<compile_context>
chip_gen: v7x
topology: tpu7x:2x2x1
jax: 0.10.0
libtpu: 0.0.40
codegen_flags: <defaults>
</compile_context>

<pallas_src>
import functools

import jax
import jax.numpy as jnp
from jax.experimental import pallas as pl
from jax.experimental.pallas import tpu as pltpu

LANE = 128                            # TPU lane width; channel dim padded to this
ACT_DTYPE = jnp.bfloat16              # inter-kernel activation dtype
VMEM_LIMIT_BYTES = 32 * 1024 * 1024   # <= physical VMEM on v5e/v6e/v7x
BN_EPS = 1e-3

# true (unpadded) channel widths of the toy backbone
C0, C_EXP, C1, C_HEAD, SE_R = 8, 32, 16, 32, 2


# ----------------------------------------------------------------------------
# Pallas kernels
# ----------------------------------------------------------------------------
def _conv1x1_bn_act_kernel(x_ref, w_ref, bias_ref, *rest, act, add_residual):
    """1x1 conv as MXU matmul; folded-BN bias + activation (+residual) epilogue.

    x_ref: (tm, Cin) bf16   w_ref: (Cin, Cout) bf16 (BN / SE scale pre-folded)
    bias_ref: (1, Cout) f32   [res_ref: (tm, Cout)]   o_ref: (tm, Cout)
    """
    o_ref = rest[-1]
    y = jnp.dot(x_ref[...], w_ref[...], preferred_element_type=jnp.float32)
    y = y + bias_ref[...]
    if act == "swish":
        y = y * jax.nn.sigmoid(y)
    if add_residual:
        y = y + rest[0][...].astype(jnp.float32)
    o_ref[...] = y.astype(o_ref.dtype)


def _conv3x3_s1_kernel(x_ref, w_ref, bias_ref, o_ref, *, act):
    """3x3 tap conv (depthwise, or full conv with Cin==1), stride 1.

    x_ref: (H+2, W+2, C) padded   w_ref: (9, Cout) (BN scale folded)
    bias_ref: (1, Cout) f32       o_ref: (H, W, Cout)
    """
    ho, wo, _ = o_ref.shape
    w = w_ref[...].astype(jnp.float32)
    b = bias_ref[...].astype(jnp.float32)
    acc = jnp.zeros(o_ref.shape, jnp.float32)
    for kh in range(3):
        for kw in range(3):
            patch = x_ref[kh:kh + ho, kw:kw + wo, :].astype(jnp.float32)
            acc = acc + patch * w[kh * 3 + kw][None, None, :]
    y = acc + b[0][None, None, :]
    if act == "swish":
        y = y * jax.nn.sigmoid(y)
    o_ref[...] = y.astype(o_ref.dtype)


def _conv3x3_s2_kernel(p00_ref, p01_ref, p10_ref, p11_ref, w_ref, bias_ref,
                       o_ref, *, act):
    """3x3 tap conv, stride 2, on a phase-decomposed (space-to-depth) input.

    p_ab[i, j, :] == x_padded[2i + a, 2j + b, :]: only the strided output is
    computed and all in-kernel slices are contiguous (no strided reads).
    """
    ho, wo, _ = o_ref.shape
    phases = ((p00_ref, p01_ref), (p10_ref, p11_ref))
    w = w_ref[...].astype(jnp.float32)
    b = bias_ref[...].astype(jnp.float32)
    acc = jnp.zeros(o_ref.shape, jnp.float32)
    for kh in range(3):
        for kw in range(3):
            ph = phases[kh % 2][kw % 2]
            patch = ph[kh // 2:kh // 2 + ho, kw // 2:kw // 2 + wo, :]
            acc = acc + patch.astype(jnp.float32) * w[kh * 3 + kw][None, None, :]
    y = acc + b[0][None, None, :]
    if act == "swish":
        y = y * jax.nn.sigmoid(y)
    o_ref[...] = y.astype(o_ref.dtype)


def _global_pool_kernel(x_ref, o_ref):
    # x_ref: (N, H*W, C) -> o_ref: (N, C)
    o_ref[...] = jnp.mean(x_ref[...].astype(jnp.float32), axis=1).astype(o_ref.dtype)


# ----------------------------------------------------------------------------
# Pallas wrappers
# ----------------------------------------------------------------------------
def conv1x1_bn_act(x_nhwc, w_eff, bias, *, act, residual=None):
    """Fused 1x1 conv + folded BN + activation (+ residual) as M-tiled matmul.

    w_eff: (Cin, Cout) shared weights, or (N, Cin, Cout) per-batch (SE-folded).
    """
    n, h, w, cin = x_nhwc.shape
    hw = h * w
    per_batch = (w_eff.ndim == 3)
    cout = w_eff.shape[-1]

    x3 = x_nhwc.reshape(n, hw, cin).astype(jnp.bfloat16)
    wmat = (w_eff if per_batch else w_eff[None]).astype(jnp.bfloat16)
    bias2 = bias.reshape(1, cout).astype(jnp.float32)

    tm = 256 if hw % 256 == 0 else hw            # M tile (rows), multiple of 8
    grid = (n, hw // tm)

    w_index = (lambda b, i: (b, 0, 0)) if per_batch else (lambda b, i: (0, 0, 0))
    in_specs = [
        pl.BlockSpec((None, tm, cin), lambda b, i: (b, i, 0)),
        pl.BlockSpec((None, cin, cout), w_index),
        pl.BlockSpec((1, cout), lambda b, i: (0, 0)),
    ]
    args = [x3, wmat, bias2]
    if residual is not None:
        in_specs.append(pl.BlockSpec((None, tm, cout), lambda b, i: (b, i, 0)))
        args.append(residual.reshape(n, hw, cout))

    out = pl.pallas_call(
        functools.partial(_conv1x1_bn_act_kernel, act=act,
                          add_residual=residual is not None),
        out_shape=jax.ShapeDtypeStruct((n, hw, cout), ACT_DTYPE),
        grid=grid,
        in_specs=in_specs,
        out_specs=pl.BlockSpec((None, tm, cout), lambda b, i: (b, i, 0)),
        compiler_params=pltpu.CompilerParams(
            dimension_semantics=("parallel", "parallel"),
            vmem_limit_bytes=VMEM_LIMIT_BYTES),
    )(*args)
    return out.reshape(n, h, w, cout)


def conv3x3_bn_act(x_nhwc, w9c, bias, *, stride, act):
    """Fused 3x3 conv (depthwise, or stem with Cin==1) + folded BN + activation.

    For stride 2 the padded input is phase-decomposed in the wrapper so the
    kernel computes exactly the strided output (no 4x waste, no strided reads).
    """
    n, h, w, cin = x_nhwc.shape
    cout = w9c.shape[-1]
    ho, wo = h // stride, w // stride
    xpad = jnp.pad(x_nhwc, ((0, 0), (1, 1), (1, 1), (0, 0)))
    bias2 = bias.reshape(1, cout).astype(jnp.float32)

    cparams = pltpu.CompilerParams(dimension_semantics=("parallel",),
                                   vmem_limit_bytes=VMEM_LIMIT_BYTES)
    w_spec = pl.BlockSpec((9, cout), lambda b: (0, 0))
    b_spec = pl.BlockSpec((1, cout), lambda b: (0, 0))
    out_spec = pl.BlockSpec((None, ho, wo, cout), lambda b: (b, 0, 0, 0))
    out_shape = jax.ShapeDtypeStruct((n, ho, wo, cout), ACT_DTYPE)

    if stride == 1:
        hp, wp = h + 2, w + 2
        return pl.pallas_call(
            functools.partial(_conv3x3_s1_kernel, act=act),
            out_shape=out_shape,
            grid=(n,),
            in_specs=[pl.BlockSpec((None, hp, wp, cin), lambda b: (b, 0, 0, 0)),
                      w_spec, b_spec],
            out_specs=out_spec,
            compiler_params=cparams,
        )(xpad, w9c, bias2)

    assert stride == 2 and h % 2 == 0 and w % 2 == 0
    # space-to-depth phases: p_ab[:, i, j, :] = xpad[:, 2i + a, 2j + b, :]
    phases = [xpad[:, a::2, b::2, :] for a in (0, 1) for b in (0, 1)]
    hp2, wp2 = h // 2 + 1, w // 2 + 1
    phase_spec = pl.BlockSpec((None, hp2, wp2, cin), lambda b: (b, 0, 0, 0))
    return pl.pallas_call(
        functools.partial(_conv3x3_s2_kernel, act=act),
        out_shape=out_shape,
        grid=(n,),
        in_specs=[phase_spec] * 4 + [w_spec, b_spec],
        out_specs=out_spec,
        compiler_params=cparams,
    )(*phases, w9c, bias2)


def global_avg_pool(x_nhwc):
    n, h, w, c = x_nhwc.shape
    return pl.pallas_call(
        _global_pool_kernel,
        out_shape=jax.ShapeDtypeStruct((n, c), jnp.float32),
        grid=(1,),
        in_specs=[pl.BlockSpec((n, h * w, c), lambda i: (0, 0, 0))],
        out_specs=pl.BlockSpec((n, c), lambda i: (0, 0)),
        compiler_params=pltpu.CompilerParams(vmem_limit_bytes=VMEM_LIMIT_BYTES),
    )(x_nhwc.reshape(n, h * w, c))


def se_scale(h_nhwc, se_p):
    """SE gate in plain JAX (a few hundred FLOPs); the resulting per-channel
    scale is folded into the projection conv's per-batch weights, so no
    standalone pool / channel-scale kernels are launched."""
    pooled = jnp.mean(h_nhwc.astype(jnp.float32), axis=(1, 2))   # (N, C)
    z = pooled @ se_p["w1"] + se_p["b1"]
    z = z * jax.nn.sigmoid(z)                                    # swish
    return jax.nn.sigmoid(z @ se_p["w2"] + se_p["b2"])           # (N, C)


# ----------------------------------------------------------------------------
# Parameter folding: BN -> conv weights/bias, kernel layouts, lane padding
# ----------------------------------------------------------------------------
def _pad_axis(a, axis, size=LANE):
    pad = [(0, 0)] * a.ndim
    pad[axis] = (0, size - a.shape[axis])
    return jnp.pad(a, pad)


def _bn_fold(bn, eps=BN_EPS):
    scale = bn["gamma"] / jnp.sqrt(bn["var"] + eps)
    bias = bn["beta"] - bn["mean"] * scale
    return scale, bias


def fold_params(p):
    """Fold BN into conv weights/bias (inference; params frozen), convert to
    kernel layouts, and zero-pad channel dims to the 128-lane width. Padded
    channels stay exactly zero through the network, so real outputs match."""

    def fold_3x3(w_c133, bn):            # (C,1,3,3) -> (9, LANE), bias (LANE,)
        scale, bias = _bn_fold(bn)
        w9c = jnp.transpose(w_c133[:, 0], (1, 2, 0)).reshape(9, -1) * scale[None, :]
        return _pad_axis(w9c, 1).astype(jnp.float32), _pad_axis(bias, 0)

    def fold_1x1(w_oi11, bn):            # (Cout,Cin,1,1) -> (LANE, LANE), bias
        scale, bias = _bn_fold(bn)
        wmat = w_oi11[:, :, 0, 0].T * scale[None, :]     # (Cin, Cout)
        wmat = _pad_axis(_pad_axis(wmat, 0), 1)
        return wmat.astype(jnp.float32), _pad_axis(bias, 0)

    def fold_se(se):
        return dict(w1=_pad_axis(se["w1"], 0), b1=se["b1"],
                    w2=_pad_axis(se["w2"], 1), b2=_pad_axis(se["b2"], 0))

    b1, b2 = p["block1"], p["block2"]
    stem_w, stem_b = fold_3x3(p["stem"]["w"], p["stem"]["bn"])
    b1_dw_w, b1_dw_b = fold_3x3(b1["dw_w"], b1["bn1"])
    b1_pw, b1_pb = fold_1x1(b1["proj_w"], b1["bn2"])
    b2_ew, b2_eb = fold_1x1(b2["exp_w"], b2["bn0"])
    b2_dw_w, b2_dw_b = fold_3x3(b2["dw_w"], b2["bn1"])
    b2_pw, b2_pb = fold_1x1(b2["proj_w"], b2["bn2"])
    head_w, head_b = fold_1x1(p["head"]["w"], p["head"]["bn"])
    return dict(
        stem_w=stem_w, stem_b=stem_b,
        b1_dw_w=b1_dw_w, b1_dw_b=b1_dw_b, b1_se=fold_se(b1["se"]),
        b1_proj_w=b1_pw, b1_proj_b=b1_pb,
        b2_exp_w=b2_ew, b2_exp_b=b2_eb,
        b2_dw_w=b2_dw_w, b2_dw_b=b2_dw_b, b2_se=fold_se(b2["se"]),
        b2_proj_w=b2_pw, b2_proj_b=b2_pb,
        head_w=head_w, head_b=head_b,
    )


# ----------------------------------------------------------------------------
# Model: stem -> MBConv x2 -> head -> avgpool -> Identity fc (extract=True)
# ----------------------------------------------------------------------------
def effnet_forward(fp, x_nchw):
    x = jnp.transpose(x_nchw, (0, 2, 3, 1)).astype(jnp.float32)   # NCHW -> NHWC

    # stem: fused conv3x3 s2 + BN + swish (im2col-free, phase-decomposed stride)
    x = conv3x3_bn_act(x, fp["stem_w"], fp["stem_b"], stride=2, act="swish")

    # block1: MBConv expand=1, stride 1, residual. SE scale and BN2 are folded
    # into per-batch projection weights; the residual add is in the epilogue.
    h = conv3x3_bn_act(x, fp["b1_dw_w"], fp["b1_dw_b"], stride=1, act="swish")
    s = se_scale(h, fp["b1_se"])                                  # (N, C)
    w_eff = s[:, :, None] * fp["b1_proj_w"][None]                 # (N, Cin, Cout)
    x = conv1x1_bn_act(h, w_eff, fp["b1_proj_b"], act="linear", residual=x)

    # block2: MBConv expand=4, stride 2
    h = conv1x1_bn_act(x, fp["b2_exp_w"], fp["b2_exp_b"], act="swish")
    h = conv3x3_bn_act(h, fp["b2_dw_w"], fp["b2_dw_b"], stride=2, act="swish")
    s = se_scale(h, fp["b2_se"])
    w_eff = s[:, :, None] * fp["b2_proj_w"][None]
    x = conv1x1_bn_act(h, w_eff, fp["b2_proj_b"], act="linear")

    # head: conv1x1 + BN + swish
    x = conv1x1_bn_act(x, fp["head_w"], fp["head_b"], act="swish")

    # global average pool; dropout is an inference no-op; _fc = Identity
    feat = global_avg_pool(x)                                     # (N, LANE) f32
    return feat[:, :C_HEAD]                                       # strip lane padding


# ----------------------------------------------------------------------------
# Deterministic parameter init (true channel widths; padding happens in fold)
# ----------------------------------------------------------------------------
def init_params(key):
    keys = iter(jax.random.split(key, 64))
    nk = lambda: next(keys)

    def conv_w(cout, cin, k):
        fan_in = cin * k * k
        return jax.random.normal(nk(), (cout, cin, k, k), jnp.float32) / jnp.sqrt(fan_in)

    def dw_w(c):
        return jax.random.normal(nk(), (c, 1, 3, 3), jnp.float32) / 3.0

    def bn(c):
        return dict(
            gamma=1.0 + 0.05 * jax.random.normal(nk(), (c,), jnp.float32),
            beta=0.05 * jax.random.normal(nk(), (c,), jnp.float32),
            mean=0.05 * jax.random.normal(nk(), (c,), jnp.float32),
            var=1.0 + 0.05 * jax.random.uniform(nk(), (c,), jnp.float32),
        )

    def se(c, cr):
        return dict(
            w1=jax.random.normal(nk(), (c, cr), jnp.float32) / jnp.sqrt(c),
            b1=jnp.zeros((cr,), jnp.float32),
            w2=jax.random.normal(nk(), (cr, c), jnp.float32) / jnp.sqrt(cr),
            b2=jnp.zeros((c,), jnp.float32),
        )

    return dict(
        stem=dict(w=conv_w(C0, 1, 3), bn=bn(C0)),
        block1=dict(dw_w=dw_w(C0), bn1=bn(C0), se=se(C0, SE_R),
                    proj_w=conv_w(C0, C0, 1), bn2=bn(C0)),
        block2=dict(exp_w=conv_w(C_EXP, C0, 1), bn0=bn(C_EXP),
                    dw_w=dw_w(C_EXP), bn1=bn(C_EXP), se=se(C_EXP, SE_R),
                    proj_w=conv_w(C1, C_EXP, 1), bn2=bn(C_EXP if False else C1)),
        head=dict(w=conv_w(C_HEAD, C1, 1), bn=bn(C_HEAD)),
    )


if __name__ == "__main__":
    key = jax.random.PRNGKey(0)
    pkey, xkey = jax.random.split(key)
    params = init_params(pkey)
    fparams = fold_params(params)   # BN fold + layout prep, once (frozen model)
    x = jax.random.normal(xkey, (2, 1, 16, 16), jnp.float32)  # NCHW, in_channels=1

    out = jax.jit(effnet_forward)(fparams, x)
    out = jax.block_until_ready(out)

    assert out.shape == (2, C_HEAD), out.shape
    assert jnp.all(jnp.isfinite(out))
    print("KERNEL_OK")
</pallas_src>

<mosaic_0001>
module attributes {stable_mosaic.version = 11 : i64} {
  func.func @_conv3x3_s2_kernel(%arg0: i32, %arg1: memref<1x9x9x1xf32, #tpu.memory_space<vmem>>, %arg2: memref<1x9x9x1xf32, #tpu.memory_space<vmem>>, %arg3: memref<1x9x9x1xf32, #tpu.memory_space<vmem>>, %arg4: memref<1x9x9x1xf32, #tpu.memory_space<vmem>>, %arg5: memref<9x128xf32, #tpu.memory_space<vmem>>, %arg6: memref<1x128xf32, #tpu.memory_space<vmem>>, %arg7: memref<1x8x8x128xbf16, #tpu.memory_space<vmem>>) attributes {dimension_semantics = [#tpu.dimension_semantics<parallel>], iteration_bounds = array<i64: 2>, scalar_prefetch = 0 : i64, scratch_operands = 0 : i64, tpu.core_type = #tpu.core_type<tc>, window_params = [{transform_indices = @transform_0, window_bounds = array<i64: 1, 9, 9, 1>}, {transform_indices = @transform_1, window_bounds = array<i64: 1, 9, 9, 1>}, {transform_indices = @transform_2, window_bounds = array<i64: 1, 9, 9, 1>}, {transform_indices = @transform_3, window_bounds = array<i64: 1, 9, 9, 1>}, {pipeline_mode = #tpu.pipeline_mode<synchronous>, transform_indices = @transform_4, window_bounds = array<i64: 9, 128>}, {pipeline_mode = #tpu.pipeline_mode<synchronous>, transform_indices = @transform_5, window_bounds = array<i64: 1, 128>}, {transform_indices = @transform_6, window_bounds = array<i64: 1, 8, 8, 128>}]} {
    %c0 = arith.constant 0 : index
    %c0_0 = arith.constant 0 : index
    %0 = vector.load %arg5[%c0, %c0_0] : memref<9x128xf32, #tpu.memory_space<vmem>>, vector<9x128xf32>
    %c0_1 = arith.constant 0 : index
    %c0_2 = arith.constant 0 : index
    %1 = vector.load %arg6[%c0_1, %c0_2] : memref<1x128xf32, #tpu.memory_space<vmem>>, vector<1x128xf32>
    %cst = arith.constant 0.000000e+00 : f32
    %2 = vector.broadcast %cst : f32 to vector<8x8x128xf32>
    %c0_3 = arith.constant 0 : index
    %c0_4 = arith.constant 0 : index
    %c0_5 = arith.constant 0 : index
    %c0_6 = arith.constant 0 : index
    %3 = vector.load %arg1[%c0_3, %c0_4, %c0_5, %c0_6] : memref<1x9x9x1xf32, #tpu.memory_space<vmem>>, vector<1x8x8x1xf32>
    %4 = vector.shape_cast %3 : vector<1x8x8x1xf32> to vector<8x8x1xf32>
    %5 = vector.extract_strided_slice %0 {offsets = [0, 0], sizes = [1, 128], strides = [1, 1]} : vector<9x128xf32> to vector<1x128xf32>
    %6 = vector.shape_cast %5 : vector<1x128xf32> to vector<128xf32>
    %7 = vector.shape_cast %6 : vector<128xf32> to vector<1x1x128xf32>
    %8 = vector.broadcast %4 : vector<8x8x1xf32> to vector<8x8x128xf32>
    %9 = vector.broadcast %7 : vector<1x1x128xf32> to vector<8x8x128xf32>
    %10 = arith.mulf %8, %9 : vector<8x8x128xf32>
    %11 = arith.addf %2, %10 : vector<8x8x128xf32>
    %c0_7 = arith.constant 0 : index
    %c0_8 = arith.constant 0 : index
    %c0_9 = arith.constant 0 : index
    %c0_10 = arith.constant 0 : index
    %12 = vector.load %arg2[%c0_7, %c0_8, %c0_9, %c0_10] : memref<1x9x9x1xf32, #tpu.memory_space<vmem>>, vector<1x8x8x1xf32>
    %13 = vector.shape_cast %12 : vector<1x8x8x1xf32> to vector<8x8x1xf32>
    %14 = vector.extract_strided_slice %0 {offsets = [1, 0], sizes = [1, 128], strides = [1, 1]} : vector<9x128xf32> to vector<1x128xf32>
    %15 = vector.shape_cast %14 : vector<1x128xf32> to vector<128xf32>
    %16 = vector.shape_cast %15 : vector<128xf32> to vector<1x1x128xf32>
    %17 = vector.broadcast %13 : vector<8x8x1xf32> to vector<8x8x128xf32>
    %18 = vector.broadcast %16 : vector<1x1x128xf32> to vector<8x8x128xf32>
    %19 = arith.mulf %17, %18 : vector<8x8x128xf32>
    %20 = arith.addf %11, %19 : vector<8x8x128xf32>
    %c0_11 = arith.constant 0 : index
    %c0_12 = arith.constant 0 : index
    %c1 = arith.constant 1 : index
    %c0_13 = arith.constant 0 : index
    %21 = vector.load %arg1[%c0_11, %c0_12, %c1, %c0_13] : memref<1x9x9x1xf32, #tpu.memory_space<vmem>>, vector<1x8x8x1xf32>
    %22 = vector.shape_cast %21 : vector<1x8x8x1xf32> to vector<8x8x1xf32>
    %23 = vector.extract_strided_slice %0 {offsets = [2, 0], sizes = [1, 128], strides = [1, 1]} : vector<9x128xf32> to vector<1x128xf32>
    %24 = vector.shape_cast %23 : vector<1x128xf32> to vector<128xf32>
    %25 = vector.shape_cast %24 : vector<128xf32> to vector<1x1x128xf32>
    %26 = vector.broadcast %22 : vector<8x8x1xf32> to vector<8x8x128xf32>
    %27 = vector.broadcast %25 : vector<1x1x128xf32> to vector<8x8x128xf32>
    %28 = arith.mulf %26, %27 : vector<8x8x128xf32>
    %29 = arith.addf %20, %28 : vector<8x8x128xf32>
    %c0_14 = arith.constant 0 : index
    %c0_15 = arith.constant 0 : index
    %c0_16 = arith.constant 0 : index
    %c0_17 = arith.constant 0 : index
    %30 = vector.load %arg3[%c0_14, %c0_15, %c0_16, %c0_17] : memref<1x9x9x1xf32, #tpu.memory_space<vmem>>, vector<1x8x8x1xf32>
    %31 = vector.shape_cast %30 : vector<1x8x8x1xf32> to vector<8x8x1xf32>
    %32 = vector.extract_strided_slice %0 {offsets = [3, 0], sizes = [1, 128], strides = [1, 1]} : vector<9x128xf32> to vector<1x128xf32>
    %33 = vector.shape_cast %32 : vector<1x128xf32> to vector<128xf32>
    %34 = vector.shape_cast %33 : vector<128xf32> to vector<1x1x128xf32>
    %35 = vector.broadcast %31 : vector<8x8x1xf32> to vector<8x8x128xf32>
    %36 = vector.broadcast %34 : vector<1x1x128xf32> to vector<8x8x128xf32>
    %37 = arith.mulf %35, %36 : vector<8x8x128xf32>
    %38 = arith.addf %29, %37 : vector<8x8x128xf32>
    %c0_18 = arith.constant 0 : index
    %c0_19 = arith.constant 0 : index
    %c0_20 = arith.constant 0 : index
    %c0_21 = arith.constant 0 : index
    %39 = vector.load %arg4[%c0_18, %c0_19, %c0_20, %c0_21] : memref<1x9x9x1xf32, #tpu.memory_space<vmem>>, vector<1x8x8x1xf32>
    %40 = vector.shape_cast %39 : vector<1x8x8x1xf32> to vector<8x8x1xf32>
    %41 = vector.extract_strided_slice %0 {offsets = [4, 0], sizes = [1, 128], strides = [1, 1]} : vector<9x128xf32> to vector<1x128xf32>
    %42 = vector.shape_cast %41 : vector<1x128xf32> to vector<128xf32>
    %43 = vector.shape_cast %42 : vector<128xf32> to vector<1x1x128xf32>
    %44 = vector.broadcast %40 : vector<8x8x1xf32> to vector<8x8x128xf32>
    %45 = vector.broadcast %43 : vector<1x1x128xf32> to vector<8x8x128xf32>
    %46 = arith.mulf %44, %45 : vector<8x8x128xf32>
    %47 = arith.addf %38, %46 : vector<8x8x128xf32>
    %c0_22 = arith.constant 0 : index
    %c0_23 = arith.constant 0 : index
    %c1_24 = arith.constant 1 : index
    %c0_25 = arith.constant 0 : index
    %48 = vector.load %arg3[%c0_22, %c0_23, %c1_24, %c0_25] : memref<1x9x9x1xf32, #tpu.memory_space<vmem>>, vector<1x8x8x1xf32>
    %49 = vector.shape_cast %48 : vector<1x8x8x1xf32> to vector<8x8x1xf32>
    %50 = vector.extract_strided_slice %0 {offsets = [5, 0], sizes = [1, 128], strides = [1, 1]} : vector<9x128xf32> to vector<1x128xf32>
    %51 = vector.shape_cast %50 : vector<1x128xf32> to vector<128xf32>
    %52 = vector.shape_cast %51 : vector<128xf32> to vector<1x1x128xf32>
    %53 = vector.broadcast %49 : vector<8x8x1xf32> to vector<8x8x128xf32>
    %54 = vector.broadcast %52 : vector<1x1x128xf32> to vector<8x8x128xf32>
    %55 = arith.mulf %53, %54 : vector<8x8x128xf32>
    %56 = arith.addf %47, %55 : vector<8x8x128xf32>
    %c0_26 = arith.constant 0 : index
    %c1_27 = arith.constant 1 : index
    %c0_28 = arith.constant 0 : index
    %c0_29 = arith.constant 0 : index
    %57 = vector.load %arg1[%c0_26, %c1_27, %c0_28, %c0_29] : memref<1x9x9x1xf32, #tpu.memory_space<vmem>>, vector<1x8x8x1xf32>
    %58 = vector.shape_cast %57 : vector<1x8x8x1xf32> to vector<8x8x1xf32>
    %59 = vector.extract_strided_slice %0 {offsets = [6, 0], sizes = [1, 128], strides = [1, 1]} : vector<9x128xf32> to vector<1x128xf32>
    %60 = vector.shape_cast %59 : vector<1x128xf32> to vector<128xf32>
    %61 = vector.shape_cast %60 : vector<128xf32> to vector<1x1x128xf32>
    %62 = vector.broadcast %58 : vector<8x8x1xf32> to vector<8x8x128xf32>
    %63 = vector.broadcast %61 : vector<1x1x128xf32> to vector<8x8x128xf32>
    %64 = arith.mulf %62, %63 : vector<8x8x128xf32>
    %65 = arith.addf %56, %64 : vector<8x8x128xf32>
    %c0_30 = arith.constant 0 : index
    %c1_31 = arith.constant 1 : index
    %c0_32 = arith.constant 0 : index
    %c0_33 = arith.constant 0 : index
    %66 = vector.load %arg2[%c0_30, %c1_31, %c0_32, %c0_33] : memref<1x9x9x1xf32, #tpu.memory_space<vmem>>, vector<1x8x8x1xf32>
    %67 = vector.shape_cast %66 : vector<1x8x8x1xf32> to vector<8x8x1xf32>
    %68 = vector.extract_strided_slice %0 {offsets = [7, 0], sizes = [1, 128], strides = [1, 1]} : vector<9x128xf32> to vector<1x128xf32>
    %69 = vector.shape_cast %68 : vector<1x128xf32> to vector<128xf32>
    %70 = vector.shape_cast %69 : vector<128xf32> to vector<1x1x128xf32>
    %71 = vector.broadcast %67 : vector<8x8x1xf32> to vector<8x8x128xf32>
    %72 = vector.broadcast %70 : vector<1x1x128xf32> to vector<8x8x128xf32>
    %73 = arith.mulf %71, %72 : vector<8x8x128xf32>
    %74 = arith.addf %65, %73 : vector<8x8x128xf32>
    %c0_34 = arith.constant 0 : index
    %c1_35 = arith.constant 1 : index
    %c1_36 = arith.constant 1 : index
    %c0_37 = arith.constant 0 : index
    %75 = vector.load %arg1[%c0_34, %c1_35, %c1_36, %c0_37] : memref<1x9x9x1xf32, #tpu.memory_space<vmem>>, vector<1x8x8x1xf32>
    %76 = vector.shape_cast %75 : vector<1x8x8x1xf32> to vector<8x8x1xf32>
    %77 = vector.extract_strided_slice %0 {offsets = [8, 0], sizes = [1, 128], strides = [1, 1]} : vector<9x128xf32> to vector<1x128xf32>
    %78 = vector.shape_cast %77 : vector<1x128xf32> to vector<128xf32>
    %79 = vector.shape_cast %78 : vector<128xf32> to vector<1x1x128xf32>
    %80 = vector.broadcast %76 : vector<8x8x1xf32> to vector<8x8x128xf32>
    %81 = vector.broadcast %79 : vector<1x1x128xf32> to vector<8x8x128xf32>
    %82 = arith.mulf %80, %81 : vector<8x8x128xf32>
    %83 = arith.addf %74, %82 : vector<8x8x128xf32>
    %84 = vector.shape_cast %1 : vector<1x128xf32> to vector<128xf32>
    %85 = vector.shape_cast %84 : vector<128xf32> to vector<1x1x128xf32>
    %86 = vector.broadcast %85 : vector<1x1x128xf32> to vector<8x8x128xf32>
    %87 = arith.addf %83, %86 : vector<8x8x128xf32>
    %88 = arith.negf %87 : vector<8x8x128xf32>
    %89 = math.exp %88 : vector<8x8x128xf32>
    %cst_38 = arith.constant 1.000000e+00 : f32
    %90 = vector.broadcast %cst_38 : f32 to vector<8x8x128xf32>
    %91 = arith.addf %90, %89 : vector<8x8x128xf32>
    %92 = arith.divf %90, %91 : vector<8x8x128xf32>
    %93 = arith.mulf %87, %92 : vector<8x8x128xf32>
    %94 = arith.truncf %93 : vector<8x8x128xf32> to vector<8x8x128xbf16>
    %c0_39 = arith.constant 0 : index
    %c0_40 = arith.constant 0 : index
    %c0_41 = arith.constant 0 : index
    %c0_42 = arith.constant 0 : index
    %95 = vector.load %arg7[%c0_39, %c0_40, %c0_41, %c0_42] : memref<1x8x8x128xbf16, #tpu.memory_space<vmem>>, vector<1x8x8x128xbf16>
    %96 = vector.shape_cast %95 : vector<1x8x8x128xbf16> to vector<8x8x128xbf16>
    %97 = vector.shape_cast %94 : vector<8x8x128xbf16> to vector<1x8x8x128xbf16>
    tpu.vector_store %arg7[%c0_39, %c0_40, %c0_41, %c0_42], %97 {strides = array<i32>} : memref<1x8x8x128xbf16, #tpu.memory_space<vmem>>, vector<1x8x8x128xbf16>,
    return
  }
  func.func @transform_0(%arg0: i32) -> (i32, i32, i32, i32) {
    %c0_i32 = arith.constant 0 : i32
    %c0_i32_0 = arith.constant 0 : i32
    %c0_i32_1 = arith.constant 0 : i32
    %c0_i32_2 = arith.constant 0 : i32
    return %arg0, %c0_i32, %c0_i32_0, %c0_i32_1 : i32, i32, i32, i32
  }
  func.func @transform_1(%arg0: i32) -> (i32, i32, i32, i32) {
    %c0_i32 = arith.constant 0 : i32
    %c0_i32_0 = arith.constant 0 : i32
    %c0_i32_1 = arith.constant 0 : i32
    %c0_i32_2 = arith.constant 0 : i32
    return %arg0, %c0_i32, %c0_i32_0, %c0_i32_1 : i32, i32, i32, i32
  }
  func.func @transform_2(%arg0: i32) -> (i32, i32, i32, i32) {
    %c0_i32 = arith.constant 0 : i32
    %c0_i32_0 = arith.constant 0 : i32
    %c0_i32_1 = arith.constant 0 : i32
    %c0_i32_2 = arith.constant 0 : i32
    return %arg0, %c0_i32, %c0_i32_0, %c0_i32_1 : i32, i32, i32, i32
  }
  func.func @transform_3(%arg0: i32) -> (i32, i32, i32, i32) {
    %c0_i32 = arith.constant 0 : i32
    %c0_i32_0 = arith.constant 0 : i32
    %c0_i32_1 = arith.constant 0 : i32
    %c0_i32_2 = arith.constant 0 : i32
    return %arg0, %c0_i32, %c0_i32_0, %c0_i32_1 : i32, i32, i32, i32
  }
  func.func @transform_4(%arg0: i32) -> (i32, i32) {
    %c0_i32 = arith.constant 0 : i32
    %c0_i32_0 = arith.constant 0 : i32
    %c0_i32_1 = arith.constant 0 : i32
    return %c0_i32, %c0_i32_0 : i32, i32
  }
  func.func @transform_5(%arg0: i32) -> (i32, i32) {
    %c0_i32 = arith.constant 0 : i32
    %c0_i32_0 = arith.constant 0 : i32
    %c0_i32_1 = arith.constant 0 : i32
    return %c0_i32, %c0_i32_0 : i32, i32
  }
  func.func @transform_6(%arg0: i32) -> (i32, i32, i32, i32) {
    %c0_i32 = arith.constant 0 : i32
    %c0_i32_0 = arith.constant 0 : i32
    %c0_i32_1 = arith.constant 0 : i32
    %c0_i32_2 = arith.constant 0 : i32
    return %arg0, %c0_i32, %c0_i32_0, %c0_i32_1 : i32, i32, i32, i32
  }
}

module attributes {stable_mosaic.version = 11 : i64} {
  func.func @_conv3x3_s1_kernel(%arg0: i32, %arg1: memref<1x10x10x128xbf16, #tpu.memory_space<vmem>>, %arg2: memref<9x128xf32, #tpu.memory_space<vmem>>, %arg3: memref<1x128xf32, #tpu.memory_space<vmem>>, %arg4: memref<1x8x8x128xbf16, #tpu.memory_space<vmem>>) attributes {dimension_semantics = [#tpu.dimension_semantics<parallel>], iteration_bounds = array<i64: 2>, scalar_prefetch = 0 : i64, scratch_operands = 0 : i64, tpu.core_type = #tpu.core_type<tc>, window_params = [{transform_indices = @transform_0, window_bounds = array<i64: 1, 10, 10, 128>}, {pipeline_mode = #tpu.pipeline_mode<synchronous>, transform_indices = @transform_1, window_bounds = array<i64: 9, 128>}, {pipeline_mode = #tpu.pipeline_mode<synchronous>, transform_indices = @transform_2, window_bounds = array<i64: 1, 128>}, {transform_indices = @transform_3, window_bounds = array<i64: 1, 8, 8, 128>}]} {
    %c0 = arith.constant 0 : index
    %c0_0 = arith.constant 0 : index
    %0 = vector.load %arg2[%c0, %c0_0] : memref<9x128xf32, #tpu.memory_space<vmem>>, vector<9x128xf32>
    %c0_1 = arith.constant 0 : index
    %c0_2 = arith.constant 0 : index
    %1 = vector.load %arg3[%c0_1, %c0_2] : memref<1x128xf32, #tpu.memory_space<vmem>>, vector<1x128xf32>
    %cst = arith.constant 0.000000e+00 : f32
    %2 = vector.broadcast %cst : f32 to vector<8x8x128xf32>
    %c0_3 = arith.constant 0 : index
    %c0_4 = arith.constant 0 : index
    %c0_5 = arith.constant 0 : index
    %c0_6 = arith.constant 0 : index
    %3 = vector.load %arg1[%c0_3, %c0_4, %c0_5, %c0_6] : memref<1x10x10x128xbf16, #tpu.memory_space<vmem>>, vector<1x8x8x128xbf16>
    %4 = vector.shape_cast %3 : vector<1x8x8x128xbf16> to vector<8x8x128xbf16>
    %5 = arith.extf %4 : vector<8x8x128xbf16> to vector<8x8x128xf32>
    %6 = vector.extract_strided_slice %0 {offsets = [0, 0], sizes = [1, 128], strides = [1, 1]} : vector<9x128xf32> to vector<1x128xf32>
    %7 = vector.shape_cast %6 : vector<1x128xf32> to vector<128xf32>
    %8 = vector.shape_cast %7 : vector<128xf32> to vector<1x1x128xf32>
    %9 = vector.broadcast %8 : vector<1x1x128xf32> to vector<8x8x128xf32>
    %10 = arith.mulf %5, %9 : vector<8x8x128xf32>
    %11 = arith.addf %2, %10 : vector<8x8x128xf32>
    %c0_7 = arith.constant 0 : index
    %c0_8 = arith.constant 0 : index
    %c1 = arith.constant 1 : index
    %c0_9 = arith.constant 0 : index
    %12 = vector.load %arg1[%c0_7, %c0_8, %c1, %c0_9] : memref<1x10x10x128xbf16, #tpu.memory_space<vmem>>, vector<1x8x8x128xbf16>
    %13 = vector.shape_cast %12 : vector<1x8x8x128xbf16> to vector<8x8x128xbf16>
    %14 = arith.extf %13 : vector<8x8x128xbf16> to vector<8x8x128xf32>
    %15 = vector.extract_strided_slice %0 {offsets = [1, 0], sizes = [1, 128], strides = [1, 1]} : vector<9x128xf32> to vector<1x128xf32>
    %16 = vector.shape_cast %15 : vector<1x128xf32> to vector<128xf32>
    %17 = vector.shape_cast %16 : vector<128xf32> to vector<1x1x128xf32>
    %18 = vector.broadcast %17 : vector<1x1x128xf32> to vector<8x8x128xf32>
    %19 = arith.mulf %14, %18 : vector<8x8x128xf32>
    %20 = arith.addf %11, %19 : vector<8x8x128xf32>
    %c0_10 = arith.constant 0 : index
    %c0_11 = arith.constant 0 : index
    %c2 = arith.constant 2 : index
    %c0_12 = arith.constant 0 : index
    %21 = vector.load %arg1[%c0_10, %c0_11, %c2, %c0_12] : memref<1x10x10x128xbf16, #tpu.memory_space<vmem>>, vector<1x8x8x128xbf16>
    %22 = vector.shape_cast %21 : vector<1x8x8x128xbf16> to vector<8x8x128xbf16>
    %23 = arith.extf %22 : vector<8x8x128xbf16> to vector<8x8x128xf32>
    %24 = vector.extract_strided_slice %0 {offsets = [2, 0], sizes = [1, 128], strides = [1, 1]} : vector<9x128xf32> to vector<1x128xf32>
    %25 = vector.shape_cast %24 : vector<1x128xf32> to vector<128xf32>
    %26 = vector.shape_cast %25 : vector<128xf32> to vector<1x1x128xf32>
    %27 = vector.broadcast %26 : vector<1x1x128xf32> to vector<8x8x128xf32>
    %28 = arith.mulf %23, %27 : vector<8x8x128xf32>
    %29 = arith.addf %20, %28 : vector<8x8x128xf32>
    %c0_13 = arith.constant 0 : index
    %c1_14 = arith.constant 1 : index
    %c0_15 = arith.constant 0 : index
    %c0_16 = arith.constant 0 : index
    %30 = vector.load %arg1[%c0_13, %c1_14, %c0_15, %c0_16] : memref<1x10x10x128xbf16, #tpu.memory_space<vmem>>, vector<1x8x8x128xbf16>
    %31 = vector.shape_cast %30 : vector<1x8x8x128xbf16> to vector<8x8x128xbf16>
    %32 = arith.extf %31 : vector<8x8x128xbf16> to vector<8x8x128xf32>
    %33 = vector.extract_strided_slice %0 {offsets = [3, 0], sizes = [1, 128], strides = [1, 1]} : vector<9x128xf32> to vector<1x128xf32>
    %34 = vector.shape_cast %33 : vector<1x128xf32> to vector<128xf32>
    %35 = vector.shape_cast %34 : vector<128xf32> to vector<1x1x128xf32>
    %36 = vector.broadcast %35 : vector<1x1x128xf32> to vector<8x8x128xf32>
    %37 = arith.mulf %32, %36 : vector<8x8x128xf32>
    %38 = arith.addf %29, %37 : vector<8x8x128xf32>
    %c0_17 = arith.constant 0 : index
    %c1_18 = arith.constant 1 : index
    %c1_19 = arith.constant 1 : index
    %c0_20 = arith.constant 0 : index
    %39 = vector.load %arg1[%c0_17, %c1_18, %c1_19, %c0_20] : memref<1x10x10x128xbf16, #tpu.memory_space<vmem>>, vector<1x8x8x128xbf16>
    %40 = vector.shape_cast %39 : vector<1x8x8x128xbf16> to vector<8x8x128xbf16>
    %41 = arith.extf %40 : vector<8x8x128xbf16> to vector<8x8x128xf32>
    %42 = vector.extract_strided_slice %0 {offsets = [4, 0], sizes = [1, 128], strides = [1, 1]} : vector<9x128xf32> to vector<1x128xf32>
    %43 = vector.shape_cast %42 : vector<1x128xf32> to vector<128xf32>
    %44 = vector.shape_cast %43 : vector<128xf32> to vector<1x1x128xf32>
    %45 = vector.broadcast %44 : vector<1x1x128xf32> to vector<8x8x128xf32>
    %46 = arith.mulf %41, %45 : vector<8x8x128xf32>
    %47 = arith.addf %38, %46 : vector<8x8x128xf32>
    %c0_21 = arith.constant 0 : index
    %c1_22 = arith.constant 1 : index
    %c2_23 = arith.constant 2 : index
    %c0_24 = arith.constant 0 : index
    %48 = vector.load %arg1[%c0_21, %c1_22, %c2_23, %c0_24] : memref<1x10x10x128xbf16, #tpu.memory_space<vmem>>, vector<1x8x8x128xbf16>
    %49 = vector.shape_cast %48 : vector<1x8x8x128xbf16> to vector<8x8x128xbf16>
    %50 = arith.extf %49 : vector<8x8x128xbf16> to vector<8x8x128xf32>
    %51 = vector.extract_strided_slice %0 {offsets = [5, 0], sizes = [1, 128], strides = [1, 1]} : vector<9x128xf32> to vector<1x128xf32>
    %52 = vector.shape_cast %51 : vector<1x128xf32> to vector<128xf32>
    %53 = vector.shape_cast %52 : vector<128xf32> to vector<1x1x128xf32>
    %54 = vector.broadcast %53 : vector<1x1x128xf32> to vector<8x8x128xf32>
    %55 = arith.mulf %50, %54 : vector<8x8x128xf32>
    %56 = arith.addf %47, %55 : vector<8x8x128xf32>
    %c0_25 = arith.constant 0 : index
    %c2_26 = arith.constant 2 : index
    %c0_27 = arith.constant 0 : index
    %c0_28 = arith.constant 0 : index
    %57 = vector.load %arg1[%c0_25, %c2_26, %c0_27, %c0_28] : memref<1x10x10x128xbf16, #tpu.memory_space<vmem>>, vector<1x8x8x128xbf16>
    %58 = vector.shape_cast %57 : vector<1x8x8x128xbf16> to vector<8x8x128xbf16>
    %59 = arith.extf %58 : vector<8x8x128xbf16> to vector<8x8x128xf32>
    %60 = vector.extract_strided_slice %0 {offsets = [6, 0], sizes = [1, 128], strides = [1, 1]} : vector<9x128xf32> to vector<1x128xf32>
    %61 = vector.shape_cast %60 : vector<1x128xf32> to vector<128xf32>
    %62 = vector.shape_cast %61 : vector<128xf32> to vector<1x1x128xf32>
    %63 = vector.broadcast %62 : vector<1x1x128xf32> to vector<8x8x128xf32>
    %64 = arith.mulf %59, %63 : vector<8x8x128xf32>
    %65 = arith.addf %56, %64 : vector<8x8x128xf32>
    %c0_29 = arith.constant 0 : index
    %c2_30 = arith.constant 2 : index
    %c1_31 = arith.constant 1 : index
    %c0_32 = arith.constant 0 : index
    %66 = vector.load %arg1[%c0_29, %c2_30, %c1_31, %c0_32] : memref<1x10x10x128xbf16, #tpu.memory_space<vmem>>, vector<1x8x8x128xbf16>
    %67 = vector.shape_cast %66 : vector<1x8x8x128xbf16> to vector<8x8x128xbf16>
    %68 = arith.extf %67 : vector<8x8x128xbf16> to vector<8x8x128xf32>
    %69 = vector.extract_strided_slice %0 {offsets = [7, 0], sizes = [1, 128], strides = [1, 1]} : vector<9x128xf32> to vector<1x128xf32>
    %70 = vector.shape_cast %69 : vector<1x128xf32> to vector<128xf32>
    %71 = vector.shape_cast %70 : vector<128xf32> to vector<1x1x128xf32>
    %72 = vector.broadcast %71 : vector<1x1x128xf32> to vector<8x8x128xf32>
    %73 = arith.mulf %68, %72 : vector<8x8x128xf32>
    %74 = arith.addf %65, %73 : vector<8x8x128xf32>
    %c0_33 = arith.constant 0 : index
    %c2_34 = arith.constant 2 : index
    %c2_35 = arith.constant 2 : index
    %c0_36 = arith.constant 0 : index
    %75 = vector.load %arg1[%c0_33, %c2_34, %c2_35, %c0_36] : memref<1x10x10x128xbf16, #tpu.memory_space<vmem>>, vector<1x8x8x128xbf16>
    %76 = vector.shape_cast %75 : vector<1x8x8x128xbf16> to vector<8x8x128xbf16>
    %77 = arith.extf %76 : vector<8x8x128xbf16> to vector<8x8x128xf32>
    %78 = vector.extract_strided_slice %0 {offsets = [8, 0], sizes = [1, 128], strides = [1, 1]} : vector<9x128xf32> to vector<1x128xf32>
    %79 = vector.shape_cast %78 : vector<1x128xf32> to vector<128xf32>
    %80 = vector.shape_cast %79 : vector<128xf32> to vector<1x1x128xf32>
    %81 = vector.broadcast %80 : vector<1x1x128xf32> to vector<8x8x128xf32>
    %82 = arith.mulf %77, %81 : vector<8x8x128xf32>
    %83 = arith.addf %74, %82 : vector<8x8x128xf32>
    %84 = vector.shape_cast %1 : vector<1x128xf32> to vector<128xf32>
    %85 = vector.shape_cast %84 : vector<128xf32> to vector<1x1x128xf32>
    %86 = vector.broadcast %85 : vector<1x1x128xf32> to vector<8x8x128xf32>
    %87 = arith.addf %83, %86 : vector<8x8x128xf32>
    %88 = arith.negf %87 : vector<8x8x128xf32>
    %89 = math.exp %88 : vector<8x8x128xf32>
    %cst_37 = arith.constant 1.000000e+00 : f32
    %90 = vector.broadcast %cst_37 : f32 to vector<8x8x128xf32>
    %91 = arith.addf %90, %89 : vector<8x8x128xf32>
    %92 = arith.divf %90, %91 : vector<8x8x128xf32>
    %93 = arith.mulf %87, %92 : vector<8x8x128xf32>
    %94 = arith.truncf %93 : vector<8x8x128xf32> to vector<8x8x128xbf16>
    %c0_38 = arith.constant 0 : index
    %c0_39 = arith.constant 0 : index
    %c0_40 = arith.constant 0 : index
    %c0_41 = arith.constant 0 : index
    %95 = vector.load %arg4[%c0_38, %c0_39, %c0_40, %c0_41] : memref<1x8x8x128xbf16, #tpu.memory_space<vmem>>, vector<1x8x8x128xbf16>
    %96 = vector.shape_cast %95 : vector<1x8x8x128xbf16> to vector<8x8x128xbf16>
    %97 = vector.shape_cast %94 : vector<8x8x128xbf16> to vector<1x8x8x128xbf16>
    tpu.vector_store %arg4[%c0_38, %c0_39, %c0_40, %c0_41], %97 {strides = array<i32>} : memref<1x8x8x128xbf16, #tpu.memory_space<vmem>>, vector<1x8x8x128xbf16>,
    return
  }
  func.func @transform_0(%arg0: i32) -> (i32, i32, i32, i32) {
    %c0_i32 = arith.constant 0 : i32
    %c0_i32_0 = arith.constant 0 : i32
    %c0_i32_1 = arith.constant 0 : i32
    %c0_i32_2 = arith.constant 0 : i32
    return %arg0, %c0_i32, %c0_i32_0, %c0_i32_1 : i32, i32, i32, i32
  }
  func.func @transform_1(%arg0: i32) -> (i32, i32) {
    %c0_i32 = arith.constant 0 : i32
    %c0_i32_0 = arith.constant 0 : i32
    %c0_i32_1 = arith.constant 0 : i32
    return %c0_i32, %c0_i32_0 : i32, i32
  }
  func.func @transform_2(%arg0: i32) -> (i32, i32) {
    %c0_i32 = arith.constant 0 : i32
    %c0_i32_0 = arith.constant 0 : i32
    %c0_i32_1 = arith.constant 0 : i32
    return %c0_i32, %c0_i32_0 : i32, i32
  }
  func.func @transform_3(%arg0: i32) -> (i32, i32, i32, i32) {
    %c0_i32 = arith.constant 0 : i32
    %c0_i32_0 = arith.constant 0 : i32
    %c0_i32_1 = arith.constant 0 : i32
    %c0_i32_2 = arith.constant 0 : i32
    return %arg0, %c0_i32, %c0_i32_0, %c0_i32_1 : i32, i32, i32, i32
  }
}

module attributes {stable_mosaic.version = 11 : i64} {
  func.func @_conv1x1_bn_act_kernel(%arg0: i32, %arg1: i32, %arg2: memref<1x64x128xbf16, #tpu.memory_space<vmem>>, %arg3: memref<1x128x128xbf16, #tpu.memory_space<vmem>>, %arg4: memref<1x128xf32, #tpu.memory_space<vmem>>, %arg5: memref<1x64x128xbf16, #tpu.memory_space<vmem>>, %arg6: memref<1x64x128xbf16, #tpu.memory_space<vmem>>) attributes {dimension_semantics = [#tpu.dimension_semantics<parallel>, #tpu.dimension_semantics<parallel>], iteration_bounds = array<i64: 2, 1>, scalar_prefetch = 0 : i64, scratch_operands = 0 : i64, tpu.core_type = #tpu.core_type<tc>, window_params = [{transform_indices = @transform_0, window_bounds = array<i64: 1, 64, 128>}, {transform_indices = @transform_1, window_bounds = array<i64: 1, 128, 128>}, {pipeline_mode = #tpu.pipeline_mode<synchronous>, transform_indices = @transform_2, window_bounds = array<i64: 1, 128>}, {transform_indices = @transform_3, window_bounds = array<i64: 1, 64, 128>}, {transform_indices = @transform_4, window_bounds = array<i64: 1, 64, 128>}]} {
    %c0 = arith.constant 0 : index
    %c0_0 = arith.constant 0 : index
    %c0_1 = arith.constant 0 : index
    %0 = vector.load %arg2[%c0, %c0_0, %c0_1] : memref<1x64x128xbf16, #tpu.memory_space<vmem>>, vector<1x64x128xbf16>
    %1 = vector.shape_cast %0 : vector<1x64x128xbf16> to vector<64x128xbf16>
    %c0_2 = arith.constant 0 : index
    %c0_3 = arith.constant 0 : index
    %c0_4 = arith.constant 0 : index
    %2 = vector.load %arg3[%c0_2, %c0_3, %c0_4] : memref<1x128x128xbf16, #tpu.memory_space<vmem>>, vector<1x128x128xbf16>
    %3 = vector.shape_cast %2 : vector<1x128x128xbf16> to vector<128x128xbf16>
    %cst = arith.constant dense<0.000000e+00> : vector<64x128xf32>
    %4 = tpu.matmul %1, %3, %cst {dimension_numbers = #tpu.dot_dimension_numbers<[1], [0], [0], [1], [0, 0, 1, 1], [], []>} : vector<64x128xbf16>, vector<128x128xbf16>, vector<64x128xf32> -> vector<64x128xf32>
    %c0_5 = arith.constant 0 : index
    %c0_6 = arith.constant 0 : index
    %5 = vector.load %arg4[%c0_5, %c0_6] : memref<1x128xf32, #tpu.memory_space<vmem>>, vector<1x128xf32>
    %6 = vector.broadcast %5 : vector<1x128xf32> to vector<64x128xf32>
    %7 = arith.addf %4, %6 : vector<64x128xf32>
    %c0_7 = arith.constant 0 : index
    %c0_8 = arith.constant 0 : index
    %c0_9 = arith.constant 0 : index
    %8 = vector.load %arg5[%c0_7, %c0_8, %c0_9] : memref<1x64x128xbf16, #tpu.memory_space<vmem>>, vector<1x64x128xbf16>
    %9 = vector.shape_cast %8 : vector<1x64x128xbf16> to vector<64x128xbf16>
    %10 = arith.extf %9 : vector<64x128xbf16> to vector<64x128xf32>
    %11 = arith.addf %7, %10 : vector<64x128xf32>
    %12 = arith.truncf %11 : vector<64x128xf32> to vector<64x128xbf16>
    %c0_10 = arith.constant 0 : index
    %c0_11 = arith.constant 0 : index
    %c0_12 = arith.constant 0 : index
    %13 = vector.load %arg6[%c0_10, %c0_11, %c0_12] : memref<1x64x128xbf16, #tpu.memory_space<vmem>>, vector<1x64x128xbf16>
    %14 = vector.shape_cast %13 : vector<1x64x128xbf16> to vector<64x128xbf16>
    %15 = vector.shape_cast %12 : vector<64x128xbf16> to vector<1x64x128xbf16>
    tpu.vector_store %arg6[%c0_10, %c0_11, %c0_12], %15 {strides = array<i32>} : memref<1x64x128xbf16, #tpu.memory_space<vmem>>, vector<1x64x128xbf16>,
    return
  }
  func.func @transform_0(%arg0: i32, %arg1: i32) -> (i32, i32, i32) {
    %c0_i32 = arith.constant 0 : i32
    %c0_i32_0 = arith.constant 0 : i32
    return %arg0, %arg1, %c0_i32 : i32, i32, i32
  }
  func.func @transform_1(%arg0: i32, %arg1: i32) -> (i32, i32, i32) {
    %c0_i32 = arith.constant 0 : i32
    %c0_i32_0 = arith.constant 0 : i32
    %c0_i32_1 = arith.constant 0 : i32
    return %arg0, %c0_i32, %c0_i32_0 : i32, i32, i32
  }
  func.func @transform_2(%arg0: i32, %arg1: i32) -> (i32, i32) {
    %c0_i32 = arith.constant 0 : i32
    %c0_i32_0 = arith.constant 0 : i32
    %c0_i32_1 = arith.constant 0 : i32
    return %c0_i32, %c0_i32_0 : i32, i32
  }
  func.func @transform_3(%arg0: i32, %arg1: i32) -> (i32, i32, i32) {
    %c0_i32 = arith.constant 0 : i32
    %c0_i32_0 = arith.constant 0 : i32
    return %arg0, %arg1, %c0_i32 : i32, i32, i32
  }
  func.func @transform_4(%arg0: i32, %arg1: i32) -> (i32, i32, i32) {
    %c0_i32 = arith.constant 0 : i32
    %c0_i32_0 = arith.constant 0 : i32
    return %arg0, %arg1, %c0_i32 : i32, i32, i32
  }
}

module attributes {stable_mosaic.version = 11 : i64} {
  func.func @_conv1x1_bn_act_kernel(%arg0: i32, %arg1: i32, %arg2: memref<1x64x128xbf16, #tpu.memory_space<vmem>>, %arg3: memref<1x128x128xbf16, #tpu.memory_space<vmem>>, %arg4: memref<1x128xf32, #tpu.memory_space<vmem>>, %arg5: memref<1x64x128xbf16, #tpu.memory_space<vmem>>) attributes {dimension_semantics = [#tpu.dimension_semantics<parallel>, #tpu.dimension_semantics<parallel>], iteration_bounds = array<i64: 2, 1>, scalar_prefetch = 0 : i64, scratch_operands = 0 : i64, tpu.core_type = #tpu.core_type<tc>, window_params = [{transform_indices = @transform_0, window_bounds = array<i64: 1, 64, 128>}, {pipeline_mode = #tpu.pipeline_mode<synchronous>, transform_indices = @transform_1, window_bounds = array<i64: 1, 128, 128>}, {pipeline_mode = #tpu.pipeline_mode<synchronous>, transform_indices = @transform_2, window_bounds = array<i64: 1, 128>}, {transform_indices = @transform_3, window_bounds = array<i64: 1, 64, 128>}]} {
    %c0 = arith.constant 0 : index
    %c0_0 = arith.constant 0 : index
    %c0_1 = arith.constant 0 : index
    %0 = vector.load %arg2[%c0, %c0_0, %c0_1] : memref<1x64x128xbf16, #tpu.memory_space<vmem>>, vector<1x64x128xbf16>
    %1 = vector.shape_cast %0 : vector<1x64x128xbf16> to vector<64x128xbf16>
    %c0_2 = arith.constant 0 : index
    %c0_3 = arith.constant 0 : index
    %c0_4 = arith.constant 0 : index
    %2 = vector.load %arg3[%c0_2, %c0_3, %c0_4] : memref<1x128x128xbf16, #tpu.memory_space<vmem>>, vector<1x128x128xbf16>
    %3 = vector.shape_cast %2 : vector<1x128x128xbf16> to vector<128x128xbf16>
    %cst = arith.constant dense<0.000000e+00> : vector<64x128xf32>
    %4 = tpu.matmul %1, %3, %cst {dimension_numbers = #tpu.dot_dimension_numbers<[1], [0], [0], [1], [0, 0, 1, 1], [], []>} : vector<64x128xbf16>, vector<128x128xbf16>, vector<64x128xf32> -> vector<64x128xf32>
    %c0_5 = arith.constant 0 : index
    %c0_6 = arith.constant 0 : index
    %5 = vector.load %arg4[%c0_5, %c0_6] : memref<1x128xf32, #tpu.memory_space<vmem>>, vector<1x128xf32>
    %6 = vector.broadcast %5 : vector<1x128xf32> to vector<64x128xf32>
    %7 = arith.addf %4, %6 : vector<64x128xf32>
    %8 = arith.negf %7 : vector<64x128xf32>
    %9 = math.exp %8 : vector<64x128xf32>
    %cst_7 = arith.constant 1.000000e+00 : f32
    %10 = vector.broadcast %cst_7 : f32 to vector<64x128xf32>
    %11 = arith.addf %10, %9 : vector<64x128xf32>
    %12 = arith.divf %10, %11 : vector<64x128xf32>
    %13 = arith.mulf %7, %12 : vector<64x128xf32>
    %14 = arith.truncf %13 : vector<64x128xf32> to vector<64x128xbf16>
    %c0_8 = arith.constant 0 : index
    %c0_9 = arith.constant 0 : index
    %c0_10 = arith.constant 0 : index
    %15 = vector.load %arg5[%c0_8, %c0_9, %c0_10] : memref<1x64x128xbf16, #tpu.memory_space<vmem>>, vector<1x64x128xbf16>
    %16 = vector.shape_cast %15 : vector<1x64x128xbf16> to vector<64x128xbf16>
    %17 = vector.shape_cast %14 : vector<64x128xbf16> to vector<1x64x128xbf16>
    tpu.vector_store %arg5[%c0_8, %c0_9, %c0_10], %17 {strides = array<i32>} : memref<1x64x128xbf16, #tpu.memory_space<vmem>>, vector<1x64x128xbf16>,
    return
  }
  func.func @transform_0(%arg0: i32, %arg1: i32) -> (i32, i32, i32) {
    %c0_i32 = arith.constant 0 : i32
    %c0_i32_0 = arith.constant 0 : i32
    return %arg0, %arg1, %c0_i32 : i32, i32, i32
  }
  func.func @transform_1(%arg0: i32, %arg1: i32) -> (i32, i32, i32) {
    %c0_i32 = arith.constant 0 : i32
    %c0_i32_0 = arith.constant 0 : i32
    %c0_i32_1 = arith.constant 0 : i32
    %c0_i32_2 = arith.constant 0 : i32
    return %c0_i32, %c0_i32_0, %c0_i32_1 : i32, i32, i32
  }
  func.func @transform_2(%arg0: i32, %arg1: i32) -> (i32, i32) {
    %c0_i32 = arith.constant 0 : i32
    %c0_i32_0 = arith.constant 0 : i32
    %c0_i32_1 = arith.constant 0 : i32
    return %c0_i32, %c0_i32_0 : i32, i32
  }
  func.func @transform_3(%arg0: i32, %arg1: i32) -> (i32, i32, i32) {
    %c0_i32 = arith.constant 0 : i32
    %c0_i32_0 = arith.constant 0 : i32
    return %arg0, %arg1, %c0_i32 : i32, i32, i32
  }
}

module attributes {stable_mosaic.version = 11 : i64} {
  func.func @_conv3x3_s2_kernel(%arg0: i32, %arg1: memref<1x5x5x128xbf16, #tpu.memory_space<vmem>>, %arg2: memref<1x5x5x128xbf16, #tpu.memory_space<vmem>>, %arg3: memref<1x5x5x128xbf16, #tpu.memory_space<vmem>>, %arg4: memref<1x5x5x128xbf16, #tpu.memory_space<vmem>>, %arg5: memref<9x128xf32, #tpu.memory_space<vmem>>, %arg6: memref<1x128xf32, #tpu.memory_space<vmem>>, %arg7: memref<1x4x4x128xbf16, #tpu.memory_space<vmem>>) attributes {dimension_semantics = [#tpu.dimension_semantics<parallel>], iteration_bounds = array<i64: 2>, scalar_prefetch = 0 : i64, scratch_operands = 0 : i64, tpu.core_type = #tpu.core_type<tc>, window_params = [{transform_indices = @transform_0, window_bounds = array<i64: 1, 5, 5, 128>}, {transform_indices = @transform_1, window_bounds = array<i64: 1, 5, 5, 128>}, {transform_indices = @transform_2, window_bounds = array<i64: 1, 5, 5, 128>}, {transform_indices = @transform_3, window_bounds = array<i64: 1, 5, 5, 128>}, {pipeline_mode = #tpu.pipeline_mode<synchronous>, transform_indices = @transform_4, window_bounds = array<i64: 9, 128>}, {pipeline_mode = #tpu.pipeline_mode<synchronous>, transform_indices = @transform_5, window_bounds = array<i64: 1, 128>}, {transform_indices = @transform_6, window_bounds = array<i64: 1, 4, 4, 128>}]} {
    %c0 = arith.constant 0 : index
    %c0_0 = arith.constant 0 : index
    %0 = vector.load %arg5[%c0, %c0_0] : memref<9x128xf32, #tpu.memory_space<vmem>>, vector<9x128xf32>
    %c0_1 = arith.constant 0 : index
    %c0_2 = arith.constant 0 : index
    %1 = vector.load %arg6[%c0_1, %c0_2] : memref<1x128xf32, #tpu.memory_space<vmem>>, vector<1x128xf32>
    %cst = arith.constant 0.000000e+00 : f32
    %2 = vector.broadcast %cst : f32 to vector<4x4x128xf32>
    %c0_3 = arith.constant 0 : index
    %c0_4 = arith.constant 0 : index
    %c0_5 = arith.constant 0 : index
    %c0_6 = arith.constant 0 : index
    %3 = vector.load %arg1[%c0_3, %c0_4, %c0_5, %c0_6] : memref<1x5x5x128xbf16, #tpu.memory_space<vmem>>, vector<1x4x4x128xbf16>
    %4 = vector.shape_cast %3 : vector<1x4x4x128xbf16> to vector<4x4x128xbf16>
    %5 = arith.extf %4 : vector<4x4x128xbf16> to vector<4x4x128xf32>
    %6 = vector.extract_strided_slice %0 {offsets = [0, 0], sizes = [1, 128], strides = [1, 1]} : vector<9x128xf32> to vector<1x128xf32>
    %7 = vector.shape_cast %6 : vector<1x128xf32> to vector<128xf32>
    %8 = vector.shape_cast %7 : vector<128xf32> to vector<1x1x128xf32>
    %9 = vector.broadcast %8 : vector<1x1x128xf32> to vector<4x4x128xf32>
    %10 = arith.mulf %5, %9 : vector<4x4x128xf32>
    %11 = arith.addf %2, %10 : vector<4x4x128xf32>
    %c0_7 = arith.constant 0 : index
    %c0_8 = arith.constant 0 : index
    %c0_9 = arith.constant 0 : index
    %c0_10 = arith.constant 0 : index
    %12 = vector.load %arg2[%c0_7, %c0_8, %c0_9, %c0_10] : memref<1x5x5x128xbf16, #tpu.memory_space<vmem>>, vector<1x4x4x128xbf16>
    %13 = vector.shape_cast %12 : vector<1x4x4x128xbf16> to vector<4x4x128xbf16>
    %14 = arith.extf %13 : vector<4x4x128xbf16> to vector<4x4x128xf32>
    %15 = vector.extract_strided_slice %0 {offsets = [1, 0], sizes = [1, 128], strides = [1, 1]} : vector<9x128xf32> to vector<1x128xf32>
    %16 = vector.shape_cast %15 : vector<1x128xf32> to vector<128xf32>
    %17 = vector.shape_cast %16 : vector<128xf32> to vector<1x1x128xf32>
    %18 = vector.broadcast %17 : vector<1x1x128xf32> to vector<4x4x128xf32>
    %19 = arith.mulf %14, %18 : vector<4x4x128xf32>
    %20 = arith.addf %11, %19 : vector<4x4x128xf32>
    %c0_11 = arith.constant 0 : index
    %c0_12 = arith.constant 0 : index
    %c1 = arith.constant 1 : index
    %c0_13 = arith.constant 0 : index
    %21 = vector.load %arg1[%c0_11, %c0_12, %c1, %c0_13] : memref<1x5x5x128xbf16, #tpu.memory_space<vmem>>, vector<1x4x4x128xbf16>
    %22 = vector.shape_cast %21 : vector<1x4x4x128xbf16> to vector<4x4x128xbf16>
    %23 = arith.extf %22 : vector<4x4x128xbf16> to vector<4x4x128xf32>
    %24 = vector.extract_strided_slice %0 {offsets = [2, 0], sizes = [1, 128], strides = [1, 1]} : vector<9x128xf32> to vector<1x128xf32>
    %25 = vector.shape_cast %24 : vector<1x128xf32> to vector<128xf32>
    %26 = vector.shape_cast %25 : vector<128xf32> to vector<1x1x128xf32>
    %27 = vector.broadcast %26 : vector<1x1x128xf32> to vector<4x4x128xf32>
    %28 = arith.mulf %23, %27 : vector<4x4x128xf32>
    %29 = arith.addf %20, %28 : vector<4x4x128xf32>
    %c0_14 = arith.constant 0 : index
    %c0_15 = arith.constant 0 : index
    %c0_16 = arith.constant 0 : index
    %c0_17 = arith.constant 0 : index
    %30 = vector.load %arg3[%c0_14, %c0_15, %c0_16, %c0_17] : memref<1x5x5x128xbf16, #tpu.memory_space<vmem>>, vector<1x4x4x128xbf16>
    %31 = vector.shape_cast %30 : vector<1x4x4x128xbf16> to vector<4x4x128xbf16>
    %32 = arith.extf %31 : vector<4x4x128xbf16> to vector<4x4x128xf32>
    %33 = vector.extract_strided_slice %0 {offsets = [3, 0], sizes = [1, 128], strides = [1, 1]} : vector<9x128xf32> to vector<1x128xf32>
    %34 = vector.shape_cast %33 : vector<1x128xf32> to vector<128xf32>
    %35 = vector.shape_cast %34 : vector<128xf32> to vector<1x1x128xf32>
    %36 = vector.broadcast %35 : vector<1x1x128xf32> to vector<4x4x128xf32>
    %37 = arith.mulf %32, %36 : vector<4x4x128xf32>
    %38 = arith.addf %29, %37 : vector<4x4x128xf32>
    %c0_18 = arith.constant 0 : index
    %c0_19 = arith.constant 0 : index
    %c0_20 = arith.constant 0 : index
    %c0_21 = arith.constant 0 : index
    %39 = vector.load %arg4[%c0_18, %c0_19, %c0_20, %c0_21] : memref<1x5x5x128xbf16, #tpu.memory_space<vmem>>, vector<1x4x4x128xbf16>
    %40 = vector.shape_cast %39 : vector<1x4x4x128xbf16> to vector<4x4x128xbf16>
    %41 = arith.extf %40 : vector<4x4x128xbf16> to vector<4x4x128xf32>
    %42 = vector.extract_strided_slice %0 {offsets = [4, 0], sizes = [1, 128], strides = [1, 1]} : vector<9x128xf32> to vector<1x128xf32>
    %43 = vector.shape_cast %42 : vector<1x128xf32> to vector<128xf32>
    %44 = vector.shape_cast %43 : vector<128xf32> to vector<1x1x128xf32>
    %45 = vector.broadcast %44 : vector<1x1x128xf32> to vector<4x4x128xf32>
    %46 = arith.mulf %41, %45 : vector<4x4x128xf32>
    %47 = arith.addf %38, %46 : vector<4x4x128xf32>
    %c0_22 = arith.constant 0 : index
    %c0_23 = arith.constant 0 : index
    %c1_24 = arith.constant 1 : index
    %c0_25 = arith.constant 0 : index
    %48 = vector.load %arg3[%c0_22, %c0_23, %c1_24, %c0_25] : memref<1x5x5x128xbf16, #tpu.memory_space<vmem>>, vector<1x4x4x128xbf16>
    %49 = vector.shape_cast %48 : vector<1x4x4x128xbf16> to vector<4x4x128xbf16>
    %50 = arith.extf %49 : vector<4x4x128xbf16> to vector<4x4x128xf32>
    %51 = vector.extract_strided_slice %0 {offsets = [5, 0], sizes = [1, 128], strides = [1, 1]} : vector<9x128xf32> to vector<1x128xf32>
    %52 = vector.shape_cast %51 : vector<1x128xf32> to vector<128xf32>
    %53 = vector.shape_cast %52 : vector<128xf32> to vector<1x1x128xf32>
    %54 = vector.broadcast %53 : vector<1x1x128xf32> to vector<4x4x128xf32>
    %55 = arith.mulf %50, %54 : vector<4x4x128xf32>
    %56 = arith.addf %47, %55 : vector<4x4x128xf32>
    %c0_26 = arith.constant 0 : index
    %c1_27 = arith.constant 1 : index
    %c0_28 = arith.constant 0 : index
    %c0_29 = arith.constant 0 : index
    %57 = vector.load %arg1[%c0_26, %c1_27, %c0_28, %c0_29] : memref<1x5x5x128xbf16, #tpu.memory_space<vmem>>, vector<1x4x4x128xbf16>
    %58 = vector.shape_cast %57 : vector<1x4x4x128xbf16> to vector<4x4x128xbf16>
    %59 = arith.extf %58 : vector<4x4x128xbf16> to vector<4x4x128xf32>
    %60 = vector.extract_strided_slice %0 {offsets = [6, 0], sizes = [1, 128], strides = [1, 1]} : vector<9x128xf32> to vector<1x128xf32>
    %61 = vector.shape_cast %60 : vector<1x128xf32> to vector<128xf32>
    %62 = vector.shape_cast %61 : vector<128xf32> to vector<1x1x128xf32>
    %63 = vector.broadcast %62 : vector<1x1x128xf32> to vector<4x4x128xf32>
    %64 = arith.mulf %59, %63 : vector<4x4x128xf32>
    %65 = arith.addf %56, %64 : vector<4x4x128xf32>
    %c0_30 = arith.constant 0 : index
    %c1_31 = arith.constant 1 : index
    %c0_32 = arith.constant 0 : index
    %c0_33 = arith.constant 0 : index
    %66 = vector.load %arg2[%c0_30, %c1_31, %c0_32, %c0_33] : memref<1x5x5x128xbf16, #tpu.memory_space<vmem>>, vector<1x4x4x128xbf16>
    %67 = vector.shape_cast %66 : vector<1x4x4x128xbf16> to vector<4x4x128xbf16>
    %68 = arith.extf %67 : vector<4x4x128xbf16> to vector<4x4x128xf32>
    %69 = vector.extract_strided_slice %0 {offsets = [7, 0], sizes = [1, 128], strides = [1, 1]} : vector<9x128xf32> to vector<1x128xf32>
    %70 = vector.shape_cast %69 : vector<1x128xf32> to vector<128xf32>
    %71 = vector.shape_cast %70 : vector<128xf32> to vector<1x1x128xf32>
    %72 = vector.broadcast %71 : vector<1x1x128xf32> to vector<4x4x128xf32>
    %73 = arith.mulf %68, %72 : vector<4x4x128xf32>
    %74 = arith.addf %65, %73 : vector<4x4x128xf32>
    %c0_34 = arith.constant 0 : index
    %c1_35 = arith.constant 1 : index
    %c1_36 = arith.constant 1 : index
    %c0_37 = arith.constant 0 : index
    %75 = vector.load %arg1[%c0_34, %c1_35, %c1_36, %c0_37] : memref<1x5x5x128xbf16, #tpu.memory_space<vmem>>, vector<1x4x4x128xbf16>
    %76 = vector.shape_cast %75 : vector<1x4x4x128xbf16> to vector<4x4x128xbf16>
    %77 = arith.extf %76 : vector<4x4x128xbf16> to vector<4x4x128xf32>
    %78 = vector.extract_strided_slice %0 {offsets = [8, 0], sizes = [1, 128], strides = [1, 1]} : vector<9x128xf32> to vector<1x128xf32>
    %79 = vector.shape_cast %78 : vector<1x128xf32> to vector<128xf32>
    %80 = vector.shape_cast %79 : vector<128xf32> to vector<1x1x128xf32>
    %81 = vector.broadcast %80 : vector<1x1x128xf32> to vector<4x4x128xf32>
    %82 = arith.mulf %77, %81 : vector<4x4x128xf32>
    %83 = arith.addf %74, %82 : vector<4x4x128xf32>
    %84 = vector.shape_cast %1 : vector<1x128xf32> to vector<128xf32>
    %85 = vector.shape_cast %84 : vector<128xf32> to vector<1x1x128xf32>
    %86 = vector.broadcast %85 : vector<1x1x128xf32> to vector<4x4x128xf32>
    %87 = arith.addf %83, %86 : vector<4x4x128xf32>
    %88 = arith.negf %87 : vector<4x4x128xf32>
    %89 = math.exp %88 : vector<4x4x128xf32>
    %cst_38 = arith.constant 1.000000e+00 : f32
    %90 = vector.broadcast %cst_38 : f32 to vector<4x4x128xf32>
    %91 = arith.addf %90, %89 : vector<4x4x128xf32>
    %92 = arith.divf %90, %91 : vector<4x4x128xf32>
    %93 = arith.mulf %87, %92 : vector<4x4x128xf32>
    %94 = arith.truncf %93 : vector<4x4x128xf32> to vector<4x4x128xbf16>
    %c0_39 = arith.constant 0 : index
    %c0_40 = arith.constant 0 : index
    %c0_41 = arith.constant 0 : index
    %c0_42 = arith.constant 0 : index
    %95 = vector.load %arg7[%c0_39, %c0_40, %c0_41, %c0_42] : memref<1x4x4x128xbf16, #tpu.memory_space<vmem>>, vector<1x4x4x128xbf16>
    %96 = vector.shape_cast %95 : vector<1x4x4x128xbf16> to vector<4x4x128xbf16>
    %97 = vector.shape_cast %94 : vector<4x4x128xbf16> to vector<1x4x4x128xbf16>
    tpu.vector_store %arg7[%c0_39, %c0_40, %c0_41, %c0_42], %97 {strides = array<i32>} : memref<1x4x4x128xbf16, #tpu.memory_space<vmem>>, vector<1x4x4x128xbf16>,
    return
  }
  func.func @transform_0(%arg0: i32) -> (i32, i32, i32, i32) {
    %c0_i32 = arith.constant 0 : i32
    %c0_i32_0 = arith.constant 0 : i32
    %c0_i32_1 = arith.constant 0 : i32
    %c0_i32_2 = arith.constant 0 : i32
    return %arg0, %c0_i32, %c0_i32_0, %c0_i32_1 : i32, i32, i32, i32
  }
  func.func @transform_1(%arg0: i32) -> (i32, i32, i32, i32) {
    %c0_i32 = arith.constant 0 : i32
    %c0_i32_0 = arith.constant 0 : i32
    %c0_i32_1 = arith.constant 0 : i32
    %c0_i32_2 = arith.constant 0 : i32
    return %arg0, %c0_i32, %c0_i32_0, %c0_i32_1 : i32, i32, i32, i32
  }
  func.func @transform_2(%arg0: i32) -> (i32, i32, i32, i32) {
    %c0_i32 = arith.constant 0 : i32
    %c0_i32_0 = arith.constant 0 : i32
    %c0_i32_1 = arith.constant 0 : i32
    %c0_i32_2 = arith.constant 0 : i32
    return %arg0, %c0_i32, %c0_i32_0, %c0_i32_1 : i32, i32, i32, i32
  }
  func.func @transform_3(%arg0: i32) -> (i32, i32, i32, i32) {
    %c0_i32 = arith.constant 0 : i32
    %c0_i32_0 = arith.constant 0 : i32
    %c0_i32_1 = arith.constant 0 : i32
    %c0_i32_2 = arith.constant 0 : i32
    return %arg0, %c0_i32, %c0_i32_0, %c0_i32_1 : i32, i32, i32, i32
  }
  func.func @transform_4(%arg0: i32) -> (i32, i32) {
    %c0_i32 = arith.constant 0 : i32
    %c0_i32_0 = arith.constant 0 : i32
    %c0_i32_1 = arith.constant 0 : i32
    return %c0_i32, %c0_i32_0 : i32, i32
  }
  func.func @transform_5(%arg0: i32) -> (i32, i32) {
    %c0_i32 = arith.constant 0 : i32
    %c0_i32_0 = arith.constant 0 : i32
    %c0_i32_1 = arith.constant 0 : i32
    return %c0_i32, %c0_i32_0 : i32, i32
  }
  func.func @transform_6(%arg0: i32) -> (i32, i32, i32, i32) {
    %c0_i32 = arith.constant 0 : i32
    %c0_i32_0 = arith.constant 0 : i32
    %c0_i32_1 = arith.constant 0 : i32
    %c0_i32_2 = arith.constant 0 : i32
    return %arg0, %c0_i32, %c0_i32_0, %c0_i32_1 : i32, i32, i32, i32
  }
}

module attributes {stable_mosaic.version = 11 : i64} {
  func.func @_global_pool_kernel(%arg0: i32, %arg1: memref<2x16x128xbf16, #tpu.memory_space<vmem>>, %arg2: memref<2x128xf32, #tpu.memory_space<vmem>>) attributes {dimension_semantics = [#tpu.dimension_semantics<arbitrary>], iteration_bounds = array<i64: 1>, scalar_prefetch = 0 : i64, scratch_operands = 0 : i64, tpu.core_type = #tpu.core_type<tc>, window_params = [{pipeline_mode = #tpu.pipeline_mode<synchronous>, transform_indices = @transform_0, window_bounds = array<i64: 2, 16, 128>}, {pipeline_mode = #tpu.pipeline_mode<synchronous>, transform_indices = @transform_1, window_bounds = array<i64: 2, 128>}]} {
    %c0 = arith.constant 0 : index
    %c0_0 = arith.constant 0 : index
    %c0_1 = arith.constant 0 : index
    %0 = vector.load %arg1[%c0, %c0_0, %c0_1] : memref<2x16x128xbf16, #tpu.memory_space<vmem>>, vector<2x16x128xbf16>
    %1 = arith.extf %0 : vector<2x16x128xbf16> to vector<2x16x128xf32>
    %cst = arith.constant dense<0.000000e+00> : vector<2x128xf32>
    %2 = vector.multi_reduction <add>, %1, %cst [1] : vector<2x16x128xf32> to vector<2x128xf32>
    %cst_2 = arith.constant 1.600000e+01 : f32
    %3 = vector.broadcast %cst_2 : f32 to vector<2x128xf32>
    %4 = arith.divf %2, %3 : vector<2x128xf32>
    %c0_3 = arith.constant 0 : index
    %c0_4 = arith.constant 0 : index
    %5 = vector.load %arg2[%c0_3, %c0_4] : memref<2x128xf32, #tpu.memory_space<vmem>>, vector<2x128xf32>
    tpu.vector_store %arg2[%c0_3, %c0_4], %4 {strides = array<i32>} : memref<2x128xf32, #tpu.memory_space<vmem>>, vector<2x128xf32>,
    return
  }
  func.func @transform_0(%arg0: i32) -> (i32, i32, i32) {
    %c0_i32 = arith.constant 0 : i32
    %c0_i32_0 = arith.constant 0 : i32
    %c0_i32_1 = arith.constant 0 : i32
    %c0_i32_2 = arith.constant 0 : i32
    return %c0_i32, %c0_i32_0, %c0_i32_1 : i32, i32, i32
  }
  func.func @transform_1(%arg0: i32) -> (i32, i32) {
    %c0_i32 = arith.constant 0 : i32
    %c0_i32_0 = arith.constant 0 : i32
    %c0_i32_1 = arith.constant 0 : i32
    return %c0_i32, %c0_i32_0 : i32, i32
  }
}

module attributes {stable_mosaic.version = 11 : i64} {
  func.func @_conv1x1_bn_act_kernel(%arg0: i32, %arg1: i32, %arg2: memref<1x16x128xbf16, #tpu.memory_space<vmem>>, %arg3: memref<1x128x128xbf16, #tpu.memory_space<vmem>>, %arg4: memref<1x128xf32, #tpu.memory_space<vmem>>, %arg5: memref<1x16x128xbf16, #tpu.memory_space<vmem>>) attributes {dimension_semantics = [#tpu.dimension_semantics<parallel>, #tpu.dimension_semantics<parallel>], iteration_bounds = array<i64: 2, 1>, scalar_prefetch = 0 : i64, scratch_operands = 0 : i64, tpu.core_type = #tpu.core_type<tc>, window_params = [{transform_indices = @transform_0, window_bounds = array<i64: 1, 16, 128>}, {transform_indices = @transform_1, window_bounds = array<i64: 1, 128, 128>}, {pipeline_mode = #tpu.pipeline_mode<synchronous>, transform_indices = @transform_2, window_bounds = array<i64: 1, 128>}, {transform_indices = @transform_3, window_bounds = array<i64: 1, 16, 128>}]} {
    %c0 = arith.constant 0 : index
    %c0_0 = arith.constant 0 : index
    %c0_1 = arith.constant 0 : index
    %0 = vector.load %arg2[%c0, %c0_0, %c0_1] : memref<1x16x128xbf16, #tpu.memory_space<vmem>>, vector<1x16x128xbf16>
    %1 = vector.shape_cast %0 : vector<1x16x128xbf16> to vector<16x128xbf16>
    %c0_2 = arith.constant 0 : index
    %c0_3 = arith.constant 0 : index
    %c0_4 = arith.constant 0 : index
    %2 = vector.load %arg3[%c0_2, %c0_3, %c0_4] : memref<1x128x128xbf16, #tpu.memory_space<vmem>>, vector<1x128x128xbf16>
    %3 = vector.shape_cast %2 : vector<1x128x128xbf16> to vector<128x128xbf16>
    %cst = arith.constant dense<0.000000e+00> : vector<16x128xf32>
    %4 = tpu.matmul %1, %3, %cst {dimension_numbers = #tpu.dot_dimension_numbers<[1], [0], [0], [1], [0, 0, 1, 1], [], []>} : vector<16x128xbf16>, vector<128x128xbf16>, vector<16x128xf32> -> vector<16x128xf32>
    %c0_5 = arith.constant 0 : index
    %c0_6 = arith.constant 0 : index
    %5 = vector.load %arg4[%c0_5, %c0_6] : memref<1x128xf32, #tpu.memory_space<vmem>>, vector<1x128xf32>
    %6 = vector.broadcast %5 : vector<1x128xf32> to vector<16x128xf32>
    %7 = arith.addf %4, %6 : vector<16x128xf32>
    %8 = arith.truncf %7 : vector<16x128xf32> to vector<16x128xbf16>
    %c0_7 = arith.constant 0 : index
    %c0_8 = arith.constant 0 : index
    %c0_9 = arith.constant 0 : index
    %9 = vector.load %arg5[%c0_7, %c0_8, %c0_9] : memref<1x16x128xbf16, #tpu.memory_space<vmem>>, vector<1x16x128xbf16>
    %10 = vector.shape_cast %9 : vector<1x16x128xbf16> to vector<16x128xbf16>
    %11 = vector.shape_cast %8 : vector<16x128xbf16> to vector<1x16x128xbf16>
    tpu.vector_store %arg5[%c0_7, %c0_8, %c0_9], %11 {strides = array<i32>} : memref<1x16x128xbf16, #tpu.memory_space<vmem>>, vector<1x16x128xbf16>,
    return
  }
  func.func @transform_0(%arg0: i32, %arg1: i32) -> (i32, i32, i32) {
    %c0_i32 = arith.constant 0 : i32
    %c0_i32_0 = arith.constant 0 : i32
    return %arg0, %arg1, %c0_i32 : i32, i32, i32
  }
  func.func @transform_1(%arg0: i32, %arg1: i32) -> (i32, i32, i32) {
    %c0_i32 = arith.constant 0 : i32
    %c0_i32_0 = arith.constant 0 : i32
    %c0_i32_1 = arith.constant 0 : i32
    return %arg0, %c0_i32, %c0_i32_0 : i32, i32, i32
  }
  func.func @transform_2(%arg0: i32, %arg1: i32) -> (i32, i32) {
    %c0_i32 = arith.constant 0 : i32
    %c0_i32_0 = arith.constant 0 : i32
    %c0_i32_1 = arith.constant 0 : i32
    return %c0_i32, %c0_i32_0 : i32, i32
  }
  func.func @transform_3(%arg0: i32, %arg1: i32) -> (i32, i32, i32) {
    %c0_i32 = arith.constant 0 : i32
    %c0_i32_0 = arith.constant 0 : i32
    return %arg0, %arg1, %c0_i32 : i32, i32, i32
  }
}

module attributes {stable_mosaic.version = 11 : i64} {
  func.func @_conv1x1_bn_act_kernel(%arg0: i32, %arg1: i32, %arg2: memref<1x16x128xbf16, #tpu.memory_space<vmem>>, %arg3: memref<1x128x128xbf16, #tpu.memory_space<vmem>>, %arg4: memref<1x128xf32, #tpu.memory_space<vmem>>, %arg5: memref<1x16x128xbf16, #tpu.memory_space<vmem>>) attributes {dimension_semantics = [#tpu.dimension_semantics<parallel>, #tpu.dimension_semantics<parallel>], iteration_bounds = array<i64: 2, 1>, scalar_prefetch = 0 : i64, scratch_operands = 0 : i64, tpu.core_type = #tpu.core_type<tc>, window_params = [{transform_indices = @transform_0, window_bounds = array<i64: 1, 16, 128>}, {pipeline_mode = #tpu.pipeline_mode<synchronous>, transform_indices = @transform_1, window_bounds = array<i64: 1, 128, 128>}, {pipeline_mode = #tpu.pipeline_mode<synchronous>, transform_indices = @transform_2, window_bounds = array<i64: 1, 128>}, {transform_indices = @transform_3, window_bounds = array<i64: 1, 16, 128>}]} {
    %c0 = arith.constant 0 : index
    %c0_0 = arith.constant 0 : index
    %c0_1 = arith.constant 0 : index
    %0 = vector.load %arg2[%c0, %c0_0, %c0_1] : memref<1x16x128xbf16, #tpu.memory_space<vmem>>, vector<1x16x128xbf16>
    %1 = vector.shape_cast %0 : vector<1x16x128xbf16> to vector<16x128xbf16>
    %c0_2 = arith.constant 0 : index
    %c0_3 = arith.constant 0 : index
    %c0_4 = arith.constant 0 : index
    %2 = vector.load %arg3[%c0_2, %c0_3, %c0_4] : memref<1x128x128xbf16, #tpu.memory_space<vmem>>, vector<1x128x128xbf16>
    %3 = vector.shape_cast %2 : vector<1x128x128xbf16> to vector<128x128xbf16>
    %cst = arith.constant dense<0.000000e+00> : vector<16x128xf32>
    %4 = tpu.matmul %1, %3, %cst {dimension_numbers = #tpu.dot_dimension_numbers<[1], [0], [0], [1], [0, 0, 1, 1], [], []>} : vector<16x128xbf16>, vector<128x128xbf16>, vector<16x128xf32> -> vector<16x128xf32>
    %c0_5 = arith.constant 0 : index
    %c0_6 = arith.constant 0 : index
    %5 = vector.load %arg4[%c0_5, %c0_6] : memref<1x128xf32, #tpu.memory_space<vmem>>, vector<1x128xf32>
    %6 = vector.broadcast %5 : vector<1x128xf32> to vector<16x128xf32>
    %7 = arith.addf %4, %6 : vector<16x128xf32>
    %8 = arith.negf %7 : vector<16x128xf32>
    %9 = math.exp %8 : vector<16x128xf32>
    %cst_7 = arith.constant 1.000000e+00 : f32
    %10 = vector.broadcast %cst_7 : f32 to vector<16x128xf32>
    %11 = arith.addf %10, %9 : vector<16x128xf32>
    %12 = arith.divf %10, %11 : vector<16x128xf32>
    %13 = arith.mulf %7, %12 : vector<16x128xf32>
    %14 = arith.truncf %13 : vector<16x128xf32> to vector<16x128xbf16>
    %c0_8 = arith.constant 0 : index
    %c0_9 = arith.constant 0 : index
    %c0_10 = arith.constant 0 : index
    %15 = vector.load %arg5[%c0_8, %c0_9, %c0_10] : memref<1x16x128xbf16, #tpu.memory_space<vmem>>, vector<1x16x128xbf16>
    %16 = vector.shape_cast %15 : vector<1x16x128xbf16> to vector<16x128xbf16>
    %17 = vector.shape_cast %14 : vector<16x128xbf16> to vector<1x16x128xbf16>
    tpu.vector_store %arg5[%c0_8, %c0_9, %c0_10], %17 {strides = array<i32>} : memref<1x16x128xbf16, #tpu.memory_space<vmem>>, vector<1x16x128xbf16>,
    return
  }
  func.func @transform_0(%arg0: i32, %arg1: i32) -> (i32, i32, i32) {
    %c0_i32 = arith.constant 0 : i32
    %c0_i32_0 = arith.constant 0 : i32
    return %arg0, %arg1, %c0_i32 : i32, i32, i32
  }
  func.func @transform_1(%arg0: i32, %arg1: i32) -> (i32, i32, i32) {
    %c0_i32 = arith.constant 0 : i32
    %c0_i32_0 = arith.constant 0 : i32
    %c0_i32_1 = arith.constant 0 : i32
    %c0_i32_2 = arith.constant 0 : i32
    return %c0_i32, %c0_i32_0, %c0_i32_1 : i32, i32, i32
  }
  func.func @transform_2(%arg0: i32, %arg1: i32) -> (i32, i32) {
    %c0_i32 = arith.constant 0 : i32
    %c0_i32_0 = arith.constant 0 : i32
    %c0_i32_1 = arith.constant 0 : i32
    return %c0_i32, %c0_i32_0 : i32, i32
  }
  func.func @transform_3(%arg0: i32, %arg1: i32) -> (i32, i32, i32) {
    %c0_i32 = arith.constant 0 : i32
    %c0_i32_0 = arith.constant 0 : i32
    return %arg0, %arg1, %c0_i32 : i32, i32, i32
  }
}

</mosaic_0001>

<bundles_post_ra>
// kernel: effnet_forward.10
= control target key start
LH: loop header
LB: loop body
LE: loop exit
PB: predicated region body
PF: predicated region fallthrough
CT: control target
= control target key end

     0   :  { %s870_s15 = smov 0   ;;  %s872_s16 = smov 0   ;;  %s933_s0 = inlined_call_operand.vmem [shape: bf16[2,64,128], index: 0, kind: input, shape index: {}]   ;;  %s934_s1 = inlined_call_operand.vmem [shape: bf16[2,128,128], index: 1, kind: input, shape index: {}]   ;;  %s935_s2 = inlined_call_operand.vmem [shape: f32[1,128], index: 2, kind: input, shape index: {}]   ;;  %s936_s3 = inlined_call_operand.vmem [shape: bf16[2,64,128], index: 3, kind: input, shape index: {}]   ;;  %s937_s4 = inlined_call_operand.vmem [shape: bf16[2,64,128], index: 4, kind: output, shape index: {}]  }
   0x1   :  { %s874_s17 = smov 0  }
   0x2 LB: > { %s26_s18 = sadd.s32 1, %s839_s16  ;;  %p647_p0 = scmp.ge.s32.totalorder %s843_s17, 1  ;;  %s843_s17 = sphi %s874_s17, %s14_s17   ;;  %s839_s16 = sphi %s872_s16, %s939_s16   ;;  %s835_s15 = sphi %s870_s15, %s938_s15  }
   0x3   : > { %p28_p1 = scmp.ge.s32.totalorder %s26_s18, 2  ;;  %p210_p2 = scmp.lt.s32.totalorder %s843_s17, 3 }
   0x5   : > { %s941_s18 = smov (%p28_p1, %s26_s18), 0  ;;  %p211_p3 = pnand %p647_p0, %p210_p2 }
   0x6   : > { %p259_p4 = scmp.lt.s32.totalorder (!%p211_p3), %s835_s15, 1  ;;  %v656_v16 = vld [vmem:[%s935_s2] ss:$0 sm:$0xff] (!%p211_p3) }
   0x7   : > { %214 = sbr.rel (%p211_p3) target bundleno = 272 (0x110), region = 36 }
   0xe   : > { %s943_s15 = smov (!%p259_p4, %s835_s15), 1 }
   0xf   : > { %s680_s19 = sshll.u32 %s943_s15, 6  ;;  %s895_s23 = sshll.u32 %s943_s15, 5 }
  0x10   : > { %s891_s22 = scalar_lea.vmem %s934_s1, %s680_s19  ;;  %s902_s26 = scalar_lea.vmem %s933_s0, %s895_s23 }
  0x11   : > { %v809_v0 = vld [vmem:[%s891_s22] sm:$0xff]   ;;  %v810_v1 = vld [vmem:[%s891_s22 + $0x8] sm:$0xff]   ;;  %v811_v2 = vld [vmem:[%s891_s22 + $0x10] sm:$0xff]   ;;  %s281_s29 = scalar_lea.vmem %s936_s3, %s895_s23  ;;  %s291_s8 = scalar_lea.vmem %s937_s4, %s895_s23 }
  0x12   : > { %745 = vmatprep.subr.bf16.mxu0 %v809_v0  ;;  %769 = vmatprep.subr.bf16.mxu1 %v809_v0  ;;  %v812_v3 = vld [vmem:[%s891_s22 + $0x18] sm:$0xff]   ;;  %v817_v4 = vld [vmem:[%s902_s26] sm:$0xff]   ;;  %v818_v5 = vld [vmem:[%s902_s26 + $0x10] sm:$0xff]  }
  0x13   : > { %746 = vmatpush3.bf16.msra.mxu0 %v809_v0  ;;  %777 = vmatpush3.bf16.msra.mxu1 %v809_v0  ;;  %v813_v6 = vld [vmem:[%s891_s22 + $0x20] sm:$0xff]   ;;  %v814_v7 = vld [vmem:[%s891_s22 + $0x28] sm:$0xff]   ;;  %v815_v8 = vld [vmem:[%s891_s22 + $0x30] sm:$0xff]  }
  0x14   : > { %747 = vmatprep.subr.bf16.mxu0 %v810_v1  ;;  %770 = vmatprep.subr.bf16.mxu1 %v810_v1  ;;  %v816_v9 = vld [vmem:[%s891_s22 + $0x38] sm:$0xff]   ;;  %v819_v10 = vld [vmem:[%s902_s26 + $0x8] sm:$0xff]   ;;  %v692_v14 = vld [vmem:[%s281_s29] sm:$0xff]  }
  0x15   : > { %761 = vmatprep.mubr.bf16.mxu0 %v817_v4  ;;  %765 = vmatprep.mubr.bf16.mxu1 %v818_v5  ;;  %v820_v11 = vld [vmem:[%s902_s26 + $0x18] sm:$0xff]   ;;  %v727_v12 = vld [vmem:[%s281_s29 + $0x8] sm:$0xff]   ;;  %v728_v15 = vld [vmem:[%s281_s29 + $0x10] sm:$0xff]   ;;  %v693_v21 = vunpack.c.l.bf16 %v692_v14  ;;  %v694_v33 = vunpack.c.h.bf16 %v692_v14 }
  0x16   : > { %v729_v13 = vld [vmem:[%s281_s29 + $0x18] sm:$0xff]   ;;  %v697_v18 = vunpack.c.l.bf16 %v727_v12  ;;  %v701_v22 = vunpack.c.l.bf16 %v728_v15  ;;  %v698_v27 = vunpack.c.h.bf16 %v727_v12  ;;  %v702_v34 = vunpack.c.h.bf16 %v728_v15 }
  0x17   : > { %748 = vmatpush3.bf16.msra.mxu0 %v810_v1  ;;  %778 = vmatpush3.bf16.msra.mxu1 %v810_v1  ;;  %v705_v20 = vunpack.c.l.bf16 %v729_v13  ;;  %v706_v28 = vunpack.c.h.bf16 %v729_v13 }
  0x18   : > { %749 = vmatprep.subr.bf16.mxu0 %v811_v2  ;;  %771 = vmatprep.subr.bf16.mxu1 %v811_v2 }
  0x1b   : > { %750 = vmatpush3.bf16.msra.mxu0 %v811_v2  ;;  %779 = vmatpush3.bf16.msra.mxu1 %v811_v2 }
  0x1c   : > { %751 = vmatprep.subr.bf16.mxu0 %v812_v3  ;;  %772 = vmatprep.subr.bf16.mxu1 %v812_v3 }
  0x1f   : > { %752 = vmatpush3.bf16.msra.mxu0 %v812_v3  ;;  %780 = vmatpush3.bf16.msra.mxu1 %v812_v3 }
  0x20   : > { %753 = vmatprep.subr.bf16.mxu0 %v813_v6  ;;  %773 = vmatprep.subr.bf16.mxu1 %v813_v6 }
  0x23   : > { %754 = vmatpush3.bf16.msra.mxu0 %v813_v6  ;;  %781 = vmatpush3.bf16.msra.mxu1 %v813_v6 }
  0x24   : > { %755 = vmatprep.subr.bf16.mxu0 %v814_v7  ;;  %774 = vmatprep.subr.bf16.mxu1 %v814_v7 }
  0x27   : > { %756 = vmatpush3.bf16.msra.mxu0 %v814_v7  ;;  %782 = vmatpush3.bf16.msra.mxu1 %v814_v7 }
  0x28   : > { %757 = vmatprep.subr.bf16.mxu0 %v815_v8  ;;  %775 = vmatprep.subr.bf16.mxu1 %v815_v8 }
  0x2b   : > { %758 = vmatpush3.bf16.msra.mxu0 %v815_v8  ;;  %783 = vmatpush3.bf16.msra.mxu1 %v815_v8 }
  0x2c   : > { %759 = vmatprep.subr.bf16.mxu0 %v816_v9  ;;  %776 = vmatprep.subr.bf16.mxu1 %v816_v9 }
  0x2f   : > { %760 = vmatpush3.bf16.msra.mxu0 %v816_v9  ;;  %784 = vmatpush3.bf16.msra.mxu1 %v816_v9 }
  0x32   : > { %762 = vmatmul.mubr.bf16.vlgmr.msra.gmra.mrb[0].mxu0 %v819_v10  ;;  %766 = vmatmul.mubr.bf16.vlgmr.msra.gmra.mrb[0].mxu1 %v820_v11 }
 0x105   : > { %v763_v17 = vpop.f32.mrb[0].mxu0  ;;  %v767_v19 = vpop.f32.mrb[0].mxu1 }
 0x106   : > { %v440_v23 = vadd.f32 %v763_v17, %v656_v16  ;;  %v456_v24 = vadd.f32 %v767_v19, %v656_v16  ;;  %v431_v25 = vpop.f32.mrb[1].mxu0  ;;  %v447_v26 = vpop.f32.mrb[1].mxu1 }
 0x107   : > { %v432_v29 = vadd.f32 %v656_v16, %v431_v25  ;;  %v448_v30 = vadd.f32 %v656_v16, %v447_v26  ;;  %v764_v31 = vpop.f32.mrb[2].mxu0  ;;  %v768_v32 = vpop.f32.mrb[2].mxu1 }
 0x108   : > { %v443_v35 = vadd.f32 %v764_v31, %v656_v16  ;;  %v459_v36 = vadd.f32 %v768_v32, %v656_v16  ;;  %v434_v37 = vpop.f32.mrb[3].mxu0  ;;  %v450_v38 = vpop.f32.mrb[3].mxu1  ;;  %v480_v41 = vadd.f32 %v697_v18, %v440_v23  ;;  %v484_v42 = vadd.f32 %v705_v20, %v456_v24 }
 0x109   : > { %v435_v39 = vadd.f32 %v656_v16, %v434_v37  ;;  %v451_v40 = vadd.f32 %v656_v16, %v450_v38  ;;  %v478_v45 = vadd.f32 %v693_v21, %v432_v29  ;;  %v482_v46 = vadd.f32 %v701_v22, %v448_v30 }
 0x10a   : > { %v481_v43 = vadd.f32 %v698_v27, %v443_v35  ;;  %v485_v44 = vadd.f32 %v706_v28, %v459_v36 }
 0x10b   : > { %v479_v47 = vadd.f32 %v694_v33, %v435_v39  ;;  %v483_v48 = vadd.f32 %v702_v34, %v451_v40 }
 0x10c   : > { %v715_v49 = vpack.c.bf16 %v481_v43, %v480_v41  ;;  %v725_v50 = vpack.c.bf16 %v485_v44, %v484_v42 }
 0x10d   : > { %v710_v51 = vpack.c.bf16 %v479_v47, %v478_v45  ;;  %v720_v52 = vpack.c.bf16 %v483_v48, %v482_v46 }
 0x10e   : > { %730 = vst [vmem:[%s291_s8 + $0x8] sm:$0xff] %v715_v49   ;;  %732 = vst [vmem:[%s291_s8 + $0x18] sm:$0xff] %v725_v50  }
 0x10f   : > { %711 = vst [vmem:[%s291_s8] sm:$0xff] %v710_v51   ;;  %731 = vst [vmem:[%s291_s8 + $0x10] sm:$0xff] %v720_v52  }
 0x110 PF: > { %s14_s17 = sadd.s32 1, %s843_s17   ;;  %s938_s15 = smov %s839_s16 }
 0x111   : > { %p11_p5 = scmp.ge.s32.totalorder %s14_s17, 4   ;;  %s939_s16 = smov %s941_s18 }
 0x113   :  { %13 = sbr.rel (!%p11_p5) target bundleno = 2 (0x2), region = 72 }

// kernel: effnet_forward.8
= control target key start
LH: loop header
LB: loop body
LE: loop exit
PB: predicated region body
PF: predicated region fallthrough
CT: control target
= control target key end

     0   :  { %s1265_s21 = smov 0   ;;  %s1536_s0 = inlined_call_operand.vmem [shape: f32[2,9,9,1], index: 0, kind: input, shape index: {}]   ;;  %s1537_s1 = inlined_call_operand.vmem [shape: f32[2,9,9,1], index: 1, kind: input, shape index: {}]   ;;  %s1538_s2 = inlined_call_operand.vmem [shape: f32[2,9,9,1], index: 2, kind: input, shape index: {}]   ;;  %s1539_s3 = inlined_call_operand.vmem [shape: f32[2,9,9,1], index: 3, kind: input, shape index: {}]   ;;  %s1540_s4 = inlined_call_operand.vmem [shape: f32[9,128], index: 4, kind: input, shape index: {}]   ;;  %s1541_s5 = inlined_call_operand.vmem [shape: f32[1,128], index: 5, kind: input, shape index: {}]   ;;  %s1542_s6 = inlined_call_operand.vmem [shape: bf16[2,8,8,128], index: 6, kind: output, shape index: {}]  }
   0x1 LB: > { %s1106_s22 = sadd.s32 4294967295, %s1227_s21   ;;  %p1110_p0 = scmp.ge.s32.totalorder %s1227_s21, 1  ;;  %s1227_s21 = sphi %s1265_s21, %s16_s21  }
   0x2   : > { %p242_p1 = scmp.lt.s32.totalorder %s1227_s21, 3 }
   0x4   : > { %p243_p2 = pnand %p1110_p0, %p242_p1 }
   0x5   : > { %p287_p3 = scmp.lt.s32.totalorder (!%p243_p2), %s1106_s22, 1  ;;  %v1229_v0 = vmov (!%p243_p2), 0   ;;  %v363_v53 = vlaneseq (!%p243_p2)  ;;  %v1432_v61 = vld [vmem:[%s1540_s4] sm:$0xff] (!%p243_p2) }
   0x6   : > { %246 = sbr.rel (%p243_p2) target bundleno = 326 (0x146), region = 44  ;;  %1188 = vset.pattern.permute.xlu1 (!%p243_p2), %v1229_v0  ;;  %1187 = vset.pattern.permute.xlu0 (!%p243_p2), %v1229_v0 }
   0x7   : > { %v1421_v56 = vshrl.u32 (!%p243_p2), %v363_v53, 7 }
   0x9   : > { %v365_v59 = vsub.s32 (!%p243_p2), 0, %v1421_v56  ;;  %v433_v60 = vsub.s32 (!%p243_p2), 1, %v1421_v56  ;;  %v569_v53 = vsub.s32 (!%p243_p2), 3, %v1421_v56 }
   0xd   : > { %s1544_s22 = smov (!%p287_p3, %s1106_s22), 1 }
   0xe   : > { %s1276_s23 = smul.u32 144, %s1544_s22  ;;  %s1153_s18 = sshll.u32 %s1544_s22, 5 }
  0x10   : > { %s1282_s26 = scalar_lea.vmem %s1536_s0, %s1276_s23  ;;  %s1315_s29 = scalar_lea.vmem %s1537_s1, %s1276_s23 }
  0x11   : > { %v1285_v1 = vld [vmem:[%s1282_s26 + $0x20] sm:$0xff]  ;;  %v1290_v3 = vld [vmem:[%s1282_s26 + $0x30] sm:$0xff]  ;;  %s1379_s8 = scalar_lea.vmem %s1538_s2, %s1276_s23  ;;  %s306_s11 = scalar_lea.vmem %s1539_s3, %s1276_s23 }
  0x12   : > { %v315_v2 = vld [vmem:[%s1282_s26] sm:$0xff]  ;;  %335 = vperm.xlu1 %1188, %v1285_v1   ;;  %v1293_v4 = vld [vmem:[%s1282_s26 + $0x10] sm:$0xff]  ;;  %s311_s23 = scalar_lea.vmem %s1542_s6, %s1153_s18 }
  0x13   : > { %325 = vperm.xlu0 %1187, %v315_v2   ;;  %v1298_v5 = vld [vmem:[%s1282_s26 + $0x50] sm:$0xff]  ;;  %v1301_v6 = vld [vmem:[%s1282_s26 + $0x40] sm:$0xff]  ;;  %v434_v2 = vrot.slane %v1432_v61, %v433_v60 }
  0x14   : > { %v1306_v7 = vld [vmem:[%s1282_s26 + $0x70] sm:$0xff]  ;;  %v1309_v8 = vld [vmem:[%s1282_s26 + $0x60] sm:$0xff] }
  0x15   : > { %v1320_v9 = vld [vmem:[%s1315_s29 + $0x10] sm:$0xff]  ;;  %v383_v10 = vld [vmem:[%s1315_s29] sm:$0xff] }
  0x16   : > { %340 = vperm.xlu1 %1188, %v1290_v3   ;;  %v1325_v11 = vld [vmem:[%s1315_s29 + $0x30] sm:$0xff]  ;;  %v1328_v12 = vld [vmem:[%s1315_s29 + $0x20] sm:$0xff] }
  0x17   : > { %330 = vperm.xlu0 %1187, %v1293_v4   ;;  %v1333_v13 = vld [vmem:[%s1315_s29 + $0x50] sm:$0xff]  ;;  %v1336_v14 = vld [vmem:[%s1315_s29 + $0x40] sm:$0xff] }
  0x18   : > { %v1341_v15 = vld [vmem:[%s1315_s29 + $0x70] sm:$0xff]  ;;  %v1344_v16 = vld [vmem:[%s1315_s29 + $0x60] sm:$0xff] }
  0x19   : > { %v1349_v17 = vld [vmem:[%s1282_s26 + $0x11] sm:$0xff]  ;;  %v451_v18 = vld [vmem:[%s1282_s26 + $0x1] sm:$0xff] }
  0x1a   : > { %350 = vperm.xlu1 %1188, %v1298_v5   ;;  %v1354_v19 = vld [vmem:[%s1282_s26 + $0x31] sm:$0xff]  ;;  %v1357_v20 = vld [vmem:[%s1282_s26 + $0x21] sm:$0xff] }
  0x1b   : > { %345 = vperm.xlu0 %1187, %v1301_v6   ;;  %v1362_v21 = vld [vmem:[%s1282_s26 + $0x51] sm:$0xff]  ;;  %v1365_v22 = vld [vmem:[%s1282_s26 + $0x41] sm:$0xff] }
  0x1c   : > { %v1370_v23 = vld [vmem:[%s1282_s26 + $0x71] sm:$0xff]  ;;  %v1373_v24 = vld [vmem:[%s1282_s26 + $0x61] sm:$0xff] }
  0x1d   : > { %v520_v25 = vld [vmem:[%s1379_s8 + $0x10] sm:$0xff]  ;;  %v519_v26 = vld [vmem:[%s1379_s8] sm:$0xff] }
  0x1e   : > { %360 = vperm.xlu1 %1188, %v1306_v7   ;;  %v522_v27 = vld [vmem:[%s1379_s8 + $0x30] sm:$0xff]  ;;  %v521_v28 = vld [vmem:[%s1379_s8 + $0x20] sm:$0xff] }
  0x1f   : > { %355 = vperm.xlu0 %1187, %v1309_v8   ;;  %v524_v29 = vld [vmem:[%s1379_s8 + $0x50] sm:$0xff]  ;;  %v523_v30 = vld [vmem:[%s1379_s8 + $0x40] sm:$0xff] }
  0x20   : > { %v526_v31 = vld [vmem:[%s1379_s8 + $0x70] sm:$0xff]  ;;  %v525_v32 = vld [vmem:[%s1379_s8 + $0x60] sm:$0xff] }
  0x21   : > { %v588_v33 = vld [vmem:[%s306_s11 + $0x10] sm:$0xff]  ;;  %v587_v34 = vld [vmem:[%s306_s11] sm:$0xff] }
  0x22   : > { %398 = vperm.xlu1 %1188, %v1320_v9   ;;  %v590_v35 = vld [vmem:[%s306_s11 + $0x30] sm:$0xff]  ;;  %v589_v36 = vld [vmem:[%s306_s11 + $0x20] sm:$0xff] }
  0x23   : > { %393 = vperm.xlu0 %1187, %v383_v10   ;;  %v592_v37 = vld [vmem:[%s306_s11 + $0x50] sm:$0xff]  ;;  %v591_v38 = vld [vmem:[%s306_s11 + $0x40] sm:$0xff] }
  0x24   : > { %v594_v39 = vld [vmem:[%s306_s11 + $0x70] sm:$0xff]  ;;  %v593_v40 = vld [vmem:[%s306_s11 + $0x60] sm:$0xff] }
  0x25   : > { %v656_v41 = vld [vmem:[%s1379_s8 + $0x11] sm:$0xff]  ;;  %v655_v42 = vld [vmem:[%s1379_s8 + $0x1] sm:$0xff] }
  0x26   : > { %408 = vperm.xlu1 %1188, %v1325_v11   ;;  %v658_v43 = vld [vmem:[%s1379_s8 + $0x31] sm:$0xff]  ;;  %v657_v44 = vld [vmem:[%s1379_s8 + $0x21] sm:$0xff] }
  0x27   : > { %403 = vperm.xlu0 %1187, %v1328_v12   ;;  %v660_v45 = vld [vmem:[%s1379_s8 + $0x51] sm:$0xff]  ;;  %v659_v46 = vld [vmem:[%s1379_s8 + $0x41] sm:$0xff] }
  0x28   : > { %v662_v47 = vld [vmem:[%s1379_s8 + $0x71] sm:$0xff]  ;;  %v661_v48 = vld [vmem:[%s1379_s8 + $0x61] sm:$0xff] }
  0x29   : > { %v1124_v49 = vld [vmem:[%s1282_s26 + $0x80] sm:$0xff] }
  0x2a   : > { %418 = vperm.xlu1 %1188, %v1333_v13   ;;  %v1132_v50 = vld [vmem:[%s1315_s29 + $0x80] sm:$0xff] }
  0x2b   : > { %413 = vperm.xlu0 %1187, %v1336_v14   ;;  %v1140_v62 = vld [vmem:[%s1282_s26 + $0x81] sm:$0xff] }
  0x2e   : > { %428 = vperm.xlu1 %1188, %v1341_v15  }
  0x2f   : > { %423 = vperm.xlu0 %1187, %v1344_v16  }
  0x32   : > { %466 = vperm.xlu1 %1188, %v1349_v17  }
  0x33   : > { %461 = vperm.xlu0 %1187, %v451_v18  }
  0x36   : > { %476 = vperm.xlu1 %1188, %v1354_v19  }
  0x37   : > { %471 = vperm.xlu0 %1187, %v1357_v20  }
  0x3a   : > { %486 = vperm.xlu1 %1188, %v1362_v21  }
  0x3b   : > { %481 = vperm.xlu0 %1187, %v1365_v22  }
  0x3e   : > { %496 = vperm.xlu1 %1188, %v1370_v23  }
  0x3f   : > { %491 = vperm.xlu0 %1187, %v1373_v24  }
  0x42   : > { %534 = vperm.xlu1 %1188, %v520_v25  }
  0x43   : > { %529 = vperm.xlu0 %1187, %v519_v26  }
  0x46   : > { %544 = vperm.xlu1 %1188, %v522_v27  }
  0x47   : > { %539 = vperm.xlu0 %1187, %v521_v28  }
  0x4a   : > { %554 = vperm.xlu1 %1188, %v524_v29  }
  0x4b   : > { %549 = vperm.xlu0 %1187, %v523_v30  }
  0x4e   : > { %564 = vperm.xlu1 %1188, %v526_v31  }
  0x4f   : > { %559 = vperm.xlu0 %1187, %v525_v32  }
  0x52   : > { %602 = vperm.xlu1 %1188, %v588_v33  }
  0x53   : > { %597 = vperm.xlu0 %1187, %v587_v34  }
  0x56   : > { %612 = vperm.xlu1 %1188, %v590_v35  }
  0x57   : > { %607 = vperm.xlu0 %1187, %v589_v36  }
  0x5a   : > { %622 = vperm.xlu1 %1188, %v592_v37  }
  0x5b   : > { %617 = vperm.xlu0 %1187, %v591_v38  }
  0x5e   : > { %632 = vperm.xlu1 %1188, %v594_v39  }
  0x5f   : > { %627 = vperm.xlu0 %1187, %v593_v40  }
  0x62   : > { %670 = vperm.xlu1 %1188, %v656_v41  }
  0x63   : > { %665 = vperm.xlu0 %1187, %v655_v42  }
  0x66   : > { %680 = vperm.xlu1 %1188, %v658_v43  }
  0x67   : > { %675 = vperm.xlu0 %1187, %v657_v44  }
  0x6a   : > { %690 = vperm.xlu1 %1188, %v660_v45  }
  0x6b   : > { %685 = vperm.xlu0 %1187, %v659_v46  }
  0x6e   : > { %700 = vperm.xlu1 %1188, %v662_v47  }
  0x6f   : > { %695 = vperm.xlu0 %1187, %v661_v48  }
  0x72   : > { %739 = vperm.xlu1 %1188, %v1285_v1   ;;  %v366_v1 = vrot.slane %v1432_v61, %v365_v59 }
  0x73   : > { %734 = vperm.xlu0 %1187, %v1293_v4  }
  0x76   : > { %749 = vperm.xlu1 %1188, %v1301_v6  }
  0x77   : > { %744 = vperm.xlu0 %1187, %v1290_v3  }
  0x7a   : > { %759 = vperm.xlu1 %1188, %v1309_v8  }
  0x7b   : > { %754 = vperm.xlu0 %1187, %v1298_v5  }
  0x7e   : > { %769 = vperm.xlu1 %1188, %v1124_v49  }
  0x7f   : > { %764 = vperm.xlu0 %1187, %v1306_v7  }
  0x82   : > { %808 = vperm.xlu1 %1188, %v1328_v12  }
  0x83   : > { %803 = vperm.xlu0 %1187, %v1320_v9  }
  0x86   : > { %818 = vperm.xlu1 %1188, %v1336_v14  }
  0x87   : > { %813 = vperm.xlu0 %1187, %v1325_v11  }
  0x8a   : > { %828 = vperm.xlu1 %1188, %v1344_v16  }
  0x8b   : > { %823 = vperm.xlu0 %1187, %v1333_v13  }
  0x8e   : > { %838 = vperm.xlu1 %1188, %v1132_v50  }
  0x8f   : > { %833 = vperm.xlu0 %1187, %v1341_v15  }
  0x91   : > { %v336_v51 = vpop.permute.xlu1 %335 }
  0x92   : > { %v326_v52 = vpop.permute.xlu0 %325  ;;  %876 = vperm.xlu1 %1188, %v1357_v20   ;;  %v369_v13 = vmul.f32 %v366_v1, %v336_v51 }
  0x93   : > { %871 = vperm.xlu0 %1187, %v1349_v17   ;;  %v367_v5 = vmul.f32 %v366_v1, %v326_v52 }
  0x95   : > { %v341_v54 = vpop.permute.xlu1 %340 }
  0x96   : > { %v331_v55 = vpop.permute.xlu0 %330  ;;  %886 = vperm.xlu1 %1188, %v1365_v22   ;;  %v370_v14 = vmul.f32 %v366_v1, %v341_v54 }
  0x97   : > { %881 = vperm.xlu0 %1187, %v1354_v19   ;;  %v368_v6 = vmul.f32 %v366_v1, %v331_v55 }
  0x99   : > { %v351_v57 = vpop.permute.xlu1 %350 }
  0x9a   : > { %v346_v58 = vpop.permute.xlu0 %345  ;;  %896 = vperm.xlu1 %1188, %v1373_v24   ;;  %v372_v22 = vmul.f32 %v366_v1, %v351_v57 }
  0x9b   : > { %891 = vperm.xlu0 %1187, %v1362_v21   ;;  %v501_v21 = vsub.s32 2, %v1421_v56 }
  0x9d   : > { %v361_v63 = vpop.permute.xlu1 %360  ;;  %v502_v30 = vrot.slane %v1432_v61, %v501_v21 }
  0x9e   : > { %v356_v0 = vpop.permute.xlu0 %355  ;;  %906 = vperm.xlu1 %1188, %v1140_v62   ;;  %v374_v31 = vmul.f32 %v366_v1, %v361_v63  ;;  %v570_v62 = vrot.slane %v1432_v61, %v569_v53  ;;  %v705_v53 = vsub.s32 5, %v1421_v56 }
  0x9f   : > { %901 = vperm.xlu0 %1187, %v1370_v23   ;;  %v371_v23 = vmul.f32 %v366_v1, %v346_v58  ;;  %v373_v32 = vmul.f32 %v366_v1, %v356_v0 }
  0xa1   : > { %v399_v3 = vpop.permute.xlu1 %398 }
  0xa2   : > { %v394_v4 = vpop.permute.xlu0 %393  ;;  %v436_v7 = vmul.f32 %v434_v2, %v399_v3 }
  0xa3   : > { %v435_v8 = vmul.f32 %v434_v2, %v394_v4 }
  0xa4   : > { %v444_v9 = vadd.f32 %v436_v7, %v368_v6 }
  0xa5   : > { %v443_v10 = vadd.f32 %v435_v8, %v367_v5  ;;  %v409_v11 = vpop.permute.xlu1 %408 }
  0xa6   : > { %v404_v12 = vpop.permute.xlu0 %403  ;;  %v438_v15 = vmul.f32 %v434_v2, %v409_v11 }
  0xa7   : > { %v437_v16 = vmul.f32 %v434_v2, %v404_v12 }
  0xa8   : > { %v446_v17 = vadd.f32 %v438_v15, %v370_v14 }
  0xa9   : > { %v445_v18 = vadd.f32 %v437_v16, %v369_v13  ;;  %v419_v19 = vpop.permute.xlu1 %418 }
  0xaa   : > { %v414_v20 = vpop.permute.xlu0 %413  ;;  %v440_v24 = vmul.f32 %v434_v2, %v419_v19 }
  0xab   : > { %v439_v25 = vmul.f32 %v434_v2, %v414_v20 }
  0xac   : > { %v448_v26 = vadd.f32 %v440_v24, %v372_v22 }
  0xad   : > { %v447_v27 = vadd.f32 %v439_v25, %v371_v23  ;;  %v429_v28 = vpop.permute.xlu1 %428 }
  0xae   : > { %v424_v29 = vpop.permute.xlu0 %423  ;;  %v442_v33 = vmul.f32 %v434_v2, %v429_v28 }
  0xaf   : > { %v441_v34 = vmul.f32 %v434_v2, %v424_v29 }
  0xb0   : > { %v450_v35 = vadd.f32 %v442_v33, %v374_v31 }
  0xb1   : > { %v449_v36 = vadd.f32 %v441_v34, %v373_v32  ;;  %v467_v37 = vpop.permute.xlu1 %466 }
  0xb2   : > { %v462_v38 = vpop.permute.xlu0 %461  ;;  %v504_v39 = vmul.f32 %v502_v30, %v467_v37 }
  0xb3   : > { %v503_v40 = vmul.f32 %v502_v30, %v462_v38 }
  0xb4   : > { %v512_v41 = vadd.f32 %v504_v39, %v444_v9 }
  0xb5   : > { %v511_v42 = vadd.f32 %v503_v40, %v443_v10  ;;  %v477_v43 = vpop.permute.xlu1 %476 }
  0xb6   : > { %v472_v44 = vpop.permute.xlu0 %471  ;;  %v506_v45 = vmul.f32 %v502_v30, %v477_v43 }
  0xb7   : > { %v505_v46 = vmul.f32 %v502_v30, %v472_v44 }
  0xb8   : > { %v514_v47 = vadd.f32 %v506_v45, %v446_v17 }
  0xb9   : > { %v513_v48 = vadd.f32 %v505_v46, %v445_v18  ;;  %v487_v49 = vpop.permute.xlu1 %486 }
  0xba   : > { %v482_v50 = vpop.permute.xlu0 %481  ;;  %v508_v51 = vmul.f32 %v502_v30, %v487_v49  ;;  %v637_v49 = vsub.s32 4, %v1421_v56 }
  0xbb   : > { %v507_v52 = vmul.f32 %v502_v30, %v482_v50 }
  0xbc   : > { %v516_v54 = vadd.f32 %v508_v51, %v448_v26 }
  0xbd   : > { %v515_v55 = vadd.f32 %v507_v52, %v447_v27  ;;  %v497_v57 = vpop.permute.xlu1 %496  ;;  %v638_v52 = vrot.slane %v1432_v61, %v637_v49 }
  0xbe   : > { %v492_v58 = vpop.permute.xlu0 %491  ;;  %v510_v59 = vmul.f32 %v502_v30, %v497_v57 }
  0xbf   : > { %v509_v60 = vmul.f32 %v502_v30, %v492_v58 }
  0xc0   : > { %v518_v63 = vadd.f32 %v510_v59, %v450_v35 }
  0xc1   : > { %v517_v0 = vadd.f32 %v509_v60, %v449_v36  ;;  %v535_v1 = vpop.permute.xlu1 %534 }
  0xc2   : > { %v530_v2 = vpop.permute.xlu0 %529  ;;  %v572_v3 = vmul.f32 %v570_v62, %v535_v1 }
  0xc3   : > { %v571_v4 = vmul.f32 %v570_v62, %v530_v2 }
  0xc4   : > { %v1442_v5 = vadd.f32 %v572_v3, %v512_v41 }
  0xc5   : > { %v1444_v6 = vadd.f32 %v571_v4, %v511_v42  ;;  %v545_v7 = vpop.permute.xlu1 %544 }
  0xc6   : > { %v540_v8 = vpop.permute.xlu0 %539  ;;  %v574_v9 = vmul.f32 %v570_v62, %v545_v7 }
  0xc7   : > { %v573_v10 = vmul.f32 %v570_v62, %v540_v8 }
  0xc8   : > { %v1446_v11 = vadd.f32 %v574_v9, %v514_v47 }
  0xc9   : > { %v1448_v12 = vadd.f32 %v573_v10, %v513_v48  ;;  %v555_v13 = vpop.permute.xlu1 %554 }
  0xca   : > { %v550_v14 = vpop.permute.xlu0 %549  ;;  %v576_v15 = vmul.f32 %v570_v62, %v555_v13 }
  0xcb   : > { %v575_v16 = vmul.f32 %v570_v62, %v550_v14 }
  0xcc   : > { %v584_v17 = vadd.f32 %v576_v15, %v516_v54  ;;  %v774_v54 = vsub.s32 6, %v1421_v56 }
  0xcd   : > { %v583_v18 = vadd.f32 %v575_v16, %v515_v55  ;;  %v565_v19 = vpop.permute.xlu1 %564  ;;  %v843_v55 = vsub.s32 7, %v1421_v56 }
  0xce   : > { %v560_v20 = vpop.permute.xlu0 %559  ;;  %v578_v21 = vmul.f32 %v570_v62, %v565_v19  ;;  %v1465_v3 = vrot.slane %v1432_v61, %v774_v54 }
  0xcf   : > { %v577_v22 = vmul.f32 %v570_v62, %v560_v20  ;;  %v706_v62 = vrot.slane %v1432_v61, %v705_v53  ;;  %v1468_v8 = vrot.slane %v1432_v61, %v843_v55 }
  0xd0   : > { %v586_v23 = vadd.f32 %v578_v21, %v518_v63 }
  0xd1   : > { %v585_v24 = vadd.f32 %v577_v22, %v517_v0  ;;  %v603_v25 = vpop.permute.xlu1 %602 }
  0xd2   : > { %v598_v26 = vpop.permute.xlu0 %597  ;;  %v640_v59 = vmul.f32 %v638_v52, %v603_v25 }
  0xd3   : > { %v639_v60 = vmul.f32 %v638_v52, %v598_v26 }
  0xd4   : > { %v648_v10 = vadd.f32 %v640_v59, %v1442_v5 }
  0xd5   : > { %v613_v27 = vpop.permute.xlu1 %612  ;;  %v647_v13 = vadd.f32 %v639_v60, %v1444_v6 }
  0xd6   : > { %v608_v28 = vpop.permute.xlu0 %607  ;;  %v642_v63 = vmul.f32 %v638_v52, %v613_v27 }
  0xd7   : > { %v641_v0 = vmul.f32 %v638_v52, %v608_v28 }
  0xd8   : > { %v650_v16 = vadd.f32 %v642_v63, %v1446_v11 }
  0xd9   : > { %v623_v29 = vpop.permute.xlu1 %622  ;;  %v649_v19 = vadd.f32 %v641_v0, %v1448_v12 }
  0xda   : > { %v618_v30 = vpop.permute.xlu0 %617  ;;  %v644_v1 = vmul.f32 %v638_v52, %v623_v29 }
  0xdb   : > { %v643_v2 = vmul.f32 %v638_v52, %v618_v30 }
  0xdc   : > { %v652_v22 = vadd.f32 %v644_v1, %v584_v17 }
  0xdd   : > { %v633_v31 = vpop.permute.xlu1 %632  ;;  %v651_v25 = vadd.f32 %v643_v2, %v583_v18 }
  0xde   : > { %v628_v32 = vpop.permute.xlu0 %627  ;;  %v646_v4 = vmul.f32 %v638_v52, %v633_v31 }
  0xdf   : > { %v645_v7 = vmul.f32 %v638_v52, %v628_v32 }
  0xe0   : > { %v654_v27 = vadd.f32 %v646_v4, %v586_v23  ;;  %v1485_v23 = vld [vmem:[%s1540_s4 + $0x8] ss:$0 sm:$0xff] }
  0xe1   : > { %v671_v33 = vpop.permute.xlu1 %670  ;;  %v653_v28 = vadd.f32 %v645_v7, %v585_v24 }
  0xe2   : > { %v666_v34 = vpop.permute.xlu0 %665  ;;  %v708_v14 = vmul.f32 %v706_v62, %v671_v33 }
  0xe3   : > { %v707_v15 = vmul.f32 %v706_v62, %v666_v34 }
  0xe4   : > { %v716_v31 = vadd.f32 %v708_v14, %v648_v10 }
  0xe5   : > { %v681_v35 = vpop.permute.xlu1 %680  ;;  %v715_v32 = vadd.f32 %v707_v15, %v647_v13 }
  0xe6   : > { %v676_v36 = vpop.permute.xlu0 %675  ;;  %v710_v20 = vmul.f32 %v706_v62, %v681_v35 }
  0xe7   : > { %v709_v21 = vmul.f32 %v706_v62, %v676_v36 }
  0xe8   : > { %v718_v33 = vadd.f32 %v710_v20, %v650_v16 }
  0xe9   : > { %v691_v37 = vpop.permute.xlu1 %690  ;;  %v717_v34 = vadd.f32 %v709_v21, %v649_v19 }
  0xea   : > { %v686_v38 = vpop.permute.xlu0 %685  ;;  %v712_v29 = vmul.f32 %v706_v62, %v691_v37 }
  0xeb   : > { %v711_v5 = vmul.f32 %v706_v62, %v686_v38 }
  0xec   : > { %v720_v38 = vadd.f32 %v712_v29, %v652_v22 }
  0xed   : > { %v701_v39 = vpop.permute.xlu1 %700 }
  0xee   : > { %v696_v40 = vpop.permute.xlu0 %695  ;;  %v714_v24 = vmul.f32 %v706_v62, %v701_v39 }
  0xef   : > { %v713_v35 = vmul.f32 %v706_v62, %v696_v40 }
  0xf1   : > { %v740_v41 = vpop.permute.xlu1 %739  ;;  %v721_v59 = vadd.f32 %v713_v35, %v653_v28 }
  0xf2   : > { %v735_v42 = vpop.permute.xlu0 %734  ;;  %v777_v61 = vmul.f32 %v1465_v3, %v740_v41  ;;  %v719_v41 = vadd.f32 %v711_v5, %v651_v25 }
  0xf3   : > { %v776_v26 = vmul.f32 %v1465_v3, %v735_v42 }
  0xf4   : > { %v785_v36 = vadd.f32 %v777_v61, %v716_v31 }
  0xf5   : > { %v750_v43 = vpop.permute.xlu1 %749  ;;  %v784_v37 = vadd.f32 %v776_v26, %v715_v32 }
  0xf6   : > { %v745_v44 = vpop.permute.xlu0 %744  ;;  %v779_v17 = vmul.f32 %v1465_v3, %v750_v43 }
  0xf7   : > { %v778_v18 = vmul.f32 %v1465_v3, %v745_v44 }
  0xf8   : > { %v787_v54 = vadd.f32 %v779_v17, %v718_v33 }
  0xf9   : > { %v1450_v45 = vpop.permute.xlu1 %759  ;;  %v786_v55 = vadd.f32 %v778_v18, %v717_v34 }
  0xfa   : > { %v1452_v46 = vpop.permute.xlu0 %754  ;;  %v781_v39 = vmul.f32 %v1465_v3, %v1450_v45 }
  0xfb   : > { %v780_v40 = vmul.f32 %v1465_v3, %v1452_v46 }
  0xfc   : > { %v789_v14 = vadd.f32 %v781_v39, %v720_v38 }
  0xfd   : > { %v1454_v47 = vpop.permute.xlu1 %769  ;;  %v788_v15 = vadd.f32 %v780_v40, %v719_v41 }
  0xfe   : > { %v1456_v48 = vpop.permute.xlu0 %764  ;;  %v783_v63 = vmul.f32 %v1465_v3, %v1454_v47 }
  0xff   : > { %v782_v16 = vmul.f32 %v1465_v3, %v1456_v48 }
 0x101   : > { %v809_v50 = vpop.permute.xlu1 %808 }
 0x102   : > { %v804_v51 = vpop.permute.xlu0 %803  ;;  %v846_v11 = vmul.f32 %v1468_v8, %v809_v50 }
 0x103   : > { %v845_v12 = vmul.f32 %v1468_v8, %v804_v51 }
 0x104   : > { %v854_v43 = vadd.f32 %v846_v11, %v785_v36 }
 0x105   : > { %v819_v57 = vpop.permute.xlu1 %818  ;;  %v853_v52 = vadd.f32 %v845_v12, %v784_v37 }
 0x106   : > { %v814_v58 = vpop.permute.xlu0 %813  ;;  %v848_v42 = vmul.f32 %v1468_v8, %v819_v57  ;;  %v1142_v57 = vld [vmem:[%s1541_s5] ss:$0 sm:$0xff] }
 0x107   : > { %v847_v49 = vmul.f32 %v1468_v8, %v814_v58  ;;  %v722_v58 = vadd.f32 %v714_v24, %v654_v27 }
 0x108   : > { %v856_v0 = vadd.f32 %v848_v42, %v787_v54 }
 0x109   : > { %v829_v9 = vpop.permute.xlu1 %828  ;;  %v855_v1 = vadd.f32 %v847_v49, %v786_v55  ;;  %v791_v22 = vadd.f32 %v783_v63, %v722_v58 }
 0x10a   : > { %v1470_v56 = vpop.permute.xlu0 %823  ;;  %v850_v2 = vmul.f32 %v1468_v8, %v829_v9 }
 0x10b   : > { %v849_v47 = vmul.f32 %v1468_v8, %v1470_v56  ;;  %v790_v56 = vadd.f32 %v782_v16, %v721_v59 }
 0x10c   : > { %v858_v25 = vadd.f32 %v850_v2, %v789_v14 }
 0x10d   : > { %v839_v30 = vpop.permute.xlu1 %838  ;;  %v857_v5 = vadd.f32 %v849_v47, %v788_v15 }
 0x10e   : > { %v834_v6 = vpop.permute.xlu0 %833  ;;  %v852_v61 = vmul.f32 %v1468_v8, %v839_v30 }
 0x10f   : > { %v851_v26 = vmul.f32 %v1468_v8, %v834_v6 }
 0x110   : > { %v860_v8 = vadd.f32 %v852_v61, %v791_v22 }
 0x111   : > { %v877_v50 = vpop.permute.xlu1 %876  ;;  %v859_v6 = vadd.f32 %v851_v26, %v790_v56 }
 0x112   : > { %v872_v51 = vpop.permute.xlu0 %871  ;;  %v914_v44 = vmul.f32 %v1485_v23, %v877_v50 }
 0x113   : > { %v913_v53 = vmul.f32 %v1485_v23, %v872_v51 }
 0x114   : > { %v922_v60 = vadd.f32 %v914_v44, %v854_v43 }
 0x115   : > { %v921_v62 = vadd.f32 %v913_v53, %v853_v52  ;;  %v887_v4 = vpop.permute.xlu1 %886 }
 0x116   : > { %v882_v45 = vpop.permute.xlu0 %881  ;;  %v1501_v7 = vadd.f32 %v1142_v57, %v922_v60  ;;  %v916_v10 = vmul.f32 %v1485_v23, %v887_v4 }
 0x117   : > { %v1503_v46 = vadd.f32 %v1142_v57, %v921_v62  ;;  %v915_v13 = vmul.f32 %v1485_v23, %v882_v45 }
 0x118   : > { %v1144_v9 = vmul.f32 -1.442695, %v1501_v7  ;;  %v924_v20 = vadd.f32 %v916_v10, %v856_v0 }
 0x119   : > { %v1143_v19 = vmul.f32 -1.442695, %v1503_v46  ;;  %v923_v21 = vadd.f32 %v915_v13, %v855_v1  ;;  %v897_v27 = vpop.permute.xlu1 %896 }
 0x11a   : > { %v892_v28 = vpop.permute.xlu0 %891  ;;  %1189 = vpow2.f32 %v1144_v9  ;;  %v1515_v29 = vadd.f32 %v1142_v57, %v924_v20  ;;  %v918_v3 = vmul.f32 %v1485_v23, %v897_v27 }
 0x11b   : > { %v1517_v48 = vadd.f32 %v1142_v57, %v923_v21  ;;  %1191 = vpow2.f32 %v1143_v19  ;;  %v917_v31 = vmul.f32 %v1485_v23, %v892_v28 }
 0x11c   : > { %v1146_v32 = vmul.f32 -1.442695, %v1515_v29  ;;  %v926_v11 = vadd.f32 %v918_v3, %v858_v25 }
 0x11d   : > { %v1145_v30 = vmul.f32 -1.442695, %v1517_v48  ;;  %v925_v12 = vadd.f32 %v917_v31, %v857_v5  ;;  %v907_v33 = vpop.permute.xlu1 %906 }
 0x11e   : > { %v902_v34 = vpop.permute.xlu0 %901  ;;  %1193 = vpow2.f32 %v1146_v32  ;;  %v940_v17 = vadd.f32 %v1142_v57, %v926_v11  ;;  %v920_v18 = vmul.f32 %v1485_v23, %v907_v33 }
 0x11f   : > { %v919_v24 = vmul.f32 %v1485_v23, %v902_v34  ;;  %1195 = vpow2.f32 %v1145_v30  ;;  %v939_v35 = vadd.f32 %v1142_v57, %v925_v12 }
 0x120   : > { %v1148_v36 = vmul.f32 -1.442695, %v940_v17  ;;  %v928_v37 = vadd.f32 %v920_v18, %v860_v8 }
 0x121   : > { %v927_v38 = vadd.f32 %v919_v24, %v859_v6  ;;  %v1147_v41 = vmul.f32 -1.442695, %v939_v35 }
 0x122   : > { %1197 = vpow2.f32 %v1148_v36  ;;  %v942_v42 = vadd.f32 %v1142_v57, %v928_v37 }
 0x123   : > { %v941_v49 = vadd.f32 %v1142_v57, %v927_v38  ;;  %1199 = vpow2.f32 %v1147_v41 }
 0x124   : > { %v1190_v50 = vpop.eup %1189  ;;  %v1150_v51 = vmul.f32 -1.442695, %v942_v42 }
 0x125   : > { %v1192_v43 = vpop.eup %1191  ;;  %v968_v52 = vadd.f32 1.0, %v1190_v50  ;;  %v1149_v44 = vmul.f32 -1.442695, %v941_v49 }
 0x126   : > { %v967_v53 = vadd.f32 1.0, %v1192_v43  ;;  %1201 = vpow2.f32 %v1150_v51 }
 0x127   : > { %1203 = vrcp.f32 %v968_v52 }
 0x128   : > { %v1194_v54 = vpop.eup %1193  ;;  %1205 = vrcp.f32 %v967_v53 }
 0x129   : > { %v1196_v23 = vpop.eup %1195  ;;  %v970_v55 = vadd.f32 1.0, %v1194_v54  ;;  %1207 = vpow2.f32 %v1149_v44 }
 0x12a   : > { %v969_v39 = vadd.f32 1.0, %v1196_v23 }
 0x12b   : > { %1209 = vrcp.f32 %v970_v55 }
 0x12c   : > { %v1198_v40 = vpop.eup %1197  ;;  %1211 = vrcp.f32 %v969_v39 }
 0x12d   : > { %v1200_v57 = vpop.eup %1199  ;;  %v972_v58 = vadd.f32 1.0, %v1198_v40 }
 0x12e   : > { %v971_v59 = vadd.f32 1.0, %v1200_v57 }
 0x12f   : > { %1213 = vrcp.f32 %v972_v58 }
 0x130   : > { %v1202_v60 = vpop.eup %1201  ;;  %1215 = vrcp.f32 %v971_v59 }
 0x131   : > { %v1204_v62 = vpop.eup %1203  ;;  %v974_v63 = vadd.f32 1.0, %v1202_v60 }
 0x132   : > { %v1206_v0 = vpop.eup %1205  ;;  %v992_v1 = vmul.f32 %v1204_v62, %v1501_v7 }
 0x133   : > { %v1208_v2 = vpop.eup %1207  ;;  %v991_v4 = vmul.f32 %v1206_v0, %v1503_v46  ;;  %1217 = vrcp.f32 %v974_v63 }
 0x134   : > { %v973_v45 = vadd.f32 1.0, %v1208_v2 }
 0x135   : > { %v1210_v10 = vpop.eup %1209  ;;  %v1157_v13 = vpack.c.bf16 %v992_v1, %v991_v4 }
 0x136   : > { %v1212_v14 = vpop.eup %1211  ;;  %v994_v15 = vmul.f32 %v1210_v10, %v1515_v29  ;;  %1219 = vrcp.f32 %v973_v45 }
 0x137   : > { %1158 = vst [vmem:[%s311_s23] sm:$0xff] %v1157_v13   ;;  %v993_v16 = vmul.f32 %v1212_v14, %v1517_v48 }
 0x139   : > { %v1214_v47 = vpop.eup %1213  ;;  %v1162_v7 = vpack.c.bf16 %v994_v15, %v993_v16 }
 0x13a   : > { %v1216_v9 = vpop.eup %1215  ;;  %v996_v19 = vmul.f32 %v1214_v47, %v940_v17 }
 0x13b   : > { %1174 = vst [vmem:[%s311_s23 + $0x8] sm:$0xff] %v1162_v7   ;;  %v995_v46 = vmul.f32 %v1216_v9, %v939_v35 }
 0x13d   : > { %v1218_v20 = vpop.eup %1217  ;;  %v1167_v21 = vpack.c.bf16 %v996_v19, %v995_v46 }
 0x13e   : > { %v998_v22 = vmul.f32 %v1218_v20, %v942_v42 }
 0x13f   : > { %1175 = vst [vmem:[%s311_s23 + $0x10] sm:$0xff] %v1167_v21  }
 0x140   : > { %v1220_v25 = vpop.eup %1219 }
 0x141   : > { %v997_v61 = vmul.f32 %v1220_v25, %v941_v49 }
 0x143   : > { %v1172_v26 = vpack.c.bf16 %v998_v22, %v997_v61 }
 0x145   : > { %1176 = vst [vmem:[%s311_s23 + $0x18] sm:$0xff] %v1172_v26  }
 0x146 PF: > { %s16_s21 = sadd.s32 1, %s1227_s21  }
 0x147   : > { %p13_p4 = scmp.ge.s32.totalorder %s16_s21, 4  }
 0x149   :  { %15 = sbr.rel (!%p13_p4) target bundleno = 1 (0x1), region = 85 }

// kernel: effnet_forward.9
= control target key start
LH: loop header
LB: loop body
LE: loop exit
PB: predicated region body
PF: predicated region fallthrough
CT: control target
= control target key end

     0   :  { %s1140_s12 = smov 0   ;;  %s1597_s0 = inlined_call_operand.vmem [shape: bf16[2,10,10,128], index: 0, kind: input, shape index: {}]   ;;  %s1598_s1 = inlined_call_operand.vmem [shape: f32[9,128], index: 1, kind: input, shape index: {}]   ;;  %s1599_s2 = inlined_call_operand.vmem [shape: f32[1,128], index: 2, kind: input, shape index: {}]   ;;  %s1600_s3 = inlined_call_operand.vmem [shape: bf16[2,8,8,128], index: 3, kind: output, shape index: {}]  }
   0x1 LB: > { %s979_s13 = sadd.s32 4294967295, %s1118_s12   ;;  %p983_p0 = scmp.ge.s32.totalorder %s1118_s12, 1  ;;  %s1118_s12 = sphi %s1140_s12, %s13_s12  }
   0x2   : > { %p137_p1 = scmp.lt.s32.totalorder %s1118_s12, 3 }
   0x4   : > { %p138_p2 = pnand %p983_p0, %p137_p1 }
   0x5   : > { %p161_p3 = scmp.lt.s32.totalorder (!%p138_p2), %s979_s13, 1  ;;  %v190_v0 = vlaneseq (!%p138_p2)  ;;  %v171_v2 = vld [vmem:[%s1598_s1] sm:$0xff] (!%p138_p2)  ;;  %vm262_vm0 = vcmask (!%p138_p2), 1046528   ;;  %vm355_vm1 = vcmask (!%p138_p2), 1045504  }
   0x6   : > { %141 = sbr.rel (%p138_p2) target bundleno = 157 (0x9d), region = 32 }
   0x7   : > { %v191_v1 = vshrl.u32 (!%p138_p2), %v190_v0, 7 }
   0x9   : > { %v192_v3 = vsub.s32 (!%p138_p2), 0, %v191_v1  ;;  %v228_v4 = vsub.s32 (!%p138_p2), 1, %v191_v1  ;;  %v321_v5 = vsub.s32 (!%p138_p2), 2, %v191_v1  ;;  %v415_v6 = vsub.s32 (!%p138_p2), 3, %v191_v1 }
   0xa   : > { %v451_v7 = vsub.s32 (!%p138_p2), 4, %v191_v1  ;;  %v543_v8 = vsub.s32 (!%p138_p2), 5, %v191_v1  ;;  %v636_v9 = vsub.s32 (!%p138_p2), 6, %v191_v1  ;;  %v672_v10 = vsub.s32 (!%p138_p2), 7, %v191_v1 }
   0xb   : > { %v193_v11 = vrot.slane (!%p138_p2), %v171_v2, %v192_v3  ;;  %v229_v12 = vrot.slane (!%p138_p2), %v171_v2, %v228_v4  ;;  %v1159_v13 = vrot.slane (!%p138_p2), %v171_v2, %v321_v5  ;;  %v1161_v14 = vrot.slane (!%p138_p2), %v171_v2, %v415_v6 }
   0xc   : > { %v1166_v18 = vrot.slane (!%p138_p2), %v171_v2, %v451_v7  ;;  %v1168_v19 = vrot.slane (!%p138_p2), %v171_v2, %v543_v8  ;;  %v1170_v20 = vrot.slane (!%p138_p2), %v171_v2, %v636_v9  ;;  %v1172_v21 = vrot.slane (!%p138_p2), %v171_v2, %v672_v10 }
   0xd   : > { %s1602_s13 = smov (!%p161_p3, %s979_s13), 1 }
   0xe   : > { %s1071_s16 = smul.u32 80, %s1602_s13  ;;  %s1047_s24 = sshll.u32 %s1602_s13, 5 }
   0xf   : > { %s170_s27 = scalar_lea.vmem %s1600_s3, %s1047_s24 }
  0x10   : > { %s1157_s19 = scalar_lea.vmem %s1597_s0, %s1071_s16 }
  0x11   : > { %v174_v15 = vld [vmem:[%s1157_s19] ss:$8 sps:$4 sm:$0xff]   ;;  %v176_v16 = vld [vmem:[%s1157_s19 + $0x10] ss:$8 sps:$4 sm:$0xff]   ;;  %v1176_v27 = vld [vmem:[%s1157_s19 + $0x4] sm:$0x1] }
  0x12   : > { %v178_v17 = vld [vmem:[%s1157_s19 + $0x20] ss:$8 sps:$4 sm:$0xff]   ;;  %v180_v22 = vld [vmem:[%s1157_s19 + $0x30] ss:$8 sps:$4 sm:$0xff]   ;;  %v182_v23 = vunpack.c.l.bf16 %v174_v15  ;;  %v183_v24 = vunpack.c.h.bf16 %v174_v15  ;;  %v184_v25 = vunpack.c.l.bf16 %v176_v16  ;;  %v185_v26 = vunpack.c.h.bf16 %v176_v16  ;;  %v1179_v28 = vld [vmem:[%s1157_s19 + $0xc] sm:$0x1] }
  0x13   : > { %v186_v29 = vunpack.c.l.bf16 %v178_v17  ;;  %v187_v30 = vunpack.c.h.bf16 %v178_v17  ;;  %v188_v31 = vunpack.c.l.bf16 %v180_v22  ;;  %v189_v32 = vunpack.c.h.bf16 %v180_v22  ;;  %v1182_v33 = vld [vmem:[%s1157_s19 + $0x14] sm:$0x1]  ;;  %v1185_v34 = vld [vmem:[%s1157_s19 + $0x1c] sm:$0x1]  ;;  %v1188_v35 = vld [vmem:[%s1157_s19 + $0x24] sm:$0x1] }
  0x14   : > { %v194_v36 = vmul.f32 %v193_v11, %v182_v23  ;;  %v195_v37 = vmul.f32 %v193_v11, %v183_v24  ;;  %v1190_v38 = vmul.f32 %v193_v11, %v184_v25  ;;  %v1192_v39 = vmul.f32 %v193_v11, %v185_v26  ;;  %v1195_v40 = vld [vmem:[%s1157_s19 + $0x2c] sm:$0x1]  ;;  %v1198_v41 = vld [vmem:[%s1157_s19 + $0x34] sm:$0x1]  ;;  %v1201_v42 = vld [vmem:[%s1157_s19 + $0x3c] sm:$0x1] }
  0x15   : > { %v198_v43 = vmul.f32 %v193_v11, %v186_v29  ;;  %v1203_v44 = vmul.f32 %v193_v11, %v187_v30  ;;  %v1205_v45 = vmul.f32 %v193_v11, %v188_v31  ;;  %v1207_v46 = vmul.f32 %v193_v11, %v189_v32 }
  0x16   : > { %v218_v47 = vunpack.c.l.bf16 %v1176_v27  ;;  %v219_v48 = vunpack.c.l.bf16 %v1179_v28  ;;  %v220_v49 = vunpack.c.l.bf16 %v1182_v33  ;;  %v221_v50 = vunpack.c.l.bf16 %v1185_v34 }
  0x17   : > { %v222_v51 = vunpack.c.l.bf16 %v1188_v35  ;;  %v223_v52 = vunpack.c.l.bf16 %v1195_v40  ;;  %v224_v53 = vunpack.c.l.bf16 %v1198_v41  ;;  %v225_v54 = vunpack.c.l.bf16 %v1201_v42 }
  0x18   : > { %v230_v55 = vmul.f32 %v229_v12, %v182_v23  ;;  %v231_v56 = vmul.f32 %v229_v12, %v218_v47  ;;  %v232_v57 = vmul.f32 %v229_v12, %v183_v24  ;;  %v233_v58 = vmul.f32 %v229_v12, %v219_v48 }
  0x19   : > { %v234_v59 = vmul.f32 %v229_v12, %v184_v25  ;;  %v235_v60 = vmul.f32 %v229_v12, %v220_v49  ;;  %v236_v61 = vmul.f32 %v229_v12, %v185_v26  ;;  %v237_v62 = vmul.f32 %v229_v12, %v221_v50 }
  0x1a   : > { %v238_v63 = vmul.f32 %v229_v12, %v186_v29  ;;  %v239_v0 = vmul.f32 %v229_v12, %v222_v51  ;;  %v240_v1 = vmul.f32 %v229_v12, %v187_v30  ;;  %v241_v2 = vmul.f32 %v229_v12, %v223_v52 }
  0x1b   : > { %v242_v3 = vmul.f32 %v229_v12, %v188_v31  ;;  %v243_v4 = vmul.f32 %v229_v12, %v224_v53  ;;  %v244_v5 = vmul.f32 %v229_v12, %v189_v32  ;;  %v245_v6 = vmul.f32 %v229_v12, %v225_v54  ;;  %v303_v31 = vld [vmem:[%s1157_s19] sm:$0xe]  ;;  %v304_v32 = vld [vmem:[%s1157_s19 + $0x8] sm:$0xe] }
  0x1c   : > { %v263_v7 = vrot.slane %v230_v55, 1  ;;  %v264_v8 = vrot.slane %v231_v56, 1  ;;  %v266_v9 = vrot.slane %v232_v57, 1  ;;  %v267_v10 = vrot.slane %v233_v58, 1 }
  0x1d   : > { %v269_v11 = vrot.slane %v234_v59, 1  ;;  %v270_v15 = vrot.slane %v235_v60, 1  ;;  %v272_v16 = vrot.slane %v236_v61, 1  ;;  %v273_v17 = vrot.slane %v237_v62, 1  ;;  %v305_v59 = vld [vmem:[%s1157_s19 + $0x10] sm:$0xe] }
  0x1e   : > { %v265_v22 = vsel %vm262_vm0, %v263_v7, %v264_v8  ;;  %v268_v23 = vsel %vm262_vm0, %v266_v9, %v267_v10  ;;  %v275_v24 = vrot.slane %v238_v63, 1  ;;  %v276_v25 = vrot.slane %v239_v0, 1  ;;  %v306_v0 = vld [vmem:[%s1157_s19 + $0x18] sm:$0xe]  ;;  %v308_v8 = vld [vmem:[%s1157_s19 + $0x28] sm:$0xe] }
  0x1f   : > { %v271_v12 = vsel %vm262_vm0, %v269_v11, %v270_v15  ;;  %v274_v26 = vsel %vm262_vm0, %v272_v16, %v273_v17  ;;  %v278_v29 = vrot.slane %v240_v1, 1  ;;  %v279_v30 = vrot.slane %v241_v2, 1  ;;  %v307_v1 = vld [vmem:[%s1157_s19 + $0x20] sm:$0xe]  ;;  %v310_v9 = vld [vmem:[%s1157_s19 + $0x38] sm:$0xe] }
  0x20   : > { %v277_v55 = vsel %vm262_vm0, %v275_v24, %v276_v25  ;;  %v281_v56 = vrot.slane %v242_v3, 1  ;;  %v282_v57 = vrot.slane %v243_v4, 1  ;;  %v284_v58 = vrot.slane %v244_v5, 1  ;;  %v309_v5 = vld [vmem:[%s1157_s19 + $0x30] sm:$0xe] }
  0x21   : > { %v280_v60 = vsel %vm262_vm0, %v278_v29, %v279_v30  ;;  %v285_v61 = vrot.slane %v245_v6, 1  ;;  %v1242_v62 = vadd.f32 %v265_v22, %v194_v36  ;;  %v1244_v63 = vadd.f32 %v268_v23, %v195_v37 }
  0x22   : > { %v283_v2 = vsel %vm262_vm0, %v281_v56, %v282_v57  ;;  %v297_v7 = vadd.f32 %v271_v12, %v1190_v38  ;;  %v298_v3 = vadd.f32 %v274_v26, %v1192_v39  ;;  %v299_v4 = vadd.f32 %v277_v55, %v198_v43 }
  0x23   : > { %v286_v10 = vsel %vm262_vm0, %v284_v58, %v285_v61  ;;  %v300_v36 = vadd.f32 %v280_v60, %v1203_v44  ;;  %v301_v37 = vadd.f32 %v283_v2, %v1205_v45  ;;  %v311_v6 = vunpack.c.l.bf16 %v303_v31 }
  0x24   : > { %v302_v11 = vadd.f32 %v286_v10, %v1207_v46  ;;  %v312_v15 = vunpack.c.l.bf16 %v304_v32  ;;  %v313_v16 = vunpack.c.l.bf16 %v305_v59  ;;  %v314_v17 = vunpack.c.l.bf16 %v306_v0  ;;  %v987_v0 = vld [vmem:[%s1157_s19 + $0x8] ss:$8 sps:$4 sm:$0xff]  }
  0x25   : > { %v315_v22 = vunpack.c.l.bf16 %v307_v1  ;;  %v316_v38 = vunpack.c.l.bf16 %v308_v8  ;;  %v317_v23 = vunpack.c.l.bf16 %v309_v5  ;;  %v318_v39 = vunpack.c.l.bf16 %v310_v9  ;;  %v989_v9 = vld [vmem:[%s1157_s19 + $0x18] ss:$8 sps:$4 sm:$0xff]  }
  0x26   : > { %v323_v43 = vmul.f32 %v1159_v13, %v311_v6  ;;  %v324_v24 = vmul.f32 %v1159_v13, %v218_v47  ;;  %v325_v44 = vmul.f32 %v1159_v13, %v312_v15  ;;  %v326_v45 = vmul.f32 %v1159_v13, %v219_v48 }
  0x27   : > { %v327_v46 = vmul.f32 %v1159_v13, %v313_v16  ;;  %v328_v25 = vmul.f32 %v1159_v13, %v220_v49  ;;  %v329_v12 = vmul.f32 %v1159_v13, %v314_v17  ;;  %v330_v27 = vmul.f32 %v1159_v13, %v221_v50  ;;  %v991_v17 = vld [vmem:[%s1157_s19 + $0x28] ss:$8 sps:$4 sm:$0xff]  }
  0x28   : > { %v331_v47 = vmul.f32 %v1159_v13, %v315_v22  ;;  %v332_v28 = vmul.f32 %v1159_v13, %v222_v51  ;;  %v333_v48 = vmul.f32 %v1159_v13, %v316_v38  ;;  %v334_v33 = vmul.f32 %v1159_v13, %v223_v52  ;;  %v993_v22 = vld [vmem:[%s1157_s19 + $0x38] ss:$8 sps:$4 sm:$0xff]  }
  0x29   : > { %v335_v49 = vmul.f32 %v1159_v13, %v317_v23  ;;  %v336_v34 = vmul.f32 %v1159_v13, %v224_v53  ;;  %v337_v50 = vmul.f32 %v1159_v13, %v318_v39  ;;  %v338_v35 = vmul.f32 %v1159_v13, %v225_v54 }
  0x2a   : > { %v356_v26 = vrot.slane %v323_v43, 2  ;;  %v357_v51 = vrot.slane %v324_v24, 2  ;;  %v359_v29 = vrot.slane %v325_v44, 2  ;;  %v360_v30 = vrot.slane %v326_v45, 2 }
  0x2b   : > { %v362_v31 = vrot.slane %v327_v46, 2  ;;  %v363_v40 = vrot.slane %v328_v25, 2  ;;  %v365_v52 = vrot.slane %v329_v12, 2  ;;  %v366_v32 = vrot.slane %v330_v27, 2  ;;  %v1312_v12 = vld [vmem:[%s1157_s19 + $0x14] sm:$0x1] }
  0x2c   : > { %v358_v55 = vsel %vm355_vm1, %v356_v26, %v357_v51  ;;  %v361_v41 = vsel %vm355_vm1, %v359_v29, %v360_v30  ;;  %v368_v53 = vrot.slane %v331_v47, 2  ;;  %v369_v56 = vrot.slane %v332_v28, 2  ;;  %v1332_v29 = vld [vmem:[%s1157_s19 + $0x34] sm:$0x1]  ;;  %v1335_v30 = vld [vmem:[%s1157_s19 + $0x3c] sm:$0x1] }
  0x2d   : > { %v364_v42 = vsel %vm355_vm1, %v362_v31, %v363_v40  ;;  %v367_v13 = vsel %vm355_vm1, %v365_v52, %v366_v32  ;;  %v371_v54 = vrot.slane %v333_v48, 2  ;;  %v372_v57 = vrot.slane %v334_v33, 2  ;;  %v1319_v33 = vld [vmem:[%s1157_s19 + $0x1c] sm:$0x1]  ;;  %v1338_v31 = vld [vmem:[%s1157_s19 + $0x44] sm:$0x1] }
  0x2e   : > { %v370_v58 = vsel %vm355_vm1, %v368_v53, %v369_v56  ;;  %v374_v59 = vrot.slane %v335_v49, 2  ;;  %v375_v60 = vrot.slane %v336_v34, 2  ;;  %v377_v61 = vrot.slane %v337_v50, 2  ;;  %v1322_v49 = vld [vmem:[%s1157_s19 + $0x24] sm:$0x1] }
  0x2f   : > { %v373_v1 = vsel %vm355_vm1, %v371_v54, %v372_v57  ;;  %v378_v2 = vrot.slane %v338_v35, 2  ;;  %v388_v8 = vadd.f32 %v358_v55, %v1242_v62  ;;  %v389_v5 = vadd.f32 %v361_v41, %v1244_v63  ;;  %v1325_v34 = vld [vmem:[%s1157_s19 + $0x2c] sm:$0x1] }
  0x30   : > { %v376_v10 = vsel %vm355_vm1, %v374_v59, %v375_v60  ;;  %v390_v6 = vadd.f32 %v364_v42, %v297_v7  ;;  %v391_v15 = vadd.f32 %v367_v13, %v298_v3  ;;  %v392_v16 = vadd.f32 %v370_v58, %v299_v4 }
  0x31   : > { %v379_v38 = vsel %vm355_vm1, %v377_v61, %v378_v2  ;;  %v393_v23 = vadd.f32 %v373_v1, %v300_v36  ;;  %v394_v39 = vadd.f32 %v376_v10, %v301_v37  ;;  %v405_v43 = vunpack.c.l.bf16 %v987_v0 }
  0x32   : > { %v395_v24 = vadd.f32 %v379_v38, %v302_v11  ;;  %v406_v44 = vunpack.c.h.bf16 %v987_v0  ;;  %v407_v62 = vunpack.c.l.bf16 %v989_v9  ;;  %v408_v63 = vunpack.c.h.bf16 %v989_v9  ;;  %v1309_v11 = vld [vmem:[%s1157_s19 + $0xc] sm:$0x1] }
  0x33   : > { %v409_v45 = vunpack.c.l.bf16 %v991_v17  ;;  %v410_v7 = vunpack.c.h.bf16 %v991_v17  ;;  %v411_v3 = vunpack.c.l.bf16 %v993_v22  ;;  %v412_v4 = vunpack.c.h.bf16 %v993_v22 }
  0x34   : > { %v417_v46 = vmul.f32 %v1161_v14, %v405_v43  ;;  %v418_v25 = vmul.f32 %v1161_v14, %v406_v44  ;;  %v419_v36 = vmul.f32 %v1161_v14, %v407_v62  ;;  %v420_v37 = vmul.f32 %v1161_v14, %v408_v63 }
  0x35   : > { %v421_v27 = vmul.f32 %v1161_v14, %v409_v45  ;;  %v422_v47 = vmul.f32 %v1161_v14, %v410_v7  ;;  %v423_v28 = vmul.f32 %v1161_v14, %v411_v3  ;;  %v424_v48 = vmul.f32 %v1161_v14, %v412_v4 }
  0x36   : > { %v425_v50 = vadd.f32 %v417_v46, %v388_v8  ;;  %v426_v35 = vadd.f32 %v418_v25, %v389_v5  ;;  %v1327_v26 = vadd.f32 %v419_v36, %v390_v6  ;;  %v1329_v51 = vadd.f32 %v420_v37, %v391_v15  ;;  %v1003_v37 = vld [vmem:[%s1157_s19 + $0x8] sm:$0xe] }
  0x37   : > { %v429_v40 = vadd.f32 %v421_v27, %v392_v16  ;;  %v1340_v14 = vadd.f32 %v422_v47, %v393_v23  ;;  %v1342_v52 = vadd.f32 %v423_v28, %v394_v39  ;;  %v1344_v32 = vadd.f32 %v424_v48, %v395_v24  ;;  %v1004_v27 = vld [vmem:[%s1157_s19 + $0x10] sm:$0xe] }
  0x38   : > { %v441_v55 = vunpack.c.l.bf16 %v1309_v11  ;;  %v442_v41 = vunpack.c.l.bf16 %v1312_v12  ;;  %v443_v53 = vunpack.c.l.bf16 %v1319_v33  ;;  %v444_v56 = vunpack.c.l.bf16 %v1322_v49 }
  0x39   : > { %v445_v42 = vunpack.c.l.bf16 %v1325_v34  ;;  %v446_v13 = vunpack.c.l.bf16 %v1332_v29  ;;  %v447_v54 = vunpack.c.l.bf16 %v1335_v30  ;;  %v448_v57 = vunpack.c.l.bf16 %v1338_v31 }
  0x3a   : > { %v453_v58 = vmul.f32 %v1166_v18, %v405_v43  ;;  %v454_v59 = vmul.f32 %v1166_v18, %v441_v55  ;;  %v455_v60 = vmul.f32 %v1166_v18, %v406_v44  ;;  %v456_v61 = vmul.f32 %v1166_v18, %v442_v41 }
  0x3b   : > { %v457_v0 = vmul.f32 %v1166_v18, %v407_v62  ;;  %v458_v1 = vmul.f32 %v1166_v18, %v443_v53  ;;  %v459_v2 = vmul.f32 %v1166_v18, %v408_v63  ;;  %v460_v8 = vmul.f32 %v1166_v18, %v444_v56 }
  0x3c   : > { %v461_v5 = vmul.f32 %v1166_v18, %v409_v45  ;;  %v462_v9 = vmul.f32 %v1166_v18, %v445_v42  ;;  %v463_v10 = vmul.f32 %v1166_v18, %v410_v7  ;;  %v464_v6 = vmul.f32 %v1166_v18, %v446_v13 }
  0x3d   : > { %v465_v15 = vmul.f32 %v1166_v18, %v411_v3  ;;  %v466_v16 = vmul.f32 %v1166_v18, %v447_v54  ;;  %v467_v17 = vmul.f32 %v1166_v18, %v412_v4  ;;  %v468_v22 = vmul.f32 %v1166_v18, %v448_v57 }
  0x3e   : > { %v485_v38 = vrot.slane %v453_v58, 1  ;;  %v486_v23 = vrot.slane %v454_v59, 1  ;;  %v488_v39 = vrot.slane %v455_v60, 1  ;;  %v489_v43 = vrot.slane %v456_v61, 1  ;;  %v1005_v59 = vld [vmem:[%s1157_s19 + $0x18] sm:$0xe] }
  0x3f   : > { %v491_v24 = vrot.slane %v457_v0, 1  ;;  %v492_v44 = vrot.slane %v458_v1, 1  ;;  %v494_v62 = vrot.slane %v459_v2, 1  ;;  %v495_v63 = vrot.slane %v460_v8, 1  ;;  %v1006_v2 = vld [vmem:[%s1157_s19 + $0x20] sm:$0xe] }
  0x40   : > { %v487_v45 = vsel %vm262_vm0, %v485_v38, %v486_v23  ;;  %v490_v7 = vsel %vm262_vm0, %v488_v39, %v489_v43  ;;  %v497_v3 = vrot.slane %v461_v5, 1  ;;  %v498_v4 = vrot.slane %v462_v9, 1  ;;  %v1007_v8 = vld [vmem:[%s1157_s19 + $0x28] sm:$0xe]  ;;  %v1008_v38 = vld [vmem:[%s1157_s19 + $0x30] sm:$0xe] }
  0x41   : > { %v493_v18 = vsel %vm262_vm0, %v491_v24, %v492_v44  ;;  %v496_v46 = vsel %vm262_vm0, %v494_v62, %v495_v63  ;;  %v500_v25 = vrot.slane %v463_v10, 1  ;;  %v501_v36 = vrot.slane %v464_v6, 1  ;;  %v1010_v23 = vld [vmem:[%s1157_s19 + $0x40] sm:$0xe] }
  0x42   : > { %v499_v47 = vsel %vm262_vm0, %v497_v3, %v498_v4  ;;  %v503_v28 = vrot.slane %v465_v15, 1  ;;  %v504_v48 = vrot.slane %v466_v16, 1  ;;  %v506_v58 = vrot.slane %v467_v17, 1  ;;  %v1009_v15 = vld [vmem:[%s1157_s19 + $0x38] sm:$0xe] }
  0x43   : > { %v502_v60 = vsel %vm262_vm0, %v500_v25, %v501_v36  ;;  %v507_v61 = vrot.slane %v468_v22, 1  ;;  %v517_v0 = vadd.f32 %v487_v45, %v425_v50  ;;  %v518_v1 = vadd.f32 %v490_v7, %v426_v35 }
  0x44   : > { %v505_v5 = vsel %vm262_vm0, %v503_v28, %v504_v48  ;;  %v519_v9 = vadd.f32 %v493_v18, %v1327_v26  ;;  %v520_v10 = vadd.f32 %v496_v46, %v1329_v51  ;;  %v521_v6 = vadd.f32 %v499_v47, %v429_v40 }
  0x45   : > { %v508_v16 = vsel %vm262_vm0, %v506_v58, %v507_v61  ;;  %v522_v17 = vadd.f32 %v502_v60, %v1340_v14  ;;  %v523_v22 = vadd.f32 %v505_v5, %v1342_v52  ;;  %v533_v50 = vunpack.c.l.bf16 %v1003_v37  ;;  %v1013_v5 = vld [vmem:[%s1157_s19 + $0x20] ss:$8 sps:$4 sm:$0xff]  }
  0x46   : > { %v524_v35 = vadd.f32 %v508_v16, %v1344_v32  ;;  %v534_v39 = vunpack.c.l.bf16 %v1004_v27  ;;  %v535_v43 = vunpack.c.l.bf16 %v1005_v59  ;;  %v536_v24 = vunpack.c.l.bf16 %v1006_v2  ;;  %v1011_v59 = vld [vmem:[%s1157_s19 + $0x10] ss:$8 sps:$4 sm:$0xff]  }
  0x47   : > { %v537_v44 = vunpack.c.l.bf16 %v1007_v8  ;;  %v538_v26 = vunpack.c.l.bf16 %v1008_v38  ;;  %v539_v62 = vunpack.c.l.bf16 %v1009_v15  ;;  %v540_v51 = vunpack.c.l.bf16 %v1010_v23 }
  0x48   : > { %v545_v40 = vmul.f32 %v1168_v19, %v533_v50  ;;  %v546_v63 = vmul.f32 %v1168_v19, %v441_v55  ;;  %v547_v14 = vmul.f32 %v1168_v19, %v534_v39  ;;  %v548_v52 = vmul.f32 %v1168_v19, %v442_v41  ;;  %v1015_v50 = vld [vmem:[%s1157_s19 + $0x30] ss:$8 sps:$4 sm:$0xff]   ;;  %v1017_v39 = vld [vmem:[%s1157_s19 + $0x40] ss:$8 sps:$4 sm:$0xff]  }
  0x49   : > { %v549_v32 = vmul.f32 %v1168_v19, %v535_v43  ;;  %v550_v45 = vmul.f32 %v1168_v19, %v443_v53  ;;  %v551_v7 = vmul.f32 %v1168_v19, %v536_v24  ;;  %v552_v11 = vmul.f32 %v1168_v19, %v444_v56 }
  0x4a   : > { %v553_v55 = vmul.f32 %v1168_v19, %v537_v44  ;;  %v554_v12 = vmul.f32 %v1168_v19, %v445_v42  ;;  %v555_v41 = vmul.f32 %v1168_v19, %v538_v26  ;;  %v556_v33 = vmul.f32 %v1168_v19, %v446_v13 }
  0x4b   : > { %v557_v53 = vmul.f32 %v1168_v19, %v539_v62  ;;  %v558_v49 = vmul.f32 %v1168_v19, %v447_v54  ;;  %v559_v56 = vmul.f32 %v1168_v19, %v540_v51  ;;  %v560_v34 = vmul.f32 %v1168_v19, %v448_v57 }
  0x4c   : > { %v577_v3 = vrot.slane %v545_v40, 2  ;;  %v578_v42 = vrot.slane %v546_v63, 2  ;;  %v580_v4 = vrot.slane %v547_v14, 2  ;;  %v581_v18 = vrot.slane %v548_v52, 2  ;;  %v1459_v52 = vld [vmem:[%s1157_s19 + $0x1c] sm:$0x1] }
  0x4d   : > { %v583_v46 = vrot.slane %v549_v32, 2  ;;  %v584_v29 = vrot.slane %v550_v45, 2  ;;  %v586_v13 = vrot.slane %v551_v7, 2  ;;  %v587_v25 = vrot.slane %v552_v11, 2 }
  0x4e   : > { %v579_v36 = vsel %vm355_vm1, %v577_v3, %v578_v42  ;;  %v582_v30 = vsel %vm355_vm1, %v580_v4, %v581_v18  ;;  %v589_v54 = vrot.slane %v553_v55, 2  ;;  %v590_v37 = vrot.slane %v554_v12, 2  ;;  %v1466_v55 = vld [vmem:[%s1157_s19 + $0x24] sm:$0x1]  ;;  %v1469_v12 = vld [vmem:[%s1157_s19 + $0x2c] sm:$0x1] }
  0x4f   : > { %v585_v31 = vsel %vm355_vm1, %v583_v46, %v584_v29  ;;  %v588_v19 = vsel %vm355_vm1, %v586_v13, %v587_v25  ;;  %v592_v57 = vrot.slane %v555_v41, 2  ;;  %v593_v27 = vrot.slane %v556_v33, 2  ;;  %v1472_v41 = vld [vmem:[%s1157_s19 + $0x34] sm:$0x1]  ;;  %v1482_v3 = vld [vmem:[%s1157_s19 + $0x44] sm:$0x1] }
  0x50   : > { %v591_v47 = vsel %vm355_vm1, %v589_v54, %v590_v37  ;;  %v595_v28 = vrot.slane %v557_v53, 2  ;;  %v596_v48 = vrot.slane %v558_v49, 2  ;;  %v598_v58 = vrot.slane %v559_v56, 2  ;;  %v1485_v42 = vld [vmem:[%s1157_s19 + $0x4c] sm:$0x1] }
  0x51   : > { %v594_v60 = vsel %vm355_vm1, %v592_v57, %v593_v27  ;;  %v599_v61 = vrot.slane %v560_v34, 2  ;;  %v609_v2 = vadd.f32 %v579_v36, %v517_v0  ;;  %v610_v8 = vadd.f32 %v582_v30, %v518_v1  ;;  %v1479_v34 = vld [vmem:[%s1157_s19 + $0x3c] sm:$0x1] }
  0x52   : > { %v597_v38 = vsel %vm355_vm1, %v595_v28, %v596_v48  ;;  %v611_v15 = vadd.f32 %v585_v31, %v519_v9  ;;  %v612_v23 = vadd.f32 %v588_v19, %v520_v10  ;;  %v613_v16 = vadd.f32 %v591_v47, %v521_v6 }
  0x53   : > { %v600_v43 = vsel %vm355_vm1, %v598_v58, %v599_v61  ;;  %v614_v24 = vadd.f32 %v594_v60, %v522_v17  ;;  %v615_v44 = vadd.f32 %v597_v38, %v523_v22  ;;  %v626_v26 = vunpack.c.l.bf16 %v1011_v59 }
  0x54   : > { %v616_v62 = vadd.f32 %v600_v43, %v524_v35  ;;  %v627_v51 = vunpack.c.h.bf16 %v1011_v59  ;;  %v628_v40 = vunpack.c.l.bf16 %v1013_v5  ;;  %v629_v0 = vunpack.c.h.bf16 %v1013_v5  ;;  %v1456_v35 = vld [vmem:[%s1157_s19 + $0x14] sm:$0x1] }
  0x55   : > { %v630_v1 = vunpack.c.l.bf16 %v1015_v50  ;;  %v631_v9 = vunpack.c.h.bf16 %v1015_v50  ;;  %v632_v10 = vunpack.c.l.bf16 %v1017_v39  ;;  %v633_v6 = vunpack.c.h.bf16 %v1017_v39 }
  0x56   : > { %v638_v63 = vmul.f32 %v1170_v20, %v626_v26  ;;  %v639_v14 = vmul.f32 %v1170_v20, %v627_v51  ;;  %v640_v17 = vmul.f32 %v1170_v20, %v628_v40  ;;  %v641_v22 = vmul.f32 %v1170_v20, %v629_v0 }
  0x57   : > { %v642_v32 = vmul.f32 %v1170_v20, %v630_v1  ;;  %v643_v45 = vmul.f32 %v1170_v20, %v631_v9  ;;  %v644_v7 = vmul.f32 %v1170_v20, %v632_v10  ;;  %v645_v11 = vmul.f32 %v1170_v20, %v633_v6 }
  0x58   : > { %v646_v33 = vadd.f32 %v638_v63, %v609_v2  ;;  %v647_v53 = vadd.f32 %v639_v14, %v610_v8  ;;  %v1474_v49 = vadd.f32 %v640_v17, %v611_v15  ;;  %v1476_v56 = vadd.f32 %v641_v22, %v612_v23  ;;  %v1027_v63 = vld [vmem:[%s1157_s19 + $0x10] sm:$0xe]  ;;  %v1028_v14 = vld [vmem:[%s1157_s19 + $0x18] sm:$0xe] }
  0x59   : > { %v650_v4 = vadd.f32 %v642_v32, %v613_v16  ;;  %v1487_v20 = vadd.f32 %v643_v45, %v614_v24  ;;  %v1489_v18 = vadd.f32 %v644_v7, %v615_v44  ;;  %v1491_v46 = vadd.f32 %v645_v11, %v616_v62  ;;  %v1029_v7 = vld [vmem:[%s1157_s19 + $0x20] sm:$0xe] }
  0x5a   : > { %v662_v29 = vunpack.c.l.bf16 %v1456_v35  ;;  %v663_v13 = vunpack.c.l.bf16 %v1459_v52  ;;  %v664_v25 = vunpack.c.l.bf16 %v1466_v55  ;;  %v665_v36 = vunpack.c.l.bf16 %v1469_v12 }
  0x5b   : > { %v666_v30 = vunpack.c.l.bf16 %v1472_v41  ;;  %v667_v54 = vunpack.c.l.bf16 %v1479_v34  ;;  %v668_v37 = vunpack.c.l.bf16 %v1482_v3  ;;  %v669_v31 = vunpack.c.l.bf16 %v1485_v42 }
  0x5c   : > { %v674_v19 = vmul.f32 %v1172_v21, %v626_v26  ;;  %v675_v57 = vmul.f32 %v1172_v21, %v662_v29  ;;  %v676_v27 = vmul.f32 %v1172_v21, %v627_v51  ;;  %v677_v47 = vmul.f32 %v1172_v21, %v663_v13 }
  0x5d   : > { %v678_v28 = vmul.f32 %v1172_v21, %v628_v40  ;;  %v679_v48 = vmul.f32 %v1172_v21, %v664_v25  ;;  %v680_v58 = vmul.f32 %v1172_v21, %v629_v0  ;;  %v681_v59 = vmul.f32 %v1172_v21, %v665_v36 }
  0x5e   : > { %v682_v60 = vmul.f32 %v1172_v21, %v630_v1  ;;  %v683_v61 = vmul.f32 %v1172_v21, %v666_v30  ;;  %v684_v2 = vmul.f32 %v1172_v21, %v631_v9  ;;  %v685_v8 = vmul.f32 %v1172_v21, %v667_v54 }
  0x5f   : > { %v686_v5 = vmul.f32 %v1172_v21, %v632_v10  ;;  %v687_v38 = vmul.f32 %v1172_v21, %v668_v37  ;;  %v688_v15 = vmul.f32 %v1172_v21, %v633_v6  ;;  %v689_v23 = vmul.f32 %v1172_v21, %v669_v31 }
  0x60   : > { %v706_v16 = vrot.slane %v674_v19, 1  ;;  %v707_v50 = vrot.slane %v675_v57, 1  ;;  %v709_v39 = vrot.slane %v676_v27, 1  ;;  %v710_v43 = vrot.slane %v677_v47, 1  ;;  %v1030_v47 = vld [vmem:[%s1157_s19 + $0x28] sm:$0xe] }
  0x61   : > { %v712_v24 = vrot.slane %v678_v28, 1  ;;  %v713_v44 = vrot.slane %v679_v48, 1  ;;  %v715_v26 = vrot.slane %v680_v58, 1  ;;  %v716_v62 = vrot.slane %v681_v59, 1  ;;  %v1031_v28 = vld [vmem:[%s1157_s19 + $0x30] sm:$0xe] }
  0x62   : > { %v708_v51 = vsel %vm262_vm0, %v706_v16, %v707_v50  ;;  %v711_v40 = vsel %vm262_vm0, %v709_v39, %v710_v43  ;;  %v718_v0 = vrot.slane %v682_v60, 1  ;;  %v719_v1 = vrot.slane %v683_v61, 1  ;;  %v1032_v61 = vld [vmem:[%s1157_s19 + $0x38] sm:$0xe] }
  0x63   : > { %v714_v21 = vsel %vm262_vm0, %v712_v24, %v713_v44  ;;  %v717_v9 = vsel %vm262_vm0, %v715_v26, %v716_v62  ;;  %v721_v10 = vrot.slane %v684_v2, 1  ;;  %v722_v6 = vrot.slane %v685_v8, 1  ;;  %v1033_v2 = vld [vmem:[%s1157_s19 + $0x40] sm:$0xe]  ;;  %v1034_v8 = vld [vmem:[%s1157_s19 + $0x48] sm:$0xe] }
  0x64   : > { %v720_v17 = vsel %vm262_vm0, %v718_v0, %v719_v1  ;;  %v724_v22 = vrot.slane %v686_v5, 1  ;;  %v725_v32 = vrot.slane %v687_v38, 1  ;;  %v727_v45 = vrot.slane %v688_v15, 1  ;;  %v1035_v5 = vld [vmem:[%s1598_s1 + $0x8] ss:$0 sm:$0xff] }
  0x65   : > { %v723_v11 = vsel %vm262_vm0, %v721_v10, %v722_v6  ;;  %v728_v19 = vrot.slane %v689_v23, 1  ;;  %v1542_v57 = vadd.f32 %v708_v51, %v646_v33  ;;  %v1544_v27 = vadd.f32 %v711_v40, %v647_v53 }
  0x66   : > { %v726_v48 = vsel %vm262_vm0, %v724_v22, %v725_v32  ;;  %v740_v58 = vadd.f32 %v714_v21, %v1474_v49  ;;  %v741_v59 = vadd.f32 %v717_v9, %v1476_v56  ;;  %v742_v60 = vadd.f32 %v720_v17, %v650_v4 }
  0x67   : > { %v729_v33 = vsel %vm262_vm0, %v727_v45, %v728_v19  ;;  %v743_v53 = vadd.f32 %v723_v11, %v1487_v20  ;;  %v744_v38 = vadd.f32 %v726_v48, %v1489_v18  ;;  %v754_v15 = vunpack.c.l.bf16 %v1027_v63 }
  0x68   : > { %v745_v23 = vadd.f32 %v729_v33, %v1491_v46  ;;  %v755_v49 = vunpack.c.l.bf16 %v1028_v14  ;;  %v756_v16 = vunpack.c.l.bf16 %v1029_v7  ;;  %v757_v56 = vunpack.c.l.bf16 %v1030_v47  ;;  %v1036_v14 = vld [vmem:[%s1599_s2] ss:$0 sm:$0xff] }
  0x69   : > { %v758_v4 = vunpack.c.l.bf16 %v1031_v28  ;;  %v759_v50 = vunpack.c.l.bf16 %v1032_v61  ;;  %v760_v39 = vunpack.c.l.bf16 %v1033_v2  ;;  %v761_v43 = vunpack.c.l.bf16 %v1034_v8 }
  0x6a   : > { %v766_v24 = vmul.f32 %v1035_v5, %v754_v15  ;;  %v767_v44 = vmul.f32 %v1035_v5, %v662_v29  ;;  %v768_v26 = vmul.f32 %v1035_v5, %v755_v49  ;;  %v769_v20 = vmul.f32 %v1035_v5, %v663_v13 }
  0x6b   : > { %v770_v62 = vmul.f32 %v1035_v5, %v756_v16  ;;  %v771_v18 = vmul.f32 %v1035_v5, %v664_v25  ;;  %v772_v46 = vmul.f32 %v1035_v5, %v757_v56  ;;  %v773_v51 = vmul.f32 %v1035_v5, %v665_v36 }
  0x6c   : > { %v774_v40 = vmul.f32 %v1035_v5, %v758_v4  ;;  %v775_v0 = vmul.f32 %v1035_v5, %v666_v30  ;;  %v776_v1 = vmul.f32 %v1035_v5, %v759_v50  ;;  %v777_v35 = vmul.f32 %v1035_v5, %v667_v54 }
  0x6d   : > { %v778_v29 = vmul.f32 %v1035_v5, %v760_v39  ;;  %v779_v52 = vmul.f32 %v1035_v5, %v668_v37  ;;  %v780_v13 = vmul.f32 %v1035_v5, %v761_v43  ;;  %v781_v55 = vmul.f32 %v1035_v5, %v669_v31 }
  0x6e   : > { %v798_v25 = vrot.slane %v766_v24, 2  ;;  %v799_v21 = vrot.slane %v767_v44, 2  ;;  %v801_v12 = vrot.slane %v768_v26, 2  ;;  %v802_v36 = vrot.slane %v769_v20, 2 }
  0x6f   : > { %v804_v9 = vrot.slane %v770_v62, 2  ;;  %v805_v10 = vrot.slane %v771_v18, 2  ;;  %v807_v41 = vrot.slane %v772_v46, 2  ;;  %v808_v30 = vrot.slane %v773_v51, 2 }
  0x70   : > { %v800_v6 = vsel %vm355_vm1, %v798_v25, %v799_v21  ;;  %v803_v34 = vsel %vm355_vm1, %v801_v12, %v802_v36  ;;  %v810_v54 = vrot.slane %v774_v40, 2  ;;  %v811_v63 = vrot.slane %v775_v0, 2 }
  0x71   : > { %v806_v3 = vsel %vm355_vm1, %v804_v9, %v805_v10  ;;  %v809_v37 = vsel %vm355_vm1, %v807_v41, %v808_v30  ;;  %v813_v42 = vrot.slane %v776_v1, 2  ;;  %v814_v31 = vrot.slane %v777_v35, 2 }
  0x72   : > { %v812_v17 = vsel %vm355_vm1, %v810_v54, %v811_v63  ;;  %v816_v22 = vrot.slane %v778_v29, 2  ;;  %v817_v32 = vrot.slane %v779_v52, 2  ;;  %v819_v45 = vrot.slane %v780_v13, 2 }
  0x73   : > { %v815_v7 = vsel %vm355_vm1, %v813_v42, %v814_v31  ;;  %v820_v11 = vrot.slane %v781_v55, 2  ;;  %v830_v19 = vadd.f32 %v800_v6, %v1542_v57  ;;  %v831_v47 = vadd.f32 %v803_v34, %v1544_v27 }
  0x74   : > { %v818_v28 = vsel %vm355_vm1, %v816_v22, %v817_v32  ;;  %v832_v48 = vadd.f32 %v806_v3, %v740_v58  ;;  %v833_v61 = vadd.f32 %v809_v37, %v741_v59  ;;  %v834_v2 = vadd.f32 %v812_v17, %v742_v60 }
  0x75   : > { %v821_v8 = vsel %vm355_vm1, %v819_v45, %v820_v11  ;;  %v835_v5 = vadd.f32 %v815_v7, %v743_v53  ;;  %v836_v33 = vadd.f32 %v818_v28, %v744_v38  ;;  %v844_v15 = vadd.f32 %v1036_v14, %v830_v19 }
  0x76   : > { %v837_v49 = vadd.f32 %v821_v8, %v745_v23  ;;  %v845_v16 = vadd.f32 %v1036_v14, %v831_v47  ;;  %v846_v56 = vadd.f32 %v1036_v14, %v832_v48  ;;  %v847_v4 = vadd.f32 %v1036_v14, %v833_v61 }
  0x77   : > { %v848_v50 = vadd.f32 %v1036_v14, %v834_v2  ;;  %v849_v39 = vadd.f32 %v1036_v14, %v835_v5  ;;  %v850_v43 = vadd.f32 %v1036_v14, %v836_v33  ;;  %v1037_v57 = vmul.f32 -1.442695, %v844_v15 }
  0x78   : > { %v851_v24 = vadd.f32 %v1036_v14, %v837_v49  ;;  %v1038_v27 = vmul.f32 -1.442695, %v845_v16  ;;  %v1039_v44 = vmul.f32 -1.442695, %v846_v56  ;;  %v1040_v26 = vmul.f32 -1.442695, %v847_v4 }
  0x79   : > { %1080 = vpow2.f32 %v1037_v57  ;;  %v1041_v58 = vmul.f32 -1.442695, %v848_v50  ;;  %v1042_v59 = vmul.f32 -1.442695, %v849_v39  ;;  %v1043_v60 = vmul.f32 -1.442695, %v850_v43 }
  0x7a   : > { %1082 = vpow2.f32 %v1038_v27  ;;  %v1044_v53 = vmul.f32 -1.442695, %v851_v24 }
  0x7b   : > { %1084 = vpow2.f32 %v1039_v44 }
  0x7c   : > { %1086 = vpow2.f32 %v1040_v26 }
  0x7d   : > { %1088 = vpow2.f32 %v1041_v58 }
  0x7e   : > { %1090 = vpow2.f32 %v1042_v59 }
  0x7f   : > { %1092 = vpow2.f32 %v1043_v60 }
  0x80   : > { %1094 = vpow2.f32 %v1044_v53 }
  0x83   : > { %v1081_v38 = vpop.eup %1080 }
  0x84   : > { %v1083_v23 = vpop.eup %1082  ;;  %v876_v20 = vadd.f32 1.0, %v1081_v38 }
  0x85   : > { %v1085_v62 = vpop.eup %1084  ;;  %v877_v18 = vadd.f32 1.0, %v1083_v23 }
  0x86   : > { %v1087_v46 = vpop.eup %1086  ;;  %v878_v51 = vadd.f32 1.0, %v1085_v62  ;;  %1096 = vrcp.f32 %v876_v20 }
  0x87   : > { %v1089_v40 = vpop.eup %1088  ;;  %v879_v0 = vadd.f32 1.0, %v1087_v46  ;;  %1098 = vrcp.f32 %v877_v18 }
  0x88   : > { %v1091_v1 = vpop.eup %1090  ;;  %v880_v35 = vadd.f32 1.0, %v1089_v40  ;;  %1100 = vrcp.f32 %v878_v51 }
  0x89   : > { %v1093_v29 = vpop.eup %1092  ;;  %v881_v52 = vadd.f32 1.0, %v1091_v1  ;;  %1102 = vrcp.f32 %v879_v0 }
  0x8a   : > { %v1095_v13 = vpop.eup %1094  ;;  %v882_v55 = vadd.f32 1.0, %v1093_v29  ;;  %1104 = vrcp.f32 %v880_v35 }
  0x8b   : > { %v883_v25 = vadd.f32 1.0, %v1095_v13  ;;  %1106 = vrcp.f32 %v881_v52 }
  0x8c   : > { %1108 = vrcp.f32 %v882_v55 }
  0x8d   : > { %1110 = vrcp.f32 %v883_v25 }
  0x90   : > { %v1097_v21 = vpop.eup %1096 }
  0x91   : > { %v1099_v12 = vpop.eup %1098  ;;  %v900_v36 = vmul.f32 %v1097_v21, %v844_v15 }
  0x92   : > { %v1101_v9 = vpop.eup %1100  ;;  %v901_v10 = vmul.f32 %v1099_v12, %v845_v16 }
  0x93   : > { %v1103_v41 = vpop.eup %1102  ;;  %v902_v30 = vmul.f32 %v1101_v9, %v846_v56 }
  0x94   : > { %v1105_v6 = vpop.eup %1104  ;;  %v903_v34 = vmul.f32 %v1103_v41, %v847_v4  ;;  %v1051_v54 = vpack.c.bf16 %v901_v10, %v900_v36 }
  0x95   : > { %v1107_v63 = vpop.eup %1106  ;;  %v904_v3 = vmul.f32 %v1105_v6, %v848_v50 }
  0x96   : > { %v1109_v37 = vpop.eup %1108  ;;  %v905_v42 = vmul.f32 %v1107_v63, %v849_v39  ;;  %1052 = vst [vmem:[%s170_s27] sm:$0xff] %v1051_v54   ;;  %v1056_v31 = vpack.c.bf16 %v903_v34, %v902_v30 }
  0x97   : > { %v1111_v14 = vpop.eup %1110  ;;  %v906_v17 = vmul.f32 %v1109_v37, %v850_v43 }
  0x98   : > { %v907_v22 = vmul.f32 %v1111_v14, %v851_v24  ;;  %1068 = vst [vmem:[%s170_s27 + $0x8] sm:$0xff] %v1056_v31   ;;  %v1061_v32 = vpack.c.bf16 %v905_v42, %v904_v3 }
  0x9a   : > { %1069 = vst [vmem:[%s170_s27 + $0x10] sm:$0xff] %v1061_v32   ;;  %v1066_v45 = vpack.c.bf16 %v907_v22, %v906_v17 }
  0x9c   : > { %1070 = vst [vmem:[%s170_s27 + $0x18] sm:$0xff] %v1066_v45  }
  0x9d PF: > { %s13_s12 = sadd.s32 1, %s1118_s12  }
  0x9e   : > { %p10_p4 = scmp.ge.s32.totalorder %s13_s12, 4  }
  0xa0   :  { %12 = sbr.rel (!%p10_p4) target bundleno = 1 (0x1), region = 64 }

// kernel: effnet_forward.11
= control target key start
LH: loop header
LB: loop body
LE: loop exit
PB: predicated region body
PF: predicated region fallthrough
CT: control target
= control target key end

     0   :  { %s799_s12 = smov 0   ;;  %s801_s13 = smov 0   ;;  %s880_s0 = inlined_call_operand.vmem [shape: bf16[2,64,128], index: 0, kind: input, shape index: {}]   ;;  %s881_s1 = inlined_call_operand.vmem [shape: bf16[1,128,128], index: 1, kind: input, shape index: {}]   ;;  %s882_s2 = inlined_call_operand.vmem [shape: f32[1,128], index: 2, kind: input, shape index: {}]   ;;  %s883_s3 = inlined_call_operand.vmem [shape: bf16[2,64,128], index: 3, kind: output, shape index: {}]  }
   0x1   :  { %s803_s14 = smov 0  }
   0x2 LB: > { %s25_s15 = sadd.s32 1, %s773_s13  ;;  %p566_p0 = scmp.ge.s32.totalorder %s777_s14, 1  ;;  %s777_s14 = sphi %s803_s14, %s13_s14   ;;  %s773_s13 = sphi %s801_s13, %s885_s13   ;;  %s769_s12 = sphi %s799_s12, %s884_s12  }
   0x3   : > { %p27_p1 = scmp.ge.s32.totalorder %s25_s15, 2  ;;  %p158_p2 = scmp.lt.s32.totalorder %s777_s14, 3 }
   0x5   : > { %s887_s15 = smov (%p27_p1, %s25_s15), 0  ;;  %p159_p3 = pnand %p566_p0, %p158_p2 }
   0x6   : > { %v711_v0 = vld [vmem:[%s881_s1] sm:$0xff] (!%p159_p3)   ;;  %p191_p4 = scmp.lt.s32.totalorder (!%p159_p3), %s769_s12, 1  ;;  %v712_v1 = vld [vmem:[%s881_s1 + $0x8] sm:$0xff] (!%p159_p3)   ;;  %v713_v2 = vld [vmem:[%s881_s1 + $0x10] sm:$0xff] (!%p159_p3)  }
   0x7   : > { %162 = sbr.rel (%p159_p3) target bundleno = 291 (0x123), region = 32  ;;  %647 = vmatprep.subr.bf16.mxu0 (!%p159_p3), %v711_v0  ;;  %671 = vmatprep.subr.bf16.mxu1 (!%p159_p3), %v711_v0  ;;  %v714_v3 = vld [vmem:[%s881_s1 + $0x18] sm:$0xff] (!%p159_p3)   ;;  %v715_v6 = vld [vmem:[%s881_s1 + $0x20] sm:$0xff] (!%p159_p3)   ;;  %v716_v7 = vld [vmem:[%s881_s1 + $0x28] sm:$0xff] (!%p159_p3)  }
   0x8   : > { %648 = vmatpush3.bf16.msra.mxu0 (!%p159_p3), %v711_v0  ;;  %679 = vmatpush3.bf16.msra.mxu1 (!%p159_p3), %v711_v0  ;;  %v717_v8 = vld [vmem:[%s881_s1 + $0x30] sm:$0xff] (!%p159_p3)   ;;  %v718_v9 = vld [vmem:[%s881_s1 + $0x38] sm:$0xff] (!%p159_p3)   ;;  %v571_v12 = vld [vmem:[%s882_s2] ss:$0 sm:$0xff] (!%p159_p3) }
   0x9   : > { %649 = vmatprep.subr.bf16.mxu0 (!%p159_p3), %v712_v1  ;;  %672 = vmatprep.subr.bf16.mxu1 (!%p159_p3), %v712_v1 }
   0xc   : > { %650 = vmatpush3.bf16.msra.mxu0 (!%p159_p3), %v712_v1  ;;  %680 = vmatpush3.bf16.msra.mxu1 (!%p159_p3), %v712_v1 }
   0xd   : > { %651 = vmatprep.subr.bf16.mxu0 (!%p159_p3), %v713_v2  ;;  %673 = vmatprep.subr.bf16.mxu1 (!%p159_p3), %v713_v2 }
   0xe   : > { %s889_s12 = smov (!%p191_p4, %s769_s12), 1 }
   0xf   : > { %s602_s22 = sshll.u32 %s889_s12, 5 }
  0x10   : > { %s834_s25 = scalar_lea.vmem %s880_s0, %s602_s22  ;;  %652 = vmatpush3.bf16.msra.mxu0 %v713_v2  ;;  %681 = vmatpush3.bf16.msra.mxu1 %v713_v2  ;;  %s208_s17 = scalar_lea.vmem %s883_s3, %s602_s22 }
  0x11   : > { %v719_v4 = vld [vmem:[%s834_s25] sm:$0xff]   ;;  %v720_v5 = vld [vmem:[%s834_s25 + $0x10] sm:$0xff]   ;;  %653 = vmatprep.subr.bf16.mxu0 %v714_v3  ;;  %674 = vmatprep.subr.bf16.mxu1 %v714_v3  ;;  %v721_v10 = vld [vmem:[%s834_s25 + $0x8] sm:$0xff]  }
  0x12   : > { %663 = vmatprep.mubr.bf16.mxu0 %v719_v4  ;;  %667 = vmatprep.mubr.bf16.mxu1 %v720_v5  ;;  %v722_v11 = vld [vmem:[%s834_s25 + $0x18] sm:$0xff]  }
  0x14   : > { %654 = vmatpush3.bf16.msra.mxu0 %v714_v3  ;;  %682 = vmatpush3.bf16.msra.mxu1 %v714_v3 }
  0x15   : > { %655 = vmatprep.subr.bf16.mxu0 %v715_v6  ;;  %675 = vmatprep.subr.bf16.mxu1 %v715_v6 }
  0x18   : > { %656 = vmatpush3.bf16.msra.mxu0 %v715_v6  ;;  %683 = vmatpush3.bf16.msra.mxu1 %v715_v6 }
  0x19   : > { %657 = vmatprep.subr.bf16.mxu0 %v716_v7  ;;  %676 = vmatprep.subr.bf16.mxu1 %v716_v7 }
  0x1c   : > { %658 = vmatpush3.bf16.msra.mxu0 %v716_v7  ;;  %684 = vmatpush3.bf16.msra.mxu1 %v716_v7 }
  0x1d   : > { %659 = vmatprep.subr.bf16.mxu0 %v717_v8  ;;  %677 = vmatprep.subr.bf16.mxu1 %v717_v8 }
  0x20   : > { %660 = vmatpush3.bf16.msra.mxu0 %v717_v8  ;;  %685 = vmatpush3.bf16.msra.mxu1 %v717_v8 }
  0x21   : > { %661 = vmatprep.subr.bf16.mxu0 %v718_v9  ;;  %678 = vmatprep.subr.bf16.mxu1 %v718_v9 }
  0x24   : > { %662 = vmatpush3.bf16.msra.mxu0 %v718_v9  ;;  %686 = vmatpush3.bf16.msra.mxu1 %v718_v9 }
  0x27   : > { %664 = vmatmul.mubr.bf16.vlgmr.msra.gmra.mrb[0].mxu0 %v721_v10  ;;  %668 = vmatmul.mubr.bf16.vlgmr.msra.gmra.mrb[0].mxu1 %v722_v11 }
  0xfa   : > { %v665_v13 = vpop.f32.mrb[0].mxu0  ;;  %v669_v14 = vpop.f32.mrb[0].mxu1 }
  0xfb   : > { %v357_v15 = vadd.f32 %v665_v13, %v571_v12  ;;  %v373_v16 = vadd.f32 %v669_v14, %v571_v12  ;;  %v348_v17 = vpop.f32.mrb[1].mxu0  ;;  %v364_v18 = vpop.f32.mrb[1].mxu1 }
  0xfc   : > { %v858_v19 = vadd.f32 %v571_v12, %v348_v17  ;;  %v860_v20 = vadd.f32 %v571_v12, %v364_v18  ;;  %v666_v21 = vpop.f32.mrb[2].mxu0  ;;  %v670_v22 = vpop.f32.mrb[2].mxu1 }
  0xfd   : > { %v586_v23 = vmul.f32 -1.442695, %v357_v15  ;;  %v590_v24 = vmul.f32 -1.442695, %v373_v16  ;;  %v360_v25 = vadd.f32 %v666_v21, %v571_v12  ;;  %v376_v26 = vadd.f32 %v670_v22, %v571_v12  ;;  %v351_v27 = vpop.f32.mrb[3].mxu0  ;;  %v367_v28 = vpop.f32.mrb[3].mxu1 }
  0xfe   : > { %v584_v29 = vmul.f32 -1.442695, %v858_v19  ;;  %v588_v30 = vmul.f32 -1.442695, %v860_v20  ;;  %v352_v31 = vadd.f32 %v571_v12, %v351_v27  ;;  %v368_v32 = vadd.f32 %v571_v12, %v367_v28 }
  0xff   : > { %723 = vpow2.f32 %v586_v23  ;;  %v587_v33 = vmul.f32 -1.442695, %v360_v25  ;;  %v591_v34 = vmul.f32 -1.442695, %v376_v26 }
 0x100   : > { %725 = vpow2.f32 %v590_v24  ;;  %v585_v35 = vmul.f32 -1.442695, %v352_v31  ;;  %v589_v36 = vmul.f32 -1.442695, %v368_v32 }
 0x101   : > { %727 = vpow2.f32 %v584_v29 }
 0x102   : > { %729 = vpow2.f32 %v588_v30 }
 0x103   : > { %731 = vpow2.f32 %v587_v33 }
 0x104   : > { %733 = vpow2.f32 %v591_v34 }
 0x105   : > { %735 = vpow2.f32 %v585_v35 }
 0x106   : > { %737 = vpow2.f32 %v589_v36 }
 0x109   : > { %v724_v37 = vpop.eup %723 }
 0x10a   : > { %v726_v38 = vpop.eup %725  ;;  %v405_v39 = vadd.f32 1.0, %v724_v37 }
 0x10b   : > { %v728_v40 = vpop.eup %727  ;;  %v409_v41 = vadd.f32 1.0, %v726_v38 }
 0x10c   : > { %v730_v42 = vpop.eup %729  ;;  %739 = vrcp.f32 %v405_v39  ;;  %v403_v43 = vadd.f32 1.0, %v728_v40 }
 0x10d   : > { %v732_v44 = vpop.eup %731  ;;  %741 = vrcp.f32 %v409_v41  ;;  %v407_v45 = vadd.f32 1.0, %v730_v42 }
 0x10e   : > { %v734_v46 = vpop.eup %733  ;;  %743 = vrcp.f32 %v403_v43  ;;  %v406_v47 = vadd.f32 1.0, %v732_v44 }
 0x10f   : > { %v736_v48 = vpop.eup %735  ;;  %745 = vrcp.f32 %v407_v45  ;;  %v410_v49 = vadd.f32 1.0, %v734_v46 }
 0x110   : > { %v738_v50 = vpop.eup %737  ;;  %747 = vrcp.f32 %v406_v47  ;;  %v404_v51 = vadd.f32 1.0, %v736_v48 }
 0x111   : > { %749 = vrcp.f32 %v410_v49  ;;  %v408_v52 = vadd.f32 1.0, %v738_v50 }
 0x112   : > { %751 = vrcp.f32 %v404_v51 }
 0x113   : > { %753 = vrcp.f32 %v408_v52 }
 0x116   : > { %v740_v53 = vpop.eup %739 }
 0x117   : > { %v742_v54 = vpop.eup %741  ;;  %v429_v59 = vmul.f32 %v740_v53, %v357_v15 }
 0x118   : > { %v744_v55 = vpop.eup %743  ;;  %v433_v62 = vmul.f32 %v742_v54, %v373_v16 }
 0x119   : > { %v746_v56 = vpop.eup %745  ;;  %v427_v1 = vmul.f32 %v744_v55, %v858_v19 }
 0x11a   : > { %v748_v57 = vpop.eup %747  ;;  %v431_v4 = vmul.f32 %v746_v56, %v860_v20 }
 0x11b   : > { %v750_v58 = vpop.eup %749  ;;  %v430_v60 = vmul.f32 %v748_v57, %v360_v25 }
 0x11c   : > { %v752_v61 = vpop.eup %751  ;;  %v434_v63 = vmul.f32 %v750_v58, %v376_v26 }
 0x11d   : > { %v754_v0 = vpop.eup %753  ;;  %v620_v2 = vpack.c.bf16 %v430_v60, %v429_v59  ;;  %v428_v3 = vmul.f32 %v752_v61, %v352_v31 }
 0x11e   : > { %v630_v5 = vpack.c.bf16 %v434_v63, %v433_v62  ;;  %v432_v6 = vmul.f32 %v754_v0, %v368_v32 }
 0x11f   : > { %632 = vst [vmem:[%s208_s17 + $0x8] sm:$0xff] %v620_v2   ;;  %v615_v7 = vpack.c.bf16 %v428_v3, %v427_v1 }
 0x120   : > { %634 = vst [vmem:[%s208_s17 + $0x18] sm:$0xff] %v630_v5   ;;  %v625_v8 = vpack.c.bf16 %v432_v6, %v431_v4 }
 0x121   : > { %616 = vst [vmem:[%s208_s17] sm:$0xff] %v615_v7  }
 0x122   : > { %633 = vst [vmem:[%s208_s17 + $0x10] sm:$0xff] %v625_v8  }
 0x123 PF: > { %s13_s14 = sadd.s32 1, %s777_s14   ;;  %s884_s12 = smov %s773_s13 }
 0x124   : > { %p10_p5 = scmp.ge.s32.totalorder %s13_s14, 4   ;;  %s885_s13 = smov %s887_s15 }
 0x126   :  { %12 = sbr.rel (!%p10_p5) target bundleno = 2 (0x2), region = 62 }

// kernel: effnet_forward.15
= control target key start
LH: loop header
LB: loop body
LE: loop exit
PB: predicated region body
PF: predicated region fallthrough
CT: control target
= control target key end

     0   :  { %s117_s0 = inlined_call_operand.vmem [shape: bf16[2,16,128], index: 0, kind: input, shape index: {}]   ;;  %s118_s1 = inlined_call_operand.hbm [shape: f32[2,128], index: 1, kind: output, shape index: {}]  }
   0x1   :  { %v55_v0 = vld [vmem:[%s117_s0] sm:$0xff]   ;;  %v62_v1 = vld [vmem:[%s117_s0 + $0x8] sm:$0xff]  }
   0x2   :  { %6 = vsyncpa [#allocation3], 0  ;;  %v56_v2 = vunpack.c.l.bf16 %v55_v0  ;;  %v57_v3 = vunpack.c.h.bf16 %v55_v0  ;;  %v60_v4 = vunpack.c.l.bf16 %v62_v1  ;;  %v61_v5 = vunpack.c.h.bf16 %v62_v1  ;;  %s88_s0 = smov [#allocation2]  }
   0x3   :  { %s46_s10 = sshll.u32 %s88_s0, 4  ;;  %vm36_vm0 = vcmask 1041409   ;;  %s47_s10 = int_to_ptr.vmem [resolvable:$true] %s46_s10 }
   0x4   :  { %v17_v6 = vadd.f32 %v57_v3, %v56_v2  ;;  %v24_v7 = vadd.f32 %v61_v5, %v60_v4  ;;  %s64_s11 = scalar_lea.vmem %s47_s10, 32  ;;  %p69_p1 = scmp.lt.s32.totalorder %s47_s10, %s47_s10 }
   0x5   :  { %p65_p0 = scmp.ne.s32.totalorder %s47_s10, %s64_s11  ;;  %p70_p2 = scmp.lt.s32.totalorder %s64_s11, %s64_s11 }
   0x6   :  { %v18_v8 = vrot.slane %v17_v6, 4  ;;  %v25_v9 = vrot.slane %v24_v7, 4 }
   0x7   :  { %p71_p3 = por %p70_p2, %p69_p1 }
   0x8   :  { %v19_v10 = vadd.f32 %v18_v8, %v17_v6  ;;  %v26_v11 = vadd.f32 %v25_v9, %v24_v7 }
   0x9   :  { %p72_p4 = pnand %p71_p3, %p65_p0 }
   0xa   :  { %v20_v12 = vrot.slane %v19_v10, 2  ;;  %v27_v13 = vrot.slane %v26_v11, 2 }
   0xc   :  { %v21_v14 = vadd.f32 %v20_v12, %v19_v10  ;;  %v28_v15 = vadd.f32 %v27_v13, %v26_v11 }
   0xe   :  { %v22_v16 = vrot.slane %v21_v14, 1  ;;  %v29_v17 = vrot.slane %v28_v15, 1 }
  0x10   :  { %v23_v18 = vadd.f32 %v22_v16, %v21_v14  ;;  %v30_v19 = vadd.f32 %v29_v17, %v28_v15 }
  0x12   :  { %v32_v20 = vmul.f32 0.0625, %v23_v18  ;;  %v33_v21 = vmul.f32 0.0625, %v30_v19 }
  0x14   :  { %v37_v22 = vsel %vm36_vm0, %v33_v21, %v32_v20 }
  0x15   :  { %39 = vst [vmem:[#allocation2] sm:$0x3] %v37_v22 }
  0x16   :  { %75 = shalt.err (!%p72_p4)
}
  0x17   :  { %s76_s14 = scalar_lea.hbm %s118_s1, 32 }
  0x18   :  { %p77_p5 = scmp.ne.s32.totalorder %s118_s1, %s76_s14  ;;  %p80_p6 = scmp.lt.u32.totalorder %s76_s14, %s118_s1 }
  0x1a   :  { %p82_p7 = pnand %p80_p6, %p77_p5 }
  0x1c   :  { %85 = shalt.err (!%p82_p7)
}
  0x1d   :  { %49 = dma.vmem_to_hbm [thread:$0]  %s47_s10, 32, %s118_s1, [#allocation3]  }
  0x1e   :  { %86 = dma.done.wait [#allocation3], 32  }
  0x1f   :  { %87 = vsyncadd [#allocation3], 4294967264 }
  0x20   :  { %53 = vsyncpa [#allocation3], 1 }

// kernel: effnet_forward.12
= control target key start
LH: loop header
LB: loop body
LE: loop exit
PB: predicated region body
PF: predicated region fallthrough
CT: control target
= control target key end

     0   :  { %s770_s21 = smov 0   ;;  %s920_s0 = inlined_call_operand.vmem [shape: bf16[2,5,5,128], index: 0, kind: input, shape index: {}]   ;;  %s921_s1 = inlined_call_operand.vmem [shape: bf16[2,5,5,128], index: 1, kind: input, shape index: {}]   ;;  %s922_s2 = inlined_call_operand.vmem [shape: bf16[2,5,5,128], index: 2, kind: input, shape index: {}]   ;;  %s923_s3 = inlined_call_operand.vmem [shape: bf16[2,5,5,128], index: 3, kind: input, shape index: {}]   ;;  %s924_s4 = inlined_call_operand.vmem [shape: f32[9,128], index: 4, kind: input, shape index: {}]   ;;  %s925_s5 = inlined_call_operand.vmem [shape: f32[1,128], index: 5, kind: input, shape index: {}]   ;;  %s926_s6 = inlined_call_operand.vmem [shape: bf16[2,4,4,128], index: 6, kind: output, shape index: {}]  }
   0x1 LB: > { %s670_s22 = sadd.s32 4294967295, %s733_s21   ;;  %p674_p0 = scmp.ge.s32.totalorder %s733_s21, 1  ;;  %s733_s21 = sphi %s770_s21, %s16_s21  }
   0x2   : > { %p242_p1 = scmp.lt.s32.totalorder %s733_s21, 3 }
   0x4   : > { %p243_p2 = pnand %p674_p0, %p242_p1 }
   0x5   : > { %p287_p3 = scmp.lt.s32.totalorder (!%p243_p2), %s670_s22, 1  ;;  %v323_v0 = vlaneseq (!%p243_p2)  ;;  %v312_v2 = vld [vmem:[%s924_s4] sm:$0xff] (!%p243_p2)  ;;  %v833_v37 = vld [vmem:[%s924_s4 + $0x8] ss:$0 sm:$0xff] (!%p243_p2) }
   0x6   : > { %246 = sbr.rel (%p243_p2) target bundleno = 92 (0x5c), region = 44 }
   0x7   : > { %v324_v1 = vshrl.u32 (!%p243_p2), %v323_v0, 7 }
   0x9   : > { %v325_v3 = vsub.s32 (!%p243_p2), 0, %v324_v1  ;;  %v345_v4 = vsub.s32 (!%p243_p2), 1, %v324_v1  ;;  %v365_v5 = vsub.s32 (!%p243_p2), 2, %v324_v1  ;;  %v397_v6 = vsub.s32 (!%p243_p2), 3, %v324_v1 }
   0xa   : > { %v417_v7 = vsub.s32 (!%p243_p2), 4, %v324_v1  ;;  %v437_v8 = vsub.s32 (!%p243_p2), 5, %v324_v1  ;;  %v470_v9 = vsub.s32 (!%p243_p2), 6, %v324_v1  ;;  %v491_v13 = vsub.s32 (!%p243_p2), 7, %v324_v1 }
   0xb   : > { %v794_v10 = vrot.slane (!%p243_p2), %v312_v2, %v325_v3  ;;  %v796_v11 = vrot.slane (!%p243_p2), %v312_v2, %v345_v4  ;;  %v798_v12 = vrot.slane (!%p243_p2), %v312_v2, %v365_v5  ;;  %v813_v17 = vrot.slane (!%p243_p2), %v312_v2, %v397_v6 }
   0xc   : > { %v818_v24 = vrot.slane (!%p243_p2), %v312_v2, %v437_v8  ;;  %v820_v27 = vrot.slane (!%p243_p2), %v312_v2, %v417_v7  ;;  %v836_v40 = vrot.slane (!%p243_p2), %v312_v2, %v470_v9  ;;  %v838_v41 = vrot.slane (!%p243_p2), %v312_v2, %v491_v13 }
   0xd   : > { %s928_s22 = smov (!%p287_p3, %s670_s22), 1 }
   0xe   : > { %s702_s25 = smul.u32 20, %s928_s22  ;;  %s701_s18 = sshll.u32 %s928_s22, 3 }
   0xf   : > { %s311_s23 = scalar_lea.vmem %s926_s6, %s701_s18 }
  0x10   : > { %s787_s28 = scalar_lea.vmem %s920_s0, %s702_s25  ;;  %s792_s7 = scalar_lea.vmem %s921_s1, %s702_s25 }
  0x11   : > { %s803_s10 = scalar_lea.vmem %s922_s2, %s702_s25  ;;  %s808_s13 = scalar_lea.vmem %s923_s3, %s702_s25  ;;  %v315_v14 = vld [vmem:[%s787_s28] sm:$0x3]  ;;  %v681_v29 = vld [vmem:[%s787_s28 + $0x4] sm:$0x3]  ;;  %v682_v62 = vld [vmem:[%s787_s28 + $0x8] sm:$0x3] }
  0x12   : > { %v335_v15 = vld [vmem:[%s792_s7] sm:$0x3]  ;;  %v319_v18 = vunpack.c.l.bf16 %v315_v14  ;;  %v689_v30 = vld [vmem:[%s787_s28 + $0x4] sm:$0x7]  ;;  %v464_v39 = vunpack.c.l.bf16 %v681_v29  ;;  %v690_v63 = vld [vmem:[%s787_s28 + $0x8] sm:$0x7] }
  0x13   : > { %v355_v16 = vld [vmem:[%s787_s28] sm:$0x7]  ;;  %v339_v19 = vunpack.c.l.bf16 %v335_v15  ;;  %v685_v34 = vld [vmem:[%s792_s7 + $0x4] sm:$0x3]  ;;  %v505_v47 = vunpack.c.l.bf16 %v689_v30  ;;  %v317_v4 = vld [vmem:[%s787_s28 + $0x8] sm:$0x3] }
  0x14   : > { %v359_v20 = vunpack.c.l.bf16 %v355_v16  ;;  %v387_v21 = vld [vmem:[%s803_s10] sm:$0x3]  ;;  %v327_v31 = vmul.f32 %v794_v10, %v319_v18  ;;  %v316_v35 = vld [vmem:[%s787_s28 + $0x4] sm:$0x3]  ;;  %v485_v51 = vunpack.c.l.bf16 %v685_v34  ;;  %v472_v2 = vmul.f32 %v836_v40, %v464_v39  ;;  %v337_v5 = vld [vmem:[%s792_s7 + $0x8] sm:$0x3] }
  0x15   : > { %v407_v22 = vld [vmem:[%s808_s13] sm:$0x3]  ;;  %v391_v25 = vunpack.c.l.bf16 %v387_v21  ;;  %v347_v32 = vmul.f32 %v796_v11, %v339_v19  ;;  %v336_v36 = vld [vmem:[%s792_s7 + $0x4] sm:$0x3]  ;;  %v320_v52 = vunpack.c.l.bf16 %v316_v35  ;;  %v847_v55 = vmul.f32 %v833_v37, %v505_v47  ;;  %v686_v13 = vld [vmem:[%s792_s7 + $0x8] sm:$0x3] }
  0x16   : > { %v427_v23 = vld [vmem:[%s803_s10] sm:$0x7]  ;;  %v411_v26 = vunpack.c.l.bf16 %v407_v22  ;;  %v367_v33 = vmul.f32 %v798_v12, %v359_v20  ;;  %v356_v42 = vld [vmem:[%s787_s28 + $0x4] sm:$0x7]  ;;  %v340_v53 = vunpack.c.l.bf16 %v336_v36  ;;  %v493_v6 = vmul.f32 %v838_v41, %v485_v51  ;;  %v357_v19 = vld [vmem:[%s787_s28 + $0x8] sm:$0x7] }
  0x17   : > { %v431_v28 = vunpack.c.l.bf16 %v427_v23  ;;  %v399_v38 = vmul.f32 %v813_v17, %v391_v25  ;;  %v388_v43 = vld [vmem:[%s803_s10 + $0x4] sm:$0x3]  ;;  %v351_v44 = vadd.f32 %v347_v32, %v327_v31  ;;  %v360_v56 = vunpack.c.l.bf16 %v356_v42  ;;  %v389_v20 = vld [vmem:[%s803_s10 + $0x8] sm:$0x3] }
  0x18   : > { %v375_v45 = vrot.slane %v367_v33, 1  ;;  %v408_v48 = vld [vmem:[%s808_s13 + $0x4] sm:$0x3]  ;;  %v419_v50 = vmul.f32 %v820_v27, %v411_v26  ;;  %v392_v57 = vunpack.c.l.bf16 %v388_v43  ;;  %v328_v58 = vmul.f32 %v794_v10, %v320_v52  ;;  %v409_v26 = vld [vmem:[%s808_s13 + $0x8] sm:$0x3] }
  0x19   : > { %v439_v46 = vmul.f32 %v818_v24, %v431_v28  ;;  %v428_v49 = vld [vmem:[%s803_s10 + $0x4] sm:$0x7]  ;;  %v348_v59 = vmul.f32 %v796_v11, %v340_v53  ;;  %v412_v60 = vunpack.c.l.bf16 %v408_v48  ;;  %v368_v3 = vmul.f32 %v798_v12, %v360_v56  ;;  %v429_v32 = vld [vmem:[%s803_s10 + $0x8] sm:$0x7]  ;;  %v880_v56 = vld [vmem:[%s925_s5] ss:$0 sm:$0xff] }
  0x1a   : > { %v383_v54 = vadd.f32 %v375_v45, %v351_v44  ;;  %v432_v61 = vunpack.c.l.bf16 %v428_v49  ;;  %v521_v7 = vrot.slane %v847_v55, 1  ;;  %v400_v9 = vmul.f32 %v813_v17, %v392_v57  ;;  %v691_v44 = vld [vmem:[%s787_s28 + $0xc] sm:$0x7] }
  0x1b   : > { %v447_v1 = vrot.slane %v439_v46, 1  ;;  %v352_v8 = vadd.f32 %v348_v59, %v328_v58  ;;  %v376_v15 = vrot.slane %v368_v3, 1  ;;  %v506_v18 = vunpack.c.l.bf16 %v690_v63  ;;  %v318_v49 = vld [vmem:[%s787_s28 + $0xc] sm:$0x3] }
  0x1c   : > { %v403_v0 = vadd.f32 %v399_v38, %v383_v54  ;;  %v440_v16 = vmul.f32 %v818_v24, %v432_v61  ;;  %v420_v21 = vmul.f32 %v820_v27, %v412_v60  ;;  %v465_v22 = vunpack.c.l.bf16 %v682_v62  ;;  %v683_v54 = vld [vmem:[%s787_s28 + $0xc] sm:$0x3] }
  0x1d   : > { %v321_v23 = vunpack.c.l.bf16 %v317_v4  ;;  %v341_v25 = vunpack.c.l.bf16 %v337_v5  ;;  %v384_v29 = vadd.f32 %v376_v15, %v352_v8  ;;  %v486_v30 = vunpack.c.l.bf16 %v686_v13  ;;  %v687_v55 = vld [vmem:[%s792_s7 + $0xc] sm:$0x3] }
  0x1e   : > { %v423_v14 = vadd.f32 %v419_v50, %v403_v0  ;;  %v514_v31 = vmul.f32 %v833_v37, %v506_v18  ;;  %v361_v35 = vunpack.c.l.bf16 %v357_v19  ;;  %v393_v36 = vunpack.c.l.bf16 %v389_v20  ;;  %v338_v61 = vld [vmem:[%s792_s7 + $0xc] sm:$0x3] }
  0x1f   : > { %v329_v33 = vmul.f32 %v794_v10, %v321_v23  ;;  %v349_v34 = vmul.f32 %v796_v11, %v341_v25  ;;  %v404_v39 = vadd.f32 %v400_v9, %v384_v29  ;;  %v448_v42 = vrot.slane %v440_v16, 1  ;;  %v390_v3 = vld [vmem:[%s803_s10 + $0xc] sm:$0x3] }
  0x20   : > { %v455_v28 = vadd.f32 %v447_v1, %v423_v14  ;;  %v413_v43 = vunpack.c.l.bf16 %v409_v26  ;;  %v473_v45 = vmul.f32 %v836_v40, %v465_v22  ;;  %v369_v47 = vmul.f32 %v798_v12, %v361_v35  ;;  %v410_v9 = vld [vmem:[%s808_s13 + $0xc] sm:$0x3]  ;;  %v692_v35 = vld [vmem:[%s787_s28 + $0x10] sm:$0x7] }
  0x21   : > { %v353_v46 = vadd.f32 %v349_v34, %v329_v33  ;;  %v433_v48 = vunpack.c.l.bf16 %v429_v32  ;;  %v424_v51 = vadd.f32 %v420_v21, %v404_v39  ;;  %v494_v52 = vmul.f32 %v838_v41, %v486_v30  ;;  %v430_v18 = vld [vmem:[%s803_s10 + $0xc] sm:$0x7]  ;;  %v684_v34 = vld [vmem:[%s787_s28 + $0x10] sm:$0x3] }
  0x22   : > { %v476_v38 = vadd.f32 %v472_v2, %v455_v28  ;;  %v522_v53 = vrot.slane %v514_v31, 1  ;;  %v377_v57 = vrot.slane %v369_v47, 1  ;;  %v401_v58 = vmul.f32 %v813_v17, %v393_v36  ;;  %v358_v2 = vld [vmem:[%s787_s28 + $0xc] sm:$0x7] }
  0x23   : > { %v441_v59 = vmul.f32 %v818_v24, %v433_v48  ;;  %v507_v60 = vunpack.c.l.bf16 %v691_v44  ;;  %v456_v63 = vadd.f32 %v448_v42, %v424_v51  ;;  %v421_v0 = vmul.f32 %v820_v27, %v413_v43 }
  0x24   : > { %v497_v50 = vadd.f32 %v493_v6, %v476_v38  ;;  %v322_v1 = vunpack.c.l.bf16 %v318_v49  ;;  %v385_v4 = vadd.f32 %v377_v57, %v353_v46  ;;  %v466_v6 = vunpack.c.l.bf16 %v683_v54 }
  0x25   : > { %v449_v5 = vrot.slane %v441_v59, 1  ;;  %v487_v8 = vunpack.c.l.bf16 %v687_v55  ;;  %v477_v14 = vadd.f32 %v473_v45, %v456_v63  ;;  %v342_v16 = vunpack.c.l.bf16 %v338_v61 }
  0x26   : > { %v529_v62 = vadd.f32 %v521_v7, %v497_v50  ;;  %v330_v15 = vmul.f32 %v794_v10, %v322_v1  ;;  %v405_v7 = vadd.f32 %v401_v58, %v385_v4  ;;  %v515_v19 = vmul.f32 %v833_v37, %v507_v60 }
  0x27   : > { %v362_v20 = vunpack.c.l.bf16 %v358_v2  ;;  %v394_v21 = vunpack.c.l.bf16 %v390_v3  ;;  %v498_v23 = vadd.f32 %v494_v52, %v477_v14  ;;  %v350_v25 = vmul.f32 %v796_v11, %v342_v16 }
  0x28   : > { %v890_v13 = vadd.f32 %v880_v56, %v529_v62  ;;  %v414_v26 = vunpack.c.l.bf16 %v410_v9  ;;  %v425_v28 = vadd.f32 %v421_v0, %v405_v7  ;;  %v474_v29 = vmul.f32 %v836_v40, %v466_v6 }
  0x29   : > { %v370_v10 = vmul.f32 %v798_v12, %v362_v20  ;;  %v434_v30 = vunpack.c.l.bf16 %v430_v18  ;;  %v530_v31 = vadd.f32 %v522_v53, %v498_v23  ;;  %v495_v32 = vmul.f32 %v838_v41, %v487_v8  ;;  %v688_v12 = vld [vmem:[%s792_s7 + $0x10] sm:$0x3] }
  0x2a   : > { %v695_v22 = vmul.f32 -1.442695, %v890_v13  ;;  %v354_v33 = vadd.f32 %v350_v25, %v330_v15  ;;  %v457_v36 = vadd.f32 %v449_v5, %v425_v28  ;;  %v402_v39 = vmul.f32 %v813_v17, %v394_v21 }
  0x2b   : > { %v378_v38 = vrot.slane %v370_v10, 1  ;;  %v442_v11 = vmul.f32 %v818_v24, %v434_v30  ;;  %v540_v42 = vadd.f32 %v880_v56, %v530_v31  ;;  %v523_v43 = vrot.slane %v515_v19, 1 }
  0x2c   : > { %711 = vpow2.f32 %v695_v22  ;;  %v422_v44 = vmul.f32 %v820_v27, %v414_v26  ;;  %v478_v45 = vadd.f32 %v474_v29, %v457_v36  ;;  %v467_v47 = vunpack.c.l.bf16 %v684_v34 }
  0x2d   : > { %v386_v46 = vadd.f32 %v378_v38, %v354_v33  ;;  %v508_v48 = vunpack.c.l.bf16 %v692_v35  ;;  %v696_v49 = vmul.f32 -1.442695, %v540_v42  ;;  %v450_v52 = vrot.slane %v442_v11, 1 }
  0x2e   : > { %v499_v50 = vadd.f32 %v495_v32, %v478_v45  ;;  %v488_v53 = vunpack.c.l.bf16 %v688_v12  ;;  %v475_v24 = vmul.f32 %v836_v40, %v467_v47 }
  0x2f   : > { %v406_v51 = vadd.f32 %v402_v39, %v386_v46  ;;  %713 = vpow2.f32 %v696_v49  ;;  %v516_v55 = vmul.f32 %v833_v37, %v508_v48 }
  0x30   : > { %v531_v54 = vadd.f32 %v523_v43, %v499_v50  ;;  %v496_v58 = vmul.f32 %v838_v41, %v488_v53 }
  0x31   : > { %v426_v17 = vadd.f32 %v422_v44, %v406_v51  ;;  %v524_v63 = vrot.slane %v516_v55, 1 }
  0x32   : > { %v541_v57 = vadd.f32 %v880_v56, %v531_v54 }
  0x33   : > { %v458_v27 = vadd.f32 %v450_v52, %v426_v17 }
  0x34   : > { %v697_v61 = vmul.f32 -1.442695, %v541_v57 }
  0x35   : > { %v479_v62 = vadd.f32 %v475_v24, %v458_v27 }
  0x36   : > { %v712_v59 = vpop.eup %711 }
  0x37   : > { %v555_v60 = vadd.f32 1.0, %v712_v59  ;;  %v500_v0 = vadd.f32 %v496_v58, %v479_v62 }
  0x39   : > { %715 = vrcp.f32 %v555_v60  ;;  %v532_v1 = vadd.f32 %v524_v63, %v500_v0  ;;  %v714_v2 = vpop.eup %713 }
  0x3a   : > { %717 = vpow2.f32 %v697_v61  ;;  %v556_v3 = vadd.f32 1.0, %v714_v2 }
  0x3b   : > { %v542_v40 = vadd.f32 %v880_v56, %v532_v1 }
  0x3c   : > { %719 = vrcp.f32 %v556_v3 }
  0x3d   : > { %v698_v37 = vmul.f32 -1.442695, %v542_v40 }
  0x3f   : > { %721 = vpow2.f32 %v698_v37 }
  0x43   : > { %v716_v4 = vpop.eup %715 }
  0x44   : > { %v718_v41 = vpop.eup %717  ;;  %v567_v5 = vmul.f32 %v716_v4, %v890_v13 }
  0x45   : > { %v557_v6 = vadd.f32 1.0, %v718_v41 }
  0x46   : > { %v571_v8 = vpack.c.bf16 %v567_v5, %v567_v5  ;;  %v720_v9 = vpop.eup %719 }
  0x47   : > { %723 = vrcp.f32 %v557_v6  ;;  %v568_v14 = vmul.f32 %v720_v9, %v540_v42 }
  0x48   : > { %575 = vst [vmem:[%s311_s23] sm:$0x3] %v571_v8 }
  0x49   : > { %v722_v15 = vpop.eup %721  ;;  %v572_v56 = vpack.c.bf16 %v568_v14, %v568_v14 }
  0x4a   : > { %v558_v16 = vadd.f32 1.0, %v722_v15 }
  0x4b   : > { %576 = vst [vmem:[%s311_s23 + $0x2] sm:$0x3] %v572_v56 }
  0x4c   : > { %725 = vrcp.f32 %v558_v16 }
  0x51   : > { %v724_v18 = vpop.eup %723 }
  0x52   : > { %v569_v7 = vmul.f32 %v724_v18, %v541_v57 }
  0x54   : > { %v573_v19 = vpack.c.bf16 %v569_v7, %v569_v7 }
  0x56   : > { %577 = vst [vmem:[%s311_s23 + $0x4] sm:$0x3] %v573_v19  ;;  %v726_v13 = vpop.eup %725 }
  0x57   : > { %v570_v20 = vmul.f32 %v726_v13, %v542_v40 }
  0x59   : > { %v574_v21 = vpack.c.bf16 %v570_v20, %v570_v20 }
  0x5b   : > { %578 = vst [vmem:[%s311_s23 + $0x6] sm:$0x3] %v574_v21 }
  0x5c PF: > { %s16_s21 = sadd.s32 1, %s733_s21  }
  0x5d   : > { %p13_p4 = scmp.ge.s32.totalorder %s16_s21, 4  }
  0x5f   :  { %15 = sbr.rel (!%p13_p4) target bundleno = 1 (0x1), region = 85 }

// kernel: effnet_forward.13
= control target key start
LH: loop header
LB: loop body
LE: loop exit
PB: predicated region body
PF: predicated region fallthrough
CT: control target
= control target key end

     0   :  { %s605_s12 = smov 0   ;;  %s607_s13 = smov 0   ;;  %s652_s0 = inlined_call_operand.vmem [shape: bf16[2,16,128], index: 0, kind: input, shape index: {}]   ;;  %s653_s1 = inlined_call_operand.vmem [shape: bf16[2,128,128], index: 1, kind: input, shape index: {}]   ;;  %s654_s2 = inlined_call_operand.vmem [shape: f32[1,128], index: 2, kind: input, shape index: {}]   ;;  %s655_s3 = inlined_call_operand.vmem [shape: bf16[2,16,128], index: 3, kind: output, shape index: {}]  }
   0x1   :  { %s609_s14 = smov 0  }
   0x2 LB: > { %s25_s15 = sadd.s32 1, %s577_s13  ;;  %p464_p0 = scmp.ge.s32.totalorder %s581_s14, 1  ;;  %s581_s14 = sphi %s609_s14, %s13_s14   ;;  %s577_s13 = sphi %s607_s13, %s657_s13   ;;  %s573_s12 = sphi %s605_s12, %s656_s12  }
   0x3   : > { %p27_p1 = scmp.ge.s32.totalorder %s25_s15, 2  ;;  %p168_p2 = scmp.lt.s32.totalorder %s581_s14, 3 }
   0x5   : > { %s659_s15 = smov (%p27_p1, %s25_s15), 0  ;;  %p169_p3 = pnand %p464_p0, %p168_p2 }
   0x6   : > { %p206_p4 = scmp.lt.s32.totalorder (!%p169_p3), %s573_s12, 1  ;;  %v583_v0 = vmov (!%p169_p3), 0.0   ;;  %vm584_vm0 = vmmov (!%p169_p3), 0   ;;  %v471_v10 = vld [vmem:[%s654_s2] ss:$0 sm:$0xff] (!%p169_p3) }
   0x7   : > { %172 = sbr.rel (%p169_p3) target bundleno = 268 (0x10c), region = 32  ;;  %504 = vmatprep.subr.bf16.mxu0 (!%p169_p3), %v583_v0  ;;  %520 = vmatprep.mubr.msk.bf16.mxu0 (!%p169_p3), %vm584_vm0, %v583_v0 }
   0xe   : > { %s661_s12 = smov (!%p206_p4, %s573_s12), 1 }
   0xf   : > { %s486_s16 = sshll.u32 %s661_s12, 6  ;;  %s485_s20 = sshll.u32 %s661_s12, 3 }
  0x10   : > { %s219_s19 = scalar_lea.vmem %s653_s1, %s486_s16  ;;  %s213_s23 = scalar_lea.vmem %s652_s0, %s485_s20 }
  0x11   : > { %v550_v1 = vld [vmem:[%s219_s19] sm:$0xff]   ;;  %v551_v2 = vld [vmem:[%s219_s19 + $0x8] sm:$0xff]   ;;  %v552_v3 = vld [vmem:[%s219_s19 + $0x10] sm:$0xff]   ;;  %s228_s28 = scalar_lea.vmem %s655_s3, %s485_s20 }
  0x12   : > { %505 = vmatpush3.bf16.msra.mxu0 %v550_v1  ;;  %v553_v4 = vld [vmem:[%s219_s19 + $0x18] sm:$0xff]   ;;  %v554_v5 = vld [vmem:[%s219_s19 + $0x20] sm:$0xff]   ;;  %v555_v6 = vld [vmem:[%s219_s19 + $0x28] sm:$0xff]  }
  0x13   : > { %506 = vmatprep.subr.bf16.mxu0 %v583_v0  ;;  %v556_v7 = vld [vmem:[%s219_s19 + $0x30] sm:$0xff]   ;;  %v557_v8 = vld [vmem:[%s219_s19 + $0x38] sm:$0xff]   ;;  %v558_v9 = vld [vmem:[%s213_s23] sm:$0xff]  }
  0x16   : > { %507 = vmatpush3.bf16.msra.mxu0 %v551_v2 }
  0x17   : > { %508 = vmatprep.subr.bf16.mxu0 %v583_v0 }
  0x1a   : > { %509 = vmatpush3.bf16.msra.mxu0 %v552_v3 }
  0x1b   : > { %510 = vmatprep.subr.bf16.mxu0 %v583_v0 }
  0x1e   : > { %511 = vmatpush3.bf16.msra.mxu0 %v553_v4 }
  0x1f   : > { %512 = vmatprep.subr.bf16.mxu0 %v583_v0 }
  0x22   : > { %513 = vmatpush3.bf16.msra.mxu0 %v554_v5 }
  0x23   : > { %514 = vmatprep.subr.bf16.mxu0 %v583_v0 }
  0x26   : > { %515 = vmatpush3.bf16.msra.mxu0 %v555_v6 }
  0x27   : > { %516 = vmatprep.subr.bf16.mxu0 %v583_v0 }
  0x2a   : > { %517 = vmatpush3.bf16.msra.mxu0 %v556_v7 }
  0x2b   : > { %518 = vmatprep.subr.bf16.mxu0 %v583_v0 }
  0x2e   : > { %519 = vmatpush3.bf16.msra.mxu0 %v557_v8 }
  0x31   : > { %521 = vmatmul.mubr.bf16.vlgmr.msra.gmra.mrb[0].mxu0 %v558_v9 }
 0x104   : > { %v344_v11 = vpop.f32.mrb[0].mxu0 }
 0x105   : > { %v522_v12 = vpop.f32.mrb[1].mxu0  ;;  %v345_v14 = vadd.f32 %v471_v10, %v344_v11 }
 0x106   : > { %v347_v13 = vpop.f32.mrb[2].mxu0 }
 0x107   : > { %v348_v15 = vadd.f32 %v471_v10, %v347_v13  ;;  %v523_v16 = vpop.f32.mrb[3].mxu0 }
 0x109   : > { %v493_v17 = vpack.c.bf16 %v348_v15, %v345_v14 }
 0x10b   : > { %494 = vst [vmem:[%s228_s28] sm:$0xff] %v493_v17  }
 0x10c PF: > { %s13_s14 = sadd.s32 1, %s581_s14   ;;  %s656_s12 = smov %s577_s13 }
 0x10d   : > { %p10_p5 = scmp.ge.s32.totalorder %s13_s14, 4   ;;  %s657_s13 = smov %s659_s15 }
 0x10f   :  { %12 = sbr.rel (!%p10_p5) target bundleno = 2 (0x2), region = 65 }

// kernel: effnet_forward.14
= control target key start
LH: loop header
LB: loop body
LE: loop exit
PB: predicated region body
PF: predicated region fallthrough
CT: control target
= control target key end

     0   :  { %s594_s12 = smov 0   ;;  %s596_s13 = smov 0   ;;  %s661_s0 = inlined_call_operand.vmem [shape: bf16[2,16,128], index: 0, kind: input, shape index: {}]   ;;  %s662_s1 = inlined_call_operand.vmem [shape: bf16[1,128,128], index: 1, kind: input, shape index: {}]   ;;  %s663_s2 = inlined_call_operand.vmem [shape: f32[1,128], index: 2, kind: input, shape index: {}]   ;;  %s664_s3 = inlined_call_operand.vmem [shape: bf16[2,16,128], index: 3, kind: output, shape index: {}]  }
   0x1   :  { %s598_s14 = smov 0  }
   0x2 LB: > { %s25_s15 = sadd.s32 1, %s566_s13  ;;  %p446_p0 = scmp.ge.s32.totalorder %s570_s14, 1  ;;  %s570_s14 = sphi %s598_s14, %s13_s14   ;;  %s566_s13 = sphi %s596_s13, %s666_s13   ;;  %s562_s12 = sphi %s594_s12, %s665_s12  }
   0x3   : > { %p27_p1 = scmp.ge.s32.totalorder %s25_s15, 2  ;;  %p158_p2 = scmp.lt.s32.totalorder %s570_s14, 3 }
   0x5   : > { %s668_s15 = smov (%p27_p1, %s25_s15), 0  ;;  %p159_p3 = pnand %p446_p0, %p158_p2 }
   0x6   : > { %v531_v0 = vld [vmem:[%s662_s1] sm:$0xff] (!%p159_p3)   ;;  %v572_v1 = vmov (!%p159_p3), 0.0   ;;  %v532_v2 = vld [vmem:[%s662_s1 + $0x8] sm:$0xff] (!%p159_p3)   ;;  %vm573_vm0 = vmmov (!%p159_p3), 0   ;;  %p191_p4 = scmp.lt.s32.totalorder (!%p159_p3), %s562_s12, 1  ;;  %v533_v3 = vld [vmem:[%s662_s1 + $0x10] sm:$0xff] (!%p159_p3)  }
   0x7   : > { %162 = sbr.rel (%p159_p3) target bundleno = 286 (0x11e), region = 32  ;;  %485 = vmatprep.subr.bf16.mxu0 (!%p159_p3), %v572_v1  ;;  %501 = vmatprep.mubr.msk.bf16.mxu0 (!%p159_p3), %vm573_vm0, %v572_v1  ;;  %v534_v4 = vld [vmem:[%s662_s1 + $0x18] sm:$0xff] (!%p159_p3)   ;;  %v535_v5 = vld [vmem:[%s662_s1 + $0x20] sm:$0xff] (!%p159_p3)   ;;  %v536_v6 = vld [vmem:[%s662_s1 + $0x28] sm:$0xff] (!%p159_p3)  }
   0x8   : > { %486 = vmatpush3.bf16.msra.mxu0 (!%p159_p3), %v531_v0  ;;  %v537_v7 = vld [vmem:[%s662_s1 + $0x30] sm:$0xff] (!%p159_p3)   ;;  %v538_v8 = vld [vmem:[%s662_s1 + $0x38] sm:$0xff] (!%p159_p3)   ;;  %v451_v10 = vld [vmem:[%s663_s2] ss:$0 sm:$0xff] (!%p159_p3) }
   0x9   : > { %487 = vmatprep.subr.bf16.mxu0 (!%p159_p3), %v572_v1 }
   0xc   : > { %488 = vmatpush3.bf16.msra.mxu0 (!%p159_p3), %v532_v2 }
   0xd   : > { %489 = vmatprep.subr.bf16.mxu0 (!%p159_p3), %v572_v1 }
   0xe   : > { %s670_s12 = smov (!%p191_p4, %s562_s12), 1 }
   0xf   : > { %s467_s22 = sshll.u32 %s670_s12, 3 }
  0x10   : > { %s198_s25 = scalar_lea.vmem %s661_s0, %s467_s22  ;;  %490 = vmatpush3.bf16.msra.mxu0 %v533_v3  ;;  %s208_s17 = scalar_lea.vmem %s664_s3, %s467_s22 }
  0x11   : > { %491 = vmatprep.subr.bf16.mxu0 %v572_v1  ;;  %v539_v9 = vld [vmem:[%s198_s25] sm:$0xff]  }
  0x14   : > { %492 = vmatpush3.bf16.msra.mxu0 %v534_v4 }
  0x15   : > { %493 = vmatprep.subr.bf16.mxu0 %v572_v1 }
  0x18   : > { %494 = vmatpush3.bf16.msra.mxu0 %v535_v5 }
  0x19   : > { %495 = vmatprep.subr.bf16.mxu0 %v572_v1 }
  0x1c   : > { %496 = vmatpush3.bf16.msra.mxu0 %v536_v6 }
  0x1d   : > { %497 = vmatprep.subr.bf16.mxu0 %v572_v1 }
  0x20   : > { %498 = vmatpush3.bf16.msra.mxu0 %v537_v7 }
  0x21   : > { %499 = vmatprep.subr.bf16.mxu0 %v572_v1 }
  0x24   : > { %500 = vmatpush3.bf16.msra.mxu0 %v538_v8 }
  0x27   : > { %502 = vmatmul.mubr.bf16.vlgmr.msra.gmra.mrb[0].mxu0 %v539_v9 }
  0xfa   : > { %v324_v11 = vpop.f32.mrb[0].mxu0 }
  0xfb   : > { %v325_v12 = vadd.f32 %v451_v10, %v324_v11  ;;  %v503_v13 = vpop.f32.mrb[1].mxu0 }
  0xfc   : > { %v327_v14 = vpop.f32.mrb[2].mxu0 }
  0xfd   : > { %v461_v15 = vmul.f32 -1.442695, %v325_v12  ;;  %v328_v16 = vadd.f32 %v451_v10, %v327_v14  ;;  %v504_v17 = vpop.f32.mrb[3].mxu0 }
  0xff   : > { %540 = vpow2.f32 %v461_v15  ;;  %v462_v18 = vmul.f32 -1.442695, %v328_v16 }
 0x101   : > { %542 = vpow2.f32 %v462_v18 }
 0x109   : > { %v541_v19 = vpop.eup %540 }
 0x10a   : > { %v337_v20 = vadd.f32 1.0, %v541_v19 }
 0x10b   : > { %v543_v21 = vpop.eup %542 }
 0x10c   : > { %544 = vrcp.f32 %v337_v20  ;;  %v338_v22 = vadd.f32 1.0, %v543_v21 }
 0x10e   : > { %546 = vrcp.f32 %v338_v22 }
 0x116   : > { %v545_v23 = vpop.eup %544 }
 0x117   : > { %v343_v25 = vmul.f32 %v545_v23, %v325_v12 }
 0x118   : > { %v547_v24 = vpop.eup %546 }
 0x119   : > { %v344_v26 = vmul.f32 %v547_v24, %v328_v16 }
 0x11b   : > { %v474_v27 = vpack.c.bf16 %v344_v26, %v343_v25 }
 0x11d   : > { %475 = vst [vmem:[%s208_s17] sm:$0xff] %v474_v27  }
 0x11e PF: > { %s13_s14 = sadd.s32 1, %s570_s14   ;;  %s665_s12 = smov %s566_s13 }
 0x11f   : > { %p10_p5 = scmp.ge.s32.totalorder %s13_s14, 4   ;;  %s666_s13 = smov %s668_s15 }
 0x121   :  { %12 = sbr.rel (!%p10_p5) target bundleno = 2 (0x2), region = 62 }

</bundles_post_ra>
